<compile_context>
chip_gen: v7x
topology: tpu7x:2x2x1
jax: 0.10.0
libtpu: 0.0.40
codegen_flags: <defaults>
</compile_context>

<pallas_src>
import functools

import numpy as np
import jax
import jax.numpy as jnp
from jax import lax
from jax.experimental import pallas as pl
from jax.experimental.pallas import tpu as pltpu


# ----------------------------------------------------------------------------
# Parameter construction (glue): mirrors torchcrf reset_parameters (U(-0.1,0.1))
# followed by CRF.init_crf_transitions for BIO tagging.
# ----------------------------------------------------------------------------
def build_crf_params(tag_names, pad_token, key, imp_value=-100.0):
    num_tags = len(tag_names)
    k1, k2, k3 = jax.random.split(key, 3)
    # np.array(...) copies -> writable buffers (np.asarray of a jax array is read-only).
    start = np.array(jax.random.uniform(k1, (num_tags,), minval=-0.1, maxval=0.1),
                     dtype=np.float32)
    end = np.array(jax.random.uniform(k2, (num_tags,), minval=-0.1, maxval=0.1),
                   dtype=np.float32)
    trans = np.array(jax.random.uniform(k3, (num_tags, num_tags),
                                        minval=-0.1, maxval=0.1), dtype=np.float32)

    prefixes = set(t[0] for t in tag_names if t != pad_token)
    assert prefixes == set(['B', 'I', 'O']), "example uses BIO tagging"
    invalid_begin = ('I',)
    invalid_end = ('B', 'I')
    invalid_transitions_position = {'B': 'P', 'I': 'P', 'O': 'I'}
    invalid_transitions_tags = {'B': 'I', 'I': 'I'}

    for i, name in enumerate(tag_names):
        if name[0] in invalid_begin or name == pad_token:
            start[i] = imp_value
        if name[0] in invalid_end:
            end[i] = imp_value

    tag_is = {p: [i for i, t in enumerate(tag_names) if t[0] == p] for p in prefixes}
    tag_is['P'] = [i for i, t in enumerate(tag_names) if t == 'tag']  # mirrors reference
    for from_tag, to_tag_list in invalid_transitions_position.items():
        for fi in tag_is[from_tag]:
            for to_tag in list(to_tag_list):
                for ti in tag_is[to_tag]:
                    trans[fi, ti] = imp_value
    for from_tag, to_tag_list in invalid_transitions_tags.items():
        for fi in tag_is[from_tag]:
            for to_tag in list(to_tag_list):
                for ti in tag_is[to_tag]:
                    if tag_names[fi].split('-')[1] != tag_names[ti].split('-')[1]:
                        trans[fi, ti] = imp_value
    return jnp.asarray(start), jnp.asarray(end), jnp.asarray(trans)


# ----------------------------------------------------------------------------
# Pallas kernel: gold-path score, forward (log-partition) recursion, Viterbi
# forward + backtrack -- all sequential DP hot paths run in-kernel.
# Layout: emissions (S, T, Bt), tags/dec (S, 1, Bt), hist (S, T, Bt),
#         start/end (T, 1), trans (T, T). Batch lives on lanes.
# ----------------------------------------------------------------------------
def _crf_kernel(em_ref, tags_ref, start_ref, end_ref, trans_ref,
                dec_ref, nll_ref, hist_ref, *, tag_pad_idx):
    S, T, B = em_ref.shape
    pad = jnp.int32(tag_pad_idx)

    start = start_ref[...]              # (T, 1) f32
    end = end_ref[...]                  # (T, 1) f32
    # trans[i, j] = score(i -> j); hoist the (T, T, 1) broadcast out of the loop
    trans3 = trans_ref[...][:, :, None]  # (T_prev, T_cur, 1) f32

    # sequence lengths / last valid tag (assumes mask[:, 0] all True, torchcrf req.)
    tags_all = tags_ref[...]                                     # (S, 1, B) i32
    maskf = (tags_all != pad).astype(jnp.float32)                # (S, 1, B)
    seq_ends = jnp.sum(maskf, axis=0).astype(jnp.int32) - 1      # (1, B)
    t_iota = lax.broadcasted_iota(jnp.int32, (S, 1, B), 0)
    is_end = (t_iota == seq_ends[None]).astype(jnp.float32)
    last_tag = jnp.sum(is_end * tags_all.astype(jnp.float32),
                       axis=0).astype(jnp.int32)                 # (1, B)

    sub_iota = lax.broadcasted_iota(jnp.int32, (T, B), 0)        # tag idx on sublanes
    iota_prev = lax.broadcasted_iota(jnp.int32, (T, T, B), 0)    # prev-tag idx (leading)

    # ------------------------------ time step 0 ------------------------------
    em0 = em_ref[pl.ds(0, 1)][0]                                 # (T, B)
    tags0 = tags_ref[pl.ds(0, 1)][0]                             # (1, B)
    oh0 = (sub_iota == tags0).astype(jnp.float32)                # one-hot gold tag
    init_score = start + em0                                     # (T, B)
    num0 = jnp.sum(init_score * oh0, axis=0, keepdims=True)      # (1, B)

    # ---------- fused gold-path + forward (lse) + Viterbi forward loop ----------
    def fwd_body(t, carry):
        alpha, vit, num, oh_prev = carry
        em_t = em_ref[pl.ds(t, 1)][0]                            # (T, B)
        tags_t = tags_ref[pl.ds(t, 1)][0]                        # (1, B)
        m_t = tags_t != pad                                      # (1, B) bool
        oh_t = (sub_iota == tags_t).astype(jnp.float32)          # (T, B)

        # base[i, j, b] = trans[i, j] + em[t, j, b]; reductions over prev tags
        # run on the LEADING axis -> plain vreg accumulation (no XLU).
        base = trans3 + em_t[None, :, :]                         # (T, T, B)

        # gold-path increment reuses base: sum_{i,j} oh_prev[i] oh_t[j] base[i,j,b]
        sel_prev = jnp.sum(base * oh_prev[:, None, :], axis=0)   # (T, B)
        gold = jnp.sum(sel_prev * oh_t, axis=0, keepdims=True)   # (1, B)
        num_new = num + m_t.astype(jnp.float32) * gold

        # forward recursion (log-sum-exp over prev tags)
        a = base + alpha[:, None, :]                             # (T, T, B)
        amax = jnp.max(a, axis=0)                                # (T, B)
        lse = amax + jnp.log(jnp.sum(jnp.exp(a - amax[None, :, :]), axis=0))
        alpha_new = jnp.where(m_t, lse, alpha)

        # Viterbi recursion (max / first-argmax over prev tags)
        v = base + vit[:, None, :]                               # (T, T, B)
        vmax = jnp.max(v, axis=0)                                # (T, B)
        vidx = jnp.min(jnp.where(v == vmax[None, :, :], iota_prev, T),
                       axis=0).astype(jnp.int32)                 # (T, B)
        vit_new = jnp.where(m_t, vmax, vit)
        hist_ref[pl.ds(t, 1)] = vidx[None]
        return alpha_new, vit_new, num_new, oh_t

    unroll = True if S <= 32 else 4
    alpha, vit, num, _ = lax.fori_loop(1, S, fwd_body,
                                       (init_score, init_score, num0, oh0),
                                       unroll=unroll)

    # gold-path end-transition term
    last_oh = (sub_iota == last_tag).astype(jnp.float32)         # (T, B)
    end_sel = jnp.sum(end * last_oh, axis=0, keepdims=True)      # (1, B)
    numerator = num + end_sel

    # log-partition; per-sequence negative log-likelihood (summed in the wrapper)
    fin = alpha + end                                            # (T, B)
    fmax = jnp.max(fin, axis=0, keepdims=True)
    denominator = fmax + jnp.log(jnp.sum(jnp.exp(fin - fmax), axis=0, keepdims=True))
    nll_ref[...] = denominator - numerator                       # (1, B)

    # ----------------------------- Viterbi backtrack -----------------------------
    vfin = vit + end                                             # (T, B)
    vfmax = jnp.max(vfin, axis=0, keepdims=True)
    best_last = jnp.min(jnp.where(vfin == vfmax, sub_iota, T),
                        axis=0, keepdims=True).astype(jnp.int32)  # (1, B)

    dec_ref[pl.ds(S - 1, 1)] = jnp.where(seq_ends == S - 1, best_last, pad)[None]

    # chain value carried in the loop; each dec row written exactly once, padded.
    # NOTE: hist rows past each seq end are garbage; the `t < seq_ends` guard
    # keeps the backtrack from ever reading them.
    def bwd_body(k, nxt):
        t = S - 2 - k
        h = hist_ref[pl.ds(t + 1, 1)][0]                         # (T, B)
        picked = jnp.sum(jnp.where(sub_iota == nxt, h, 0),
                         axis=0, keepdims=True).astype(jnp.int32)  # (1, B)
        chain = jnp.where(t < seq_ends, picked, best_last)
        dec_ref[pl.ds(t, 1)] = jnp.where(t <= seq_ends, chain, pad)[None]
        return chain

    lax.fori_loop(0, S - 1, bwd_body, best_last, unroll=unroll)


# ----------------------------------------------------------------------------
# Wrapper (glue): layout plumbing, batch-tile selection, pallas_call
# ----------------------------------------------------------------------------
def _pick_batch_tile(S, T, B, budget_bytes=16 * 1024 * 1024):
    """Largest lane-aligned batch tile that divides B and fits the VMEM budget
    (budget leaves headroom under v7x's 64 MiB VMEM and the scoped limit)."""
    if B % 128 != 0:
        return B                      # small / unaligned batch: single block
    t_pad = -(-T // 8) * 8

    def block_bytes(bt):
        em = 2 * S * t_pad * bt * 4   # double-buffered emissions block
        tags = 2 * S * 8 * bt * 4     # (S,1,bt) padded to sublane 8
        hist = S * t_pad * bt * 4     # scratch (single buffer)
        dec = 2 * S * 8 * bt * 4
        return em + tags + hist + dec

    bt = 128
    for mult in (2, 4, 8):
        cand = 128 * mult
        if B % cand == 0 and block_bytes(cand) <= budget_bytes:
            bt = cand
    return bt


def crf_forward(fc_out, tags, start, end, trans, tag_pad_idx, *, batch_tile=None):
    B, S, T = fc_out.shape
    em = jnp.transpose(fc_out, (1, 2, 0)).astype(jnp.float32)        # (S, T, B)
    tags_s1b = jnp.transpose(tags.astype(jnp.int32), (1, 0))[:, None, :]  # (S, 1, B)
    start_c = start.reshape(T, 1).astype(jnp.float32)
    end_c = end.reshape(T, 1).astype(jnp.float32)
    trans_f = trans.astype(jnp.float32)

    bt = batch_tile or _pick_batch_tile(S, T, B)
    assert B % bt == 0
    grid = (B // bt,)

    kernel = functools.partial(_crf_kernel, tag_pad_idx=int(tag_pad_idx))
    dec, nll = pl.pallas_call(
        kernel,
        out_shape=(jax.ShapeDtypeStruct((S, 1, B), jnp.int32),
                   jax.ShapeDtypeStruct((1, B), jnp.float32)),
        grid=grid,
        in_specs=[
            pl.BlockSpec((S, T, bt), lambda g: (0, 0, g)),
            pl.BlockSpec((S, 1, bt), lambda g: (0, 0, g)),
            pl.BlockSpec((T, 1), lambda g: (0, 0)),
            pl.BlockSpec((T, 1), lambda g: (0, 0)),
            pl.BlockSpec((T, T), lambda g: (0, 0)),
        ],
        out_specs=(
            pl.BlockSpec((S, 1, bt), lambda g: (0, 0, g)),
            pl.BlockSpec((1, bt), lambda g: (0, g)),
        ),
        scratch_shapes=[pltpu.VMEM((S, T, bt), jnp.int32)],
        compiler_params=pltpu.CompilerParams(
            dimension_semantics=("parallel",),
            vmem_limit_bytes=48 * 1024 * 1024),
    )(em, tags_s1b, start_c, end_c, trans_f)

    decoded = jnp.transpose(dec[:, 0, :], (1, 0))                    # (B, S)
    loss = jnp.sum(nll)                                              # reduction='sum', negated llh
    return decoded, loss


# ----------------------------------------------------------------------------
# Pure numpy reference (same math as torchcrf) for verification.  The scores
# are grouped as (trans + emission) + state to match the kernel's hoisted
# broadcast bit-for-bit (mathematically identical to torchcrf).
# ----------------------------------------------------------------------------
def _lse(x, axis):
    m = x.max(axis=axis, keepdims=True)
    return np.squeeze(m + np.log(np.exp(x - m).sum(axis=axis, keepdims=True)), axis)


def reference_crf(fc_out, tags, start, end, trans, tag_pad_idx):
    em = np.asarray(fc_out, dtype=np.float32)
    tg = np.asarray(tags)
    st = np.asarray(start); en = np.asarray(end); tr = np.asarray(trans)
    B, S, T = em.shape
    mask = tg != tag_pad_idx
    # numerator
    num = st[tg[:, 0]] + em[np.arange(B), 0, tg[:, 0]]
    for t in range(1, S):
        add = tr[tg[:, t - 1], tg[:, t]] + em[np.arange(B), t, tg[:, t]]
        num = num + add * mask[:, t]
    seq_ends = mask.sum(1) - 1
    num = num + en[tg[np.arange(B), seq_ends]]
    # denominator
    score = st[None, :] + em[:, 0, :]
    for t in range(1, S):
        nxt = _lse((tr[None] + em[:, t, None, :]) + score[:, :, None], axis=1)
        score = np.where(mask[:, t, None], nxt, score)
    den = _lse(score + en[None], axis=1)
    loss = -(num - den).sum()
    # viterbi
    vscore = st[None, :] + em[:, 0, :]
    history = []
    for t in range(1, S):
        cmb = (tr[None] + em[:, t, None, :]) + vscore[:, :, None]
        history.append(cmb.argmax(axis=1))
        vscore = np.where(mask[:, t, None], cmb.max(axis=1), vscore)
    vscore = vscore + en[None]
    decoded = np.full((B, S), tag_pad_idx, dtype=np.int32)
    for b in range(B):
        best = int(vscore[b].argmax())
        path = [best]
        for hist in reversed(history[:seq_ends[b]]):
            best = int(hist[b, path[-1]])
            path.append(best)
        path.reverse()
        decoded[b, :len(path)] = path
    return decoded, np.float32(loss)


if __name__ == "__main__":
    tag_names = ['O', 'B-PER', 'I-PER', 'B-LOC', 'I-LOC', '<pad>']
    pad_token = '<pad>'
    tag_pad_idx = tag_names.index(pad_token)        # 5
    T = len(tag_names)
    B, S = 2, 8

    key = jax.random.PRNGKey(0)
    k_par, k_em, k_tag = jax.random.split(key, 3)
    start, end, trans = build_crf_params(tag_names, pad_token, k_par)

    fc_out = jax.random.normal(k_em, (B, S, T), dtype=jnp.float32)
    lengths = jnp.array([S, 5], dtype=jnp.int32)    # mask[:, 0] must be True (torchcrf)
    raw_tags = jax.random.randint(k_tag, (B, S), 0, T - 1)   # valid tags in [0, T-2]
    pos = jnp.arange(S)[None, :]
    tags = jnp.where(pos < lengths[:, None], raw_tags, tag_pad_idx).astype(jnp.int32)

    decoded, loss = crf_forward(fc_out, tags, start, end, trans, tag_pad_idx)
    decoded = jax.block_until_ready(decoded)
    loss = jax.block_until_ready(loss)

    ref_dec, ref_loss = reference_crf(fc_out, tags, start, end, trans, tag_pad_idx)
    assert np.array_equal(np.asarray(decoded), ref_dec), (decoded, ref_dec)
    assert np.allclose(float(loss), float(ref_loss), rtol=1e-4, atol=1e-3), (loss, ref_loss)

    print("KERNEL_OK")
</pallas_src>

<mosaic_0001>
module attributes {stable_mosaic.version = 11 : i64} {
  func.func @_crf_kernel(%arg0: i32, %arg1: memref<8x6x2xf32, #tpu.memory_space<vmem>>, %arg2: memref<8x1x2xi32, #tpu.memory_space<vmem>>, %arg3: memref<6x1xf32, #tpu.memory_space<vmem>>, %arg4: memref<6x1xf32, #tpu.memory_space<vmem>>, %arg5: memref<6x6xf32, #tpu.memory_space<vmem>>, %arg6: memref<8x1x2xi32, #tpu.memory_space<vmem>>, %arg7: memref<1x2xf32, #tpu.memory_space<vmem>>, %arg8: memref<8x6x2xi32, #tpu.memory_space<vmem>>) attributes {dimension_semantics = [#tpu.dimension_semantics<parallel>], iteration_bounds = array<i64: 1>, scalar_prefetch = 0 : i64, scratch_operands = 1 : i64, tpu.core_type = #tpu.core_type<tc>, window_params = [{transform_indices = @transform_0, window_bounds = array<i64: 8, 6, 2>}, {transform_indices = @transform_1, window_bounds = array<i64: 8, 1, 2>}, {pipeline_mode = #tpu.pipeline_mode<synchronous>, transform_indices = @transform_2, window_bounds = array<i64: 6, 1>}, {pipeline_mode = #tpu.pipeline_mode<synchronous>, transform_indices = @transform_3, window_bounds = array<i64: 6, 1>}, {pipeline_mode = #tpu.pipeline_mode<synchronous>, transform_indices = @transform_4, window_bounds = array<i64: 6, 6>}, {transform_indices = @transform_5, window_bounds = array<i64: 8, 1, 2>}, {transform_indices = @transform_6, window_bounds = array<i64: 1, 2>}]} {
    %c0 = arith.constant 0 : index
    %c0_0 = arith.constant 0 : index
    %0 = vector.load %arg3[%c0, %c0_0] : memref<6x1xf32, #tpu.memory_space<vmem>>, vector<6x1xf32>
    %c0_1 = arith.constant 0 : index
    %c0_2 = arith.constant 0 : index
    %1 = vector.load %arg4[%c0_1, %c0_2] : memref<6x1xf32, #tpu.memory_space<vmem>>, vector<6x1xf32>
    %c0_3 = arith.constant 0 : index
    %c0_4 = arith.constant 0 : index
    %2 = vector.load %arg5[%c0_3, %c0_4] : memref<6x6xf32, #tpu.memory_space<vmem>>, vector<6x6xf32>
    %3 = vector.shape_cast %2 : vector<6x6xf32> to vector<6x6x1xf32>
    %c0_5 = arith.constant 0 : index
    %c0_6 = arith.constant 0 : index
    %c0_7 = arith.constant 0 : index
    %4 = vector.load %arg2[%c0_5, %c0_6, %c0_7] : memref<8x1x2xi32, #tpu.memory_space<vmem>>, vector<8x1x2xi32>
    %c5_i32 = arith.constant 5 : i32
    %5 = vector.broadcast %c5_i32 : i32 to vector<8x1x2xi32>
    %6 = arith.cmpi ne, %4, %5 : vector<8x1x2xi32>
    %7 = arith.extui %6 : vector<8x1x2xi1> to vector<8x1x2xi32>
    %8 = arith.sitofp %7 : vector<8x1x2xi32> to vector<8x1x2xf32>
    %cst = arith.constant dense<0.000000e+00> : vector<1x2xf32>
    %9 = vector.multi_reduction <add>, %8, %cst [0] : vector<8x1x2xf32> to vector<1x2xf32>
    %10 = arith.fptosi %9 : vector<1x2xf32> to vector<1x2xi32>
    %c1_i32 = arith.constant 1 : i32
    %11 = vector.broadcast %c1_i32 : i32 to vector<1x2xi32>
    %12 = arith.subi %10, %11 : vector<1x2xi32>
    %13 = tpu.iota {dimensions = array<i32: 0>} : vector<8x1x2xi32>
    %14 = vector.shape_cast %12 : vector<1x2xi32> to vector<1x1x2xi32>
    %15 = vector.broadcast %14 : vector<1x1x2xi32> to vector<8x1x2xi32>
    %16 = arith.cmpi eq, %13, %15 : vector<8x1x2xi32>
    %17 = arith.extui %16 : vector<8x1x2xi1> to vector<8x1x2xi32>
    %18 = arith.sitofp %17 : vector<8x1x2xi32> to vector<8x1x2xf32>
    %19 = arith.sitofp %4 : vector<8x1x2xi32> to vector<8x1x2xf32>
    %20 = arith.mulf %18, %19 : vector<8x1x2xf32>
    %cst_8 = arith.constant dense<0.000000e+00> : vector<1x2xf32>
    %21 = vector.multi_reduction <add>, %20, %cst_8 [0] : vector<8x1x2xf32> to vector<1x2xf32>
    %22 = arith.fptosi %21 : vector<1x2xf32> to vector<1x2xi32>
    %23 = tpu.iota {dimensions = array<i32: 0>} : vector<6x2xi32>
    %24 = tpu.iota {dimensions = array<i32: 0>} : vector<6x6x2xi32>
    %c0_9 = arith.constant 0 : index
    %c0_10 = arith.constant 0 : index
    %c0_11 = arith.constant 0 : index
    %25 = vector.load %arg1[%c0_9, %c0_10, %c0_11] : memref<8x6x2xf32, #tpu.memory_space<vmem>>, vector<1x6x2xf32>
    %26 = vector.shape_cast %25 : vector<1x6x2xf32> to vector<6x2xf32>
    %c0_12 = arith.constant 0 : index
    %c0_13 = arith.constant 0 : index
    %c0_14 = arith.constant 0 : index
    %27 = vector.load %arg2[%c0_12, %c0_13, %c0_14] : memref<8x1x2xi32, #tpu.memory_space<vmem>>, vector<1x1x2xi32>
    %28 = vector.shape_cast %27 : vector<1x1x2xi32> to vector<1x2xi32>
    %29 = vector.broadcast %28 : vector<1x2xi32> to vector<6x2xi32>
    %30 = arith.cmpi eq, %23, %29 : vector<6x2xi32>
    %31 = arith.extui %30 : vector<6x2xi1> to vector<6x2xi32>
    %32 = arith.sitofp %31 : vector<6x2xi32> to vector<6x2xf32>
    %33 = vector.broadcast %0 : vector<6x1xf32> to vector<6x2xf32>
    %34 = arith.addf %33, %26 : vector<6x2xf32>
    %35 = arith.mulf %34, %32 : vector<6x2xf32>
    %cst_15 = arith.constant dense<0.000000e+00> : vector<2xf32>
    %36 = vector.multi_reduction <add>, %35, %cst_15 [0] : vector<6x2xf32> to vector<2xf32>
    %37 = vector.shape_cast %36 : vector<2xf32> to vector<1x2xf32>
    %c5_i32_16 = arith.constant 5 : i32
    %c1_i32_17 = arith.constant 1 : i32
    %38 = arith.index_cast %c1_i32_17 : i32 to index
    %c0_18 = arith.constant 0 : index
    %c0_19 = arith.constant 0 : index
    %39 = vector.load %arg1[%38, %c0_18, %c0_19] : memref<8x6x2xf32, #tpu.memory_space<vmem>>, vector<1x6x2xf32>
    %40 = vector.shape_cast %39 : vector<1x6x2xf32> to vector<6x2xf32>
    %41 = arith.index_cast %c1_i32_17 : i32 to index
    %c0_20 = arith.constant 0 : index
    %c0_21 = arith.constant 0 : index
    %42 = vector.load %arg2[%41, %c0_20, %c0_21] : memref<8x1x2xi32, #tpu.memory_space<vmem>>, vector<1x1x2xi32>
    %43 = vector.shape_cast %42 : vector<1x1x2xi32> to vector<1x2xi32>
    %44 = vector.broadcast %c5_i32_16 : i32 to vector<1x2xi32>
    %45 = arith.cmpi ne, %43, %44 : vector<1x2xi32>
    %46 = vector.broadcast %43 : vector<1x2xi32> to vector<6x2xi32>
    %47 = arith.cmpi eq, %23, %46 : vector<6x2xi32>
    %48 = arith.extui %47 : vector<6x2xi1> to vector<6x2xi32>
    %49 = arith.sitofp %48 : vector<6x2xi32> to vector<6x2xf32>
    %50 = vector.shape_cast %40 : vector<6x2xf32> to vector<1x6x2xf32>
    %51 = vector.broadcast %3 : vector<6x6x1xf32> to vector<6x6x2xf32>
    %52 = vector.broadcast %50 : vector<1x6x2xf32> to vector<6x6x2xf32>
    %53 = arith.addf %51, %52 : vector<6x6x2xf32>
    %54 = vector.shape_cast %32 : vector<6x2xf32> to vector<6x1x2xf32>
    %55 = vector.broadcast %54 : vector<6x1x2xf32> to vector<6x6x2xf32>
    %56 = arith.mulf %53, %55 : vector<6x6x2xf32>
    %cst_22 = arith.constant dense<0.000000e+00> : vector<6x2xf32>
    %57 = vector.multi_reduction <add>, %56, %cst_22 [0] : vector<6x6x2xf32> to vector<6x2xf32>
    %58 = arith.mulf %57, %49 : vector<6x2xf32>
    %cst_23 = arith.constant dense<0.000000e+00> : vector<2xf32>
    %59 = vector.multi_reduction <add>, %58, %cst_23 [0] : vector<6x2xf32> to vector<2xf32>
    %60 = vector.shape_cast %59 : vector<2xf32> to vector<1x2xf32>
    %61 = arith.extui %45 : vector<1x2xi1> to vector<1x2xi32>
    %62 = arith.sitofp %61 : vector<1x2xi32> to vector<1x2xf32>
    %63 = arith.mulf %62, %60 : vector<1x2xf32>
    %64 = arith.addf %37, %63 : vector<1x2xf32>
    %65 = vector.shape_cast %34 : vector<6x2xf32> to vector<6x1x2xf32>
    %66 = vector.broadcast %65 : vector<6x1x2xf32> to vector<6x6x2xf32>
    %67 = arith.addf %53, %66 : vector<6x6x2xf32>
    %cst_24 = arith.constant dense<0xFF800000> : vector<6x2xf32>
    %68 = vector.multi_reduction <maximumf>, %67, %cst_24 [0] : vector<6x6x2xf32> to vector<6x2xf32>
    %69 = vector.shape_cast %68 : vector<6x2xf32> to vector<1x6x2xf32>
    %70 = vector.broadcast %69 : vector<1x6x2xf32> to vector<6x6x2xf32>
    %71 = arith.subf %67, %70 : vector<6x6x2xf32>
    %72 = math.exp %71 : vector<6x6x2xf32>
    %cst_25 = arith.constant dense<0.000000e+00> : vector<6x2xf32>
    %73 = vector.multi_reduction <add>, %72, %cst_25 [0] : vector<6x6x2xf32> to vector<6x2xf32>
    %74 = math.log %73 : vector<6x2xf32>
    %75 = arith.addf %68, %74 : vector<6x2xf32>
    %76 = vector.shape_cast %45 : vector<1x2xi1> to vector<1x2xi1>
    %77 = vector.broadcast %76 : vector<1x2xi1> to vector<6x2xi1>
    %78 = arith.select %77, %75, %34 : vector<6x2xi1>, vector<6x2xf32>
    %79 = vector.shape_cast %34 : vector<6x2xf32> to vector<6x1x2xf32>
    %80 = vector.broadcast %79 : vector<6x1x2xf32> to vector<6x6x2xf32>
    %81 = arith.addf %53, %80 : vector<6x6x2xf32>
    %cst_26 = arith.constant dense<0xFF800000> : vector<6x2xf32>
    %82 = vector.multi_reduction <maximumf>, %81, %cst_26 [0] : vector<6x6x2xf32> to vector<6x2xf32>
    %83 = vector.shape_cast %82 : vector<6x2xf32> to vector<1x6x2xf32>
    %84 = vector.broadcast %83 : vector<1x6x2xf32> to vector<6x6x2xf32>
    %85 = arith.cmpf oeq, %81, %84 : vector<6x6x2xf32>
    %c6_i32 = arith.constant 6 : i32
    %86 = vector.broadcast %c6_i32 : i32 to vector<6x6x2xi32>
    %87 = arith.select %85, %24, %86 : vector<6x6x2xi1>, vector<6x6x2xi32>
    %cst_27 = arith.constant dense<2147483647> : vector<6x2xi32>
    %88 = vector.multi_reduction <minsi>, %87, %cst_27 [0] : vector<6x6x2xi32> to vector<6x2xi32>
    %89 = vector.shape_cast %45 : vector<1x2xi1> to vector<1x2xi1>
    %90 = vector.broadcast %89 : vector<1x2xi1> to vector<6x2xi1>
    %91 = arith.select %90, %82, %34 : vector<6x2xi1>, vector<6x2xf32>
    %92 = vector.shape_cast %88 : vector<6x2xi32> to vector<1x6x2xi32>
    %93 = arith.index_cast %c1_i32_17 : i32 to index
    %c0_28 = arith.constant 0 : index
    %c0_29 = arith.constant 0 : index
    %94 = vector.load %arg8[%93, %c0_28, %c0_29] : memref<8x6x2xi32, #tpu.memory_space<vmem>>, vector<1x6x2xi32>
    tpu.vector_store %arg8[%93, %c0_28, %c0_29], %92 {strides = array<i32>} : memref<8x6x2xi32, #tpu.memory_space<vmem>>, vector<1x6x2xi32>,
    %c2_i32 = arith.constant 2 : i32
    %95 = arith.index_cast %c2_i32 : i32 to index
    %c0_30 = arith.constant 0 : index
    %c0_31 = arith.constant 0 : index
    %96 = vector.load %arg1[%95, %c0_30, %c0_31] : memref<8x6x2xf32, #tpu.memory_space<vmem>>, vector<1x6x2xf32>
    %97 = vector.shape_cast %96 : vector<1x6x2xf32> to vector<6x2xf32>
    %98 = arith.index_cast %c2_i32 : i32 to index
    %c0_32 = arith.constant 0 : index
    %c0_33 = arith.constant 0 : index
    %99 = vector.load %arg2[%98, %c0_32, %c0_33] : memref<8x1x2xi32, #tpu.memory_space<vmem>>, vector<1x1x2xi32>
    %100 = vector.shape_cast %99 : vector<1x1x2xi32> to vector<1x2xi32>
    %101 = vector.broadcast %c5_i32_16 : i32 to vector<1x2xi32>
    %102 = arith.cmpi ne, %100, %101 : vector<1x2xi32>
    %103 = vector.broadcast %100 : vector<1x2xi32> to vector<6x2xi32>
    %104 = arith.cmpi eq, %23, %103 : vector<6x2xi32>
    %105 = arith.extui %104 : vector<6x2xi1> to vector<6x2xi32>
    %106 = arith.sitofp %105 : vector<6x2xi32> to vector<6x2xf32>
    %107 = vector.shape_cast %97 : vector<6x2xf32> to vector<1x6x2xf32>
    %108 = vector.broadcast %3 : vector<6x6x1xf32> to vector<6x6x2xf32>
    %109 = vector.broadcast %107 : vector<1x6x2xf32> to vector<6x6x2xf32>
    %110 = arith.addf %108, %109 : vector<6x6x2xf32>
    %111 = vector.shape_cast %49 : vector<6x2xf32> to vector<6x1x2xf32>
    %112 = vector.broadcast %111 : vector<6x1x2xf32> to vector<6x6x2xf32>
    %113 = arith.mulf %110, %112 : vector<6x6x2xf32>
    %cst_34 = arith.constant dense<0.000000e+00> : vector<6x2xf32>
    %114 = vector.multi_reduction <add>, %113, %cst_34 [0] : vector<6x6x2xf32> to vector<6x2xf32>
    %115 = arith.mulf %114, %106 : vector<6x2xf32>
    %cst_35 = arith.constant dense<0.000000e+00> : vector<2xf32>
    %116 = vector.multi_reduction <add>, %115, %cst_35 [0] : vector<6x2xf32> to vector<2xf32>
    %117 = vector.shape_cast %116 : vector<2xf32> to vector<1x2xf32>
    %118 = arith.extui %102 : vector<1x2xi1> to vector<1x2xi32>
    %119 = arith.sitofp %118 : vector<1x2xi32> to vector<1x2xf32>
    %120 = arith.mulf %119, %117 : vector<1x2xf32>
    %121 = arith.addf %64, %120 : vector<1x2xf32>
    %122 = vector.shape_cast %78 : vector<6x2xf32> to vector<6x1x2xf32>
    %123 = vector.broadcast %122 : vector<6x1x2xf32> to vector<6x6x2xf32>
    %124 = arith.addf %110, %123 : vector<6x6x2xf32>
    %cst_36 = arith.constant dense<0xFF800000> : vector<6x2xf32>
    %125 = vector.multi_reduction <maximumf>, %124, %cst_36 [0] : vector<6x6x2xf32> to vector<6x2xf32>
    %126 = vector.shape_cast %125 : vector<6x2xf32> to vector<1x6x2xf32>
    %127 = vector.broadcast %126 : vector<1x6x2xf32> to vector<6x6x2xf32>
    %128 = arith.subf %124, %127 : vector<6x6x2xf32>
    %129 = math.exp %128 : vector<6x6x2xf32>
    %cst_37 = arith.constant dense<0.000000e+00> : vector<6x2xf32>
    %130 = vector.multi_reduction <add>, %129, %cst_37 [0] : vector<6x6x2xf32> to vector<6x2xf32>
    %131 = math.log %130 : vector<6x2xf32>
    %132 = arith.addf %125, %131 : vector<6x2xf32>
    %133 = vector.shape_cast %102 : vector<1x2xi1> to vector<1x2xi1>
    %134 = vector.broadcast %133 : vector<1x2xi1> to vector<6x2xi1>
    %135 = arith.select %134, %132, %78 : vector<6x2xi1>, vector<6x2xf32>
    %136 = vector.shape_cast %91 : vector<6x2xf32> to vector<6x1x2xf32>
    %137 = vector.broadcast %136 : vector<6x1x2xf32> to vector<6x6x2xf32>
    %138 = arith.addf %110, %137 : vector<6x6x2xf32>
    %cst_38 = arith.constant dense<0xFF800000> : vector<6x2xf32>
    %139 = vector.multi_reduction <maximumf>, %138, %cst_38 [0] : vector<6x6x2xf32> to vector<6x2xf32>
    %140 = vector.shape_cast %139 : vector<6x2xf32> to vector<1x6x2xf32>
    %141 = vector.broadcast %140 : vector<1x6x2xf32> to vector<6x6x2xf32>
    %142 = arith.cmpf oeq, %138, %141 : vector<6x6x2xf32>
    %c6_i32_39 = arith.constant 6 : i32
    %143 = vector.broadcast %c6_i32_39 : i32 to vector<6x6x2xi32>
    %144 = arith.select %142, %24, %143 : vector<6x6x2xi1>, vector<6x6x2xi32>
    %cst_40 = arith.constant dense<2147483647> : vector<6x2xi32>
    %145 = vector.multi_reduction <minsi>, %144, %cst_40 [0] : vector<6x6x2xi32> to vector<6x2xi32>
    %146 = vector.shape_cast %102 : vector<1x2xi1> to vector<1x2xi1>
    %147 = vector.broadcast %146 : vector<1x2xi1> to vector<6x2xi1>
    %148 = arith.select %147, %139, %91 : vector<6x2xi1>, vector<6x2xf32>
    %149 = vector.shape_cast %145 : vector<6x2xi32> to vector<1x6x2xi32>
    %150 = arith.index_cast %c2_i32 : i32 to index
    %c0_41 = arith.constant 0 : index
    %c0_42 = arith.constant 0 : index
    %151 = vector.load %arg8[%150, %c0_41, %c0_42] : memref<8x6x2xi32, #tpu.memory_space<vmem>>, vector<1x6x2xi32>
    tpu.vector_store %arg8[%150, %c0_41, %c0_42], %149 {strides = array<i32>} : memref<8x6x2xi32, #tpu.memory_space<vmem>>, vector<1x6x2xi32>,
    %c3_i32 = arith.constant 3 : i32
    %152 = arith.index_cast %c3_i32 : i32 to index
    %c0_43 = arith.constant 0 : index
    %c0_44 = arith.constant 0 : index
    %153 = vector.load %arg1[%152, %c0_43, %c0_44] : memref<8x6x2xf32, #tpu.memory_space<vmem>>, vector<1x6x2xf32>
    %154 = vector.shape_cast %153 : vector<1x6x2xf32> to vector<6x2xf32>
    %155 = arith.index_cast %c3_i32 : i32 to index
    %c0_45 = arith.constant 0 : index
    %c0_46 = arith.constant 0 : index
    %156 = vector.load %arg2[%155, %c0_45, %c0_46] : memref<8x1x2xi32, #tpu.memory_space<vmem>>, vector<1x1x2xi32>
    %157 = vector.shape_cast %156 : vector<1x1x2xi32> to vector<1x2xi32>
    %158 = vector.broadcast %c5_i32_16 : i32 to vector<1x2xi32>
    %159 = arith.cmpi ne, %157, %158 : vector<1x2xi32>
    %160 = vector.broadcast %157 : vector<1x2xi32> to vector<6x2xi32>
    %161 = arith.cmpi eq, %23, %160 : vector<6x2xi32>
    %162 = arith.extui %161 : vector<6x2xi1> to vector<6x2xi32>
    %163 = arith.sitofp %162 : vector<6x2xi32> to vector<6x2xf32>
    %164 = vector.shape_cast %154 : vector<6x2xf32> to vector<1x6x2xf32>
    %165 = vector.broadcast %3 : vector<6x6x1xf32> to vector<6x6x2xf32>
    %166 = vector.broadcast %164 : vector<1x6x2xf32> to vector<6x6x2xf32>
    %167 = arith.addf %165, %166 : vector<6x6x2xf32>
    %168 = vector.shape_cast %106 : vector<6x2xf32> to vector<6x1x2xf32>
    %169 = vector.broadcast %168 : vector<6x1x2xf32> to vector<6x6x2xf32>
    %170 = arith.mulf %167, %169 : vector<6x6x2xf32>
    %cst_47 = arith.constant dense<0.000000e+00> : vector<6x2xf32>
    %171 = vector.multi_reduction <add>, %170, %cst_47 [0] : vector<6x6x2xf32> to vector<6x2xf32>
    %172 = arith.mulf %171, %163 : vector<6x2xf32>
    %cst_48 = arith.constant dense<0.000000e+00> : vector<2xf32>
    %173 = vector.multi_reduction <add>, %172, %cst_48 [0] : vector<6x2xf32> to vector<2xf32>
    %174 = vector.shape_cast %173 : vector<2xf32> to vector<1x2xf32>
    %175 = arith.extui %159 : vector<1x2xi1> to vector<1x2xi32>
    %176 = arith.sitofp %175 : vector<1x2xi32> to vector<1x2xf32>
    %177 = arith.mulf %176, %174 : vector<1x2xf32>
    %178 = arith.addf %121, %177 : vector<1x2xf32>
    %179 = vector.shape_cast %135 : vector<6x2xf32> to vector<6x1x2xf32>
    %180 = vector.broadcast %179 : vector<6x1x2xf32> to vector<6x6x2xf32>
    %181 = arith.addf %167, %180 : vector<6x6x2xf32>
    %cst_49 = arith.constant dense<0xFF800000> : vector<6x2xf32>
    %182 = vector.multi_reduction <maximumf>, %181, %cst_49 [0] : vector<6x6x2xf32> to vector<6x2xf32>
    %183 = vector.shape_cast %182 : vector<6x2xf32> to vector<1x6x2xf32>
    %184 = vector.broadcast %183 : vector<1x6x2xf32> to vector<6x6x2xf32>
    %185 = arith.subf %181, %184 : vector<6x6x2xf32>
    %186 = math.exp %185 : vector<6x6x2xf32>
    %cst_50 = arith.constant dense<0.000000e+00> : vector<6x2xf32>
    %187 = vector.multi_reduction <add>, %186, %cst_50 [0] : vector<6x6x2xf32> to vector<6x2xf32>
    %188 = math.log %187 : vector<6x2xf32>
    %189 = arith.addf %182, %188 : vector<6x2xf32>
    %190 = vector.shape_cast %159 : vector<1x2xi1> to vector<1x2xi1>
    %191 = vector.broadcast %190 : vector<1x2xi1> to vector<6x2xi1>
    %192 = arith.select %191, %189, %135 : vector<6x2xi1>, vector<6x2xf32>
    %193 = vector.shape_cast %148 : vector<6x2xf32> to vector<6x1x2xf32>
    %194 = vector.broadcast %193 : vector<6x1x2xf32> to vector<6x6x2xf32>
    %195 = arith.addf %167, %194 : vector<6x6x2xf32>
    %cst_51 = arith.constant dense<0xFF800000> : vector<6x2xf32>
    %196 = vector.multi_reduction <maximumf>, %195, %cst_51 [0] : vector<6x6x2xf32> to vector<6x2xf32>
    %197 = vector.shape_cast %196 : vector<6x2xf32> to vector<1x6x2xf32>
    %198 = vector.broadcast %197 : vector<1x6x2xf32> to vector<6x6x2xf32>
    %199 = arith.cmpf oeq, %195, %198 : vector<6x6x2xf32>
    %c6_i32_52 = arith.constant 6 : i32
    %200 = vector.broadcast %c6_i32_52 : i32 to vector<6x6x2xi32>
    %201 = arith.select %199, %24, %200 : vector<6x6x2xi1>, vector<6x6x2xi32>
    %cst_53 = arith.constant dense<2147483647> : vector<6x2xi32>
    %202 = vector.multi_reduction <minsi>, %201, %cst_53 [0] : vector<6x6x2xi32> to vector<6x2xi32>
    %203 = vector.shape_cast %159 : vector<1x2xi1> to vector<1x2xi1>
    %204 = vector.broadcast %203 : vector<1x2xi1> to vector<6x2xi1>
    %205 = arith.select %204, %196, %148 : vector<6x2xi1>, vector<6x2xf32>
    %206 = vector.shape_cast %202 : vector<6x2xi32> to vector<1x6x2xi32>
    %207 = arith.index_cast %c3_i32 : i32 to index
    %c0_54 = arith.constant 0 : index
    %c0_55 = arith.constant 0 : index
    %208 = vector.load %arg8[%207, %c0_54, %c0_55] : memref<8x6x2xi32, #tpu.memory_space<vmem>>, vector<1x6x2xi32>
    tpu.vector_store %arg8[%207, %c0_54, %c0_55], %206 {strides = array<i32>} : memref<8x6x2xi32, #tpu.memory_space<vmem>>, vector<1x6x2xi32>,
    %c4_i32 = arith.constant 4 : i32
    %209 = arith.index_cast %c4_i32 : i32 to index
    %c0_56 = arith.constant 0 : index
    %c0_57 = arith.constant 0 : index
    %210 = vector.load %arg1[%209, %c0_56, %c0_57] : memref<8x6x2xf32, #tpu.memory_space<vmem>>, vector<1x6x2xf32>
    %211 = vector.shape_cast %210 : vector<1x6x2xf32> to vector<6x2xf32>
    %212 = arith.index_cast %c4_i32 : i32 to index
    %c0_58 = arith.constant 0 : index
    %c0_59 = arith.constant 0 : index
    %213 = vector.load %arg2[%212, %c0_58, %c0_59] : memref<8x1x2xi32, #tpu.memory_space<vmem>>, vector<1x1x2xi32>
    %214 = vector.shape_cast %213 : vector<1x1x2xi32> to vector<1x2xi32>
    %215 = vector.broadcast %c5_i32_16 : i32 to vector<1x2xi32>
    %216 = arith.cmpi ne, %214, %215 : vector<1x2xi32>
    %217 = vector.broadcast %214 : vector<1x2xi32> to vector<6x2xi32>
    %218 = arith.cmpi eq, %23, %217 : vector<6x2xi32>
    %219 = arith.extui %218 : vector<6x2xi1> to vector<6x2xi32>
    %220 = arith.sitofp %219 : vector<6x2xi32> to vector<6x2xf32>
    %221 = vector.shape_cast %211 : vector<6x2xf32> to vector<1x6x2xf32>
    %222 = vector.broadcast %3 : vector<6x6x1xf32> to vector<6x6x2xf32>
    %223 = vector.broadcast %221 : vector<1x6x2xf32> to vector<6x6x2xf32>
    %224 = arith.addf %222, %223 : vector<6x6x2xf32>
    %225 = vector.shape_cast %163 : vector<6x2xf32> to vector<6x1x2xf32>
    %226 = vector.broadcast %225 : vector<6x1x2xf32> to vector<6x6x2xf32>
    %227 = arith.mulf %224, %226 : vector<6x6x2xf32>
    %cst_60 = arith.constant dense<0.000000e+00> : vector<6x2xf32>
    %228 = vector.multi_reduction <add>, %227, %cst_60 [0] : vector<6x6x2xf32> to vector<6x2xf32>
    %229 = arith.mulf %228, %220 : vector<6x2xf32>
    %cst_61 = arith.constant dense<0.000000e+00> : vector<2xf32>
    %230 = vector.multi_reduction <add>, %229, %cst_61 [0] : vector<6x2xf32> to vector<2xf32>
    %231 = vector.shape_cast %230 : vector<2xf32> to vector<1x2xf32>
    %232 = arith.extui %216 : vector<1x2xi1> to vector<1x2xi32>
    %233 = arith.sitofp %232 : vector<1x2xi32> to vector<1x2xf32>
    %234 = arith.mulf %233, %231 : vector<1x2xf32>
    %235 = arith.addf %178, %234 : vector<1x2xf32>
    %236 = vector.shape_cast %192 : vector<6x2xf32> to vector<6x1x2xf32>
    %237 = vector.broadcast %236 : vector<6x1x2xf32> to vector<6x6x2xf32>
    %238 = arith.addf %224, %237 : vector<6x6x2xf32>
    %cst_62 = arith.constant dense<0xFF800000> : vector<6x2xf32>
    %239 = vector.multi_reduction <maximumf>, %238, %cst_62 [0] : vector<6x6x2xf32> to vector<6x2xf32>
    %240 = vector.shape_cast %239 : vector<6x2xf32> to vector<1x6x2xf32>
    %241 = vector.broadcast %240 : vector<1x6x2xf32> to vector<6x6x2xf32>
    %242 = arith.subf %238, %241 : vector<6x6x2xf32>
    %243 = math.exp %242 : vector<6x6x2xf32>
    %cst_63 = arith.constant dense<0.000000e+00> : vector<6x2xf32>
    %244 = vector.multi_reduction <add>, %243, %cst_63 [0] : vector<6x6x2xf32> to vector<6x2xf32>
    %245 = math.log %244 : vector<6x2xf32>
    %246 = arith.addf %239, %245 : vector<6x2xf32>
    %247 = vector.shape_cast %216 : vector<1x2xi1> to vector<1x2xi1>
    %248 = vector.broadcast %247 : vector<1x2xi1> to vector<6x2xi1>
    %249 = arith.select %248, %246, %192 : vector<6x2xi1>, vector<6x2xf32>
    %250 = vector.shape_cast %205 : vector<6x2xf32> to vector<6x1x2xf32>
    %251 = vector.broadcast %250 : vector<6x1x2xf32> to vector<6x6x2xf32>
    %252 = arith.addf %224, %251 : vector<6x6x2xf32>
    %cst_64 = arith.constant dense<0xFF800000> : vector<6x2xf32>
    %253 = vector.multi_reduction <maximumf>, %252, %cst_64 [0] : vector<6x6x2xf32> to vector<6x2xf32>
    %254 = vector.shape_cast %253 : vector<6x2xf32> to vector<1x6x2xf32>
    %255 = vector.broadcast %254 : vector<1x6x2xf32> to vector<6x6x2xf32>
    %256 = arith.cmpf oeq, %252, %255 : vector<6x6x2xf32>
    %c6_i32_65 = arith.constant 6 : i32
    %257 = vector.broadcast %c6_i32_65 : i32 to vector<6x6x2xi32>
    %258 = arith.select %256, %24, %257 : vector<6x6x2xi1>, vector<6x6x2xi32>
    %cst_66 = arith.constant dense<2147483647> : vector<6x2xi32>
    %259 = vector.multi_reduction <minsi>, %258, %cst_66 [0] : vector<6x6x2xi32> to vector<6x2xi32>
    %260 = vector.shape_cast %216 : vector<1x2xi1> to vector<1x2xi1>
    %261 = vector.broadcast %260 : vector<1x2xi1> to vector<6x2xi1>
    %262 = arith.select %261, %253, %205 : vector<6x2xi1>, vector<6x2xf32>
    %263 = vector.shape_cast %259 : vector<6x2xi32> to vector<1x6x2xi32>
    %264 = arith.index_cast %c4_i32 : i32 to index
    %c0_67 = arith.constant 0 : index
    %c0_68 = arith.constant 0 : index
    %265 = vector.load %arg8[%264, %c0_67, %c0_68] : memref<8x6x2xi32, #tpu.memory_space<vmem>>, vector<1x6x2xi32>
    tpu.vector_store %arg8[%264, %c0_67, %c0_68], %263 {strides = array<i32>} : memref<8x6x2xi32, #tpu.memory_space<vmem>>, vector<1x6x2xi32>,
    %c5_i32_69 = arith.constant 5 : i32
    %266 = arith.index_cast %c5_i32_69 : i32 to index
    %c0_70 = arith.constant 0 : index
    %c0_71 = arith.constant 0 : index
    %267 = vector.load %arg1[%266, %c0_70, %c0_71] : memref<8x6x2xf32, #tpu.memory_space<vmem>>, vector<1x6x2xf32>
    %268 = vector.shape_cast %267 : vector<1x6x2xf32> to vector<6x2xf32>
    %269 = arith.index_cast %c5_i32_69 : i32 to index
    %c0_72 = arith.constant 0 : index
    %c0_73 = arith.constant 0 : index
    %270 = vector.load %arg2[%269, %c0_72, %c0_73] : memref<8x1x2xi32, #tpu.memory_space<vmem>>, vector<1x1x2xi32>
    %271 = vector.shape_cast %270 : vector<1x1x2xi32> to vector<1x2xi32>
    %272 = vector.broadcast %c5_i32_16 : i32 to vector<1x2xi32>
    %273 = arith.cmpi ne, %271, %272 : vector<1x2xi32>
    %274 = vector.broadcast %271 : vector<1x2xi32> to vector<6x2xi32>
    %275 = arith.cmpi eq, %23, %274 : vector<6x2xi32>
    %276 = arith.extui %275 : vector<6x2xi1> to vector<6x2xi32>
    %277 = arith.sitofp %276 : vector<6x2xi32> to vector<6x2xf32>
    %278 = vector.shape_cast %268 : vector<6x2xf32> to vector<1x6x2xf32>
    %279 = vector.broadcast %3 : vector<6x6x1xf32> to vector<6x6x2xf32>
    %280 = vector.broadcast %278 : vector<1x6x2xf32> to vector<6x6x2xf32>
    %281 = arith.addf %279, %280 : vector<6x6x2xf32>
    %282 = vector.shape_cast %220 : vector<6x2xf32> to vector<6x1x2xf32>
    %283 = vector.broadcast %282 : vector<6x1x2xf32> to vector<6x6x2xf32>
    %284 = arith.mulf %281, %283 : vector<6x6x2xf32>
    %cst_74 = arith.constant dense<0.000000e+00> : vector<6x2xf32>
    %285 = vector.multi_reduction <add>, %284, %cst_74 [0] : vector<6x6x2xf32> to vector<6x2xf32>
    %286 = arith.mulf %285, %277 : vector<6x2xf32>
    %cst_75 = arith.constant dense<0.000000e+00> : vector<2xf32>
    %287 = vector.multi_reduction <add>, %286, %cst_75 [0] : vector<6x2xf32> to vector<2xf32>
    %288 = vector.shape_cast %287 : vector<2xf32> to vector<1x2xf32>
    %289 = arith.extui %273 : vector<1x2xi1> to vector<1x2xi32>
    %290 = arith.sitofp %289 : vector<1x2xi32> to vector<1x2xf32>
    %291 = arith.mulf %290, %288 : vector<1x2xf32>
    %292 = arith.addf %235, %291 : vector<1x2xf32>
    %293 = vector.shape_cast %249 : vector<6x2xf32> to vector<6x1x2xf32>
    %294 = vector.broadcast %293 : vector<6x1x2xf32> to vector<6x6x2xf32>
    %295 = arith.addf %281, %294 : vector<6x6x2xf32>
    %cst_76 = arith.constant dense<0xFF800000> : vector<6x2xf32>
    %296 = vector.multi_reduction <maximumf>, %295, %cst_76 [0] : vector<6x6x2xf32> to vector<6x2xf32>
    %297 = vector.shape_cast %296 : vector<6x2xf32> to vector<1x6x2xf32>
    %298 = vector.broadcast %297 : vector<1x6x2xf32> to vector<6x6x2xf32>
    %299 = arith.subf %295, %298 : vector<6x6x2xf32>
    %300 = math.exp %299 : vector<6x6x2xf32>
    %cst_77 = arith.constant dense<0.000000e+00> : vector<6x2xf32>
    %301 = vector.multi_reduction <add>, %300, %cst_77 [0] : vector<6x6x2xf32> to vector<6x2xf32>
    %302 = math.log %301 : vector<6x2xf32>
    %303 = arith.addf %296, %302 : vector<6x2xf32>
    %304 = vector.shape_cast %273 : vector<1x2xi1> to vector<1x2xi1>
    %305 = vector.broadcast %304 : vector<1x2xi1> to vector<6x2xi1>
    %306 = arith.select %305, %303, %249 : vector<6x2xi1>, vector<6x2xf32>
    %307 = vector.shape_cast %262 : vector<6x2xf32> to vector<6x1x2xf32>
    %308 = vector.broadcast %307 : vector<6x1x2xf32> to vector<6x6x2xf32>
    %309 = arith.addf %281, %308 : vector<6x6x2xf32>
    %cst_78 = arith.constant dense<0xFF800000> : vector<6x2xf32>
    %310 = vector.multi_reduction <maximumf>, %309, %cst_78 [0] : vector<6x6x2xf32> to vector<6x2xf32>
    %311 = vector.shape_cast %310 : vector<6x2xf32> to vector<1x6x2xf32>
    %312 = vector.broadcast %311 : vector<1x6x2xf32> to vector<6x6x2xf32>
    %313 = arith.cmpf oeq, %309, %312 : vector<6x6x2xf32>
    %c6_i32_79 = arith.constant 6 : i32
    %314 = vector.broadcast %c6_i32_79 : i32 to vector<6x6x2xi32>
    %315 = arith.select %313, %24, %314 : vector<6x6x2xi1>, vector<6x6x2xi32>
    %cst_80 = arith.constant dense<2147483647> : vector<6x2xi32>
    %316 = vector.multi_reduction <minsi>, %315, %cst_80 [0] : vector<6x6x2xi32> to vector<6x2xi32>
    %317 = vector.shape_cast %273 : vector<1x2xi1> to vector<1x2xi1>
    %318 = vector.broadcast %317 : vector<1x2xi1> to vector<6x2xi1>
    %319 = arith.select %318, %310, %262 : vector<6x2xi1>, vector<6x2xf32>
    %320 = vector.shape_cast %316 : vector<6x2xi32> to vector<1x6x2xi32>
    %321 = arith.index_cast %c5_i32_69 : i32 to index
    %c0_81 = arith.constant 0 : index
    %c0_82 = arith.constant 0 : index
    %322 = vector.load %arg8[%321, %c0_81, %c0_82] : memref<8x6x2xi32, #tpu.memory_space<vmem>>, vector<1x6x2xi32>
    tpu.vector_store %arg8[%321, %c0_81, %c0_82], %320 {strides = array<i32>} : memref<8x6x2xi32, #tpu.memory_space<vmem>>, vector<1x6x2xi32>,
    %c6_i32_83 = arith.constant 6 : i32
    %323 = arith.index_cast %c6_i32_83 : i32 to index
    %c0_84 = arith.constant 0 : index
    %c0_85 = arith.constant 0 : index
    %324 = vector.load %arg1[%323, %c0_84, %c0_85] : memref<8x6x2xf32, #tpu.memory_space<vmem>>, vector<1x6x2xf32>
    %325 = vector.shape_cast %324 : vector<1x6x2xf32> to vector<6x2xf32>
    %326 = arith.index_cast %c6_i32_83 : i32 to index
    %c0_86 = arith.constant 0 : index
    %c0_87 = arith.constant 0 : index
    %327 = vector.load %arg2[%326, %c0_86, %c0_87] : memref<8x1x2xi32, #tpu.memory_space<vmem>>, vector<1x1x2xi32>
    %328 = vector.shape_cast %327 : vector<1x1x2xi32> to vector<1x2xi32>
    %329 = vector.broadcast %c5_i32_16 : i32 to vector<1x2xi32>
    %330 = arith.cmpi ne, %328, %329 : vector<1x2xi32>
    %331 = vector.broadcast %328 : vector<1x2xi32> to vector<6x2xi32>
    %332 = arith.cmpi eq, %23, %331 : vector<6x2xi32>
    %333 = arith.extui %332 : vector<6x2xi1> to vector<6x2xi32>
    %334 = arith.sitofp %333 : vector<6x2xi32> to vector<6x2xf32>
    %335 = vector.shape_cast %325 : vector<6x2xf32> to vector<1x6x2xf32>
    %336 = vector.broadcast %3 : vector<6x6x1xf32> to vector<6x6x2xf32>
    %337 = vector.broadcast %335 : vector<1x6x2xf32> to vector<6x6x2xf32>
    %338 = arith.addf %336, %337 : vector<6x6x2xf32>
    %339 = vector.shape_cast %277 : vector<6x2xf32> to vector<6x1x2xf32>
    %340 = vector.broadcast %339 : vector<6x1x2xf32> to vector<6x6x2xf32>
    %341 = arith.mulf %338, %340 : vector<6x6x2xf32>
    %cst_88 = arith.constant dense<0.000000e+00> : vector<6x2xf32>
    %342 = vector.multi_reduction <add>, %341, %cst_88 [0] : vector<6x6x2xf32> to vector<6x2xf32>
    %343 = arith.mulf %342, %334 : vector<6x2xf32>
    %cst_89 = arith.constant dense<0.000000e+00> : vector<2xf32>
    %344 = vector.multi_reduction <add>, %343, %cst_89 [0] : vector<6x2xf32> to vector<2xf32>
    %345 = vector.shape_cast %344 : vector<2xf32> to vector<1x2xf32>
    %346 = arith.extui %330 : vector<1x2xi1> to vector<1x2xi32>
    %347 = arith.sitofp %346 : vector<1x2xi32> to vector<1x2xf32>
    %348 = arith.mulf %347, %345 : vector<1x2xf32>
    %349 = arith.addf %292, %348 : vector<1x2xf32>
    %350 = vector.shape_cast %306 : vector<6x2xf32> to vector<6x1x2xf32>
    %351 = vector.broadcast %350 : vector<6x1x2xf32> to vector<6x6x2xf32>
    %352 = arith.addf %338, %351 : vector<6x6x2xf32>
    %cst_90 = arith.constant dense<0xFF800000> : vector<6x2xf32>
    %353 = vector.multi_reduction <maximumf>, %352, %cst_90 [0] : vector<6x6x2xf32> to vector<6x2xf32>
    %354 = vector.shape_cast %353 : vector<6x2xf32> to vector<1x6x2xf32>
    %355 = vector.broadcast %354 : vector<1x6x2xf32> to vector<6x6x2xf32>
    %356 = arith.subf %352, %355 : vector<6x6x2xf32>
    %357 = math.exp %356 : vector<6x6x2xf32>
    %cst_91 = arith.constant dense<0.000000e+00> : vector<6x2xf32>
    %358 = vector.multi_reduction <add>, %357, %cst_91 [0] : vector<6x6x2xf32> to vector<6x2xf32>
    %359 = math.log %358 : vector<6x2xf32>
    %360 = arith.addf %353, %359 : vector<6x2xf32>
    %361 = vector.shape_cast %330 : vector<1x2xi1> to vector<1x2xi1>
    %362 = vector.broadcast %361 : vector<1x2xi1> to vector<6x2xi1>
    %363 = arith.select %362, %360, %306 : vector<6x2xi1>, vector<6x2xf32>
    %364 = vector.shape_cast %319 : vector<6x2xf32> to vector<6x1x2xf32>
    %365 = vector.broadcast %364 : vector<6x1x2xf32> to vector<6x6x2xf32>
    %366 = arith.addf %338, %365 : vector<6x6x2xf32>
    %cst_92 = arith.constant dense<0xFF800000> : vector<6x2xf32>
    %367 = vector.multi_reduction <maximumf>, %366, %cst_92 [0] : vector<6x6x2xf32> to vector<6x2xf32>
    %368 = vector.shape_cast %367 : vector<6x2xf32> to vector<1x6x2xf32>
    %369 = vector.broadcast %368 : vector<1x6x2xf32> to vector<6x6x2xf32>
    %370 = arith.cmpf oeq, %366, %369 : vector<6x6x2xf32>
    %c6_i32_93 = arith.constant 6 : i32
    %371 = vector.broadcast %c6_i32_93 : i32 to vector<6x6x2xi32>
    %372 = arith.select %370, %24, %371 : vector<6x6x2xi1>, vector<6x6x2xi32>
    %cst_94 = arith.constant dense<2147483647> : vector<6x2xi32>
    %373 = vector.multi_reduction <minsi>, %372, %cst_94 [0] : vector<6x6x2xi32> to vector<6x2xi32>
    %374 = vector.shape_cast %330 : vector<1x2xi1> to vector<1x2xi1>
    %375 = vector.broadcast %374 : vector<1x2xi1> to vector<6x2xi1>
    %376 = arith.select %375, %367, %319 : vector<6x2xi1>, vector<6x2xf32>
    %377 = vector.shape_cast %373 : vector<6x2xi32> to vector<1x6x2xi32>
    %378 = arith.index_cast %c6_i32_83 : i32 to index
    %c0_95 = arith.constant 0 : index
    %c0_96 = arith.constant 0 : index
    %379 = vector.load %arg8[%378, %c0_95, %c0_96] : memref<8x6x2xi32, #tpu.memory_space<vmem>>, vector<1x6x2xi32>
    tpu.vector_store %arg8[%378, %c0_95, %c0_96], %377 {strides = array<i32>} : memref<8x6x2xi32, #tpu.memory_space<vmem>>, vector<1x6x2xi32>,
    %c7_i32 = arith.constant 7 : i32
    %380 = arith.index_cast %c7_i32 : i32 to index
    %c0_97 = arith.constant 0 : index
    %c0_98 = arith.constant 0 : index
    %381 = vector.load %arg1[%380, %c0_97, %c0_98] : memref<8x6x2xf32, #tpu.memory_space<vmem>>, vector<1x6x2xf32>
    %382 = vector.shape_cast %381 : vector<1x6x2xf32> to vector<6x2xf32>
    %383 = arith.index_cast %c7_i32 : i32 to index
    %c0_99 = arith.constant 0 : index
    %c0_100 = arith.constant 0 : index
    %384 = vector.load %arg2[%383, %c0_99, %c0_100] : memref<8x1x2xi32, #tpu.memory_space<vmem>>, vector<1x1x2xi32>
    %385 = vector.shape_cast %384 : vector<1x1x2xi32> to vector<1x2xi32>
    %386 = vector.broadcast %c5_i32_16 : i32 to vector<1x2xi32>
    %387 = arith.cmpi ne, %385, %386 : vector<1x2xi32>
    %388 = vector.broadcast %385 : vector<1x2xi32> to vector<6x2xi32>
    %389 = arith.cmpi eq, %23, %388 : vector<6x2xi32>
    %390 = arith.extui %389 : vector<6x2xi1> to vector<6x2xi32>
    %391 = arith.sitofp %390 : vector<6x2xi32> to vector<6x2xf32>
    %392 = vector.shape_cast %382 : vector<6x2xf32> to vector<1x6x2xf32>
    %393 = vector.broadcast %3 : vector<6x6x1xf32> to vector<6x6x2xf32>
    %394 = vector.broadcast %392 : vector<1x6x2xf32> to vector<6x6x2xf32>
    %395 = arith.addf %393, %394 : vector<6x6x2xf32>
    %396 = vector.shape_cast %334 : vector<6x2xf32> to vector<6x1x2xf32>
    %397 = vector.broadcast %396 : vector<6x1x2xf32> to vector<6x6x2xf32>
    %398 = arith.mulf %395, %397 : vector<6x6x2xf32>
    %cst_101 = arith.constant dense<0.000000e+00> : vector<6x2xf32>
    %399 = vector.multi_reduction <add>, %398, %cst_101 [0] : vector<6x6x2xf32> to vector<6x2xf32>
    %400 = arith.mulf %399, %391 : vector<6x2xf32>
    %cst_102 = arith.constant dense<0.000000e+00> : vector<2xf32>
    %401 = vector.multi_reduction <add>, %400, %cst_102 [0] : vector<6x2xf32> to vector<2xf32>
    %402 = vector.shape_cast %401 : vector<2xf32> to vector<1x2xf32>
    %403 = arith.extui %387 : vector<1x2xi1> to vector<1x2xi32>
    %404 = arith.sitofp %403 : vector<1x2xi32> to vector<1x2xf32>
    %405 = arith.mulf %404, %402 : vector<1x2xf32>
    %406 = arith.addf %349, %405 : vector<1x2xf32>
    %407 = vector.shape_cast %363 : vector<6x2xf32> to vector<6x1x2xf32>
    %408 = vector.broadcast %407 : vector<6x1x2xf32> to vector<6x6x2xf32>
    %409 = arith.addf %395, %408 : vector<6x6x2xf32>
    %cst_103 = arith.constant dense<0xFF800000> : vector<6x2xf32>
    %410 = vector.multi_reduction <maximumf>, %409, %cst_103 [0] : vector<6x6x2xf32> to vector<6x2xf32>
    %411 = vector.shape_cast %410 : vector<6x2xf32> to vector<1x6x2xf32>
    %412 = vector.broadcast %411 : vector<1x6x2xf32> to vector<6x6x2xf32>
    %413 = arith.subf %409, %412 : vector<6x6x2xf32>
    %414 = math.exp %413 : vector<6x6x2xf32>
    %cst_104 = arith.constant dense<0.000000e+00> : vector<6x2xf32>
    %415 = vector.multi_reduction <add>, %414, %cst_104 [0] : vector<6x6x2xf32> to vector<6x2xf32>
    %416 = math.log %415 : vector<6x2xf32>
    %417 = arith.addf %410, %416 : vector<6x2xf32>
    %418 = vector.shape_cast %387 : vector<1x2xi1> to vector<1x2xi1>
    %419 = vector.broadcast %418 : vector<1x2xi1> to vector<6x2xi1>
    %420 = arith.select %419, %417, %363 : vector<6x2xi1>, vector<6x2xf32>
    %421 = vector.shape_cast %376 : vector<6x2xf32> to vector<6x1x2xf32>
    %422 = vector.broadcast %421 : vector<6x1x2xf32> to vector<6x6x2xf32>
    %423 = arith.addf %395, %422 : vector<6x6x2xf32>
    %cst_105 = arith.constant dense<0xFF800000> : vector<6x2xf32>
    %424 = vector.multi_reduction <maximumf>, %423, %cst_105 [0] : vector<6x6x2xf32> to vector<6x2xf32>
    %425 = vector.shape_cast %424 : vector<6x2xf32> to vector<1x6x2xf32>
    %426 = vector.broadcast %425 : vector<1x6x2xf32> to vector<6x6x2xf32>
    %427 = arith.cmpf oeq, %423, %426 : vector<6x6x2xf32>
    %c6_i32_106 = arith.constant 6 : i32
    %428 = vector.broadcast %c6_i32_106 : i32 to vector<6x6x2xi32>
    %429 = arith.select %427, %24, %428 : vector<6x6x2xi1>, vector<6x6x2xi32>
    %cst_107 = arith.constant dense<2147483647> : vector<6x2xi32>
    %430 = vector.multi_reduction <minsi>, %429, %cst_107 [0] : vector<6x6x2xi32> to vector<6x2xi32>
    %431 = vector.shape_cast %387 : vector<1x2xi1> to vector<1x2xi1>
    %432 = vector.broadcast %431 : vector<1x2xi1> to vector<6x2xi1>
    %433 = arith.select %432, %424, %376 : vector<6x2xi1>, vector<6x2xf32>
    %434 = vector.shape_cast %430 : vector<6x2xi32> to vector<1x6x2xi32>
    %435 = arith.index_cast %c7_i32 : i32 to index
    %c0_108 = arith.constant 0 : index
    %c0_109 = arith.constant 0 : index
    %436 = vector.load %arg8[%435, %c0_108, %c0_109] : memref<8x6x2xi32, #tpu.memory_space<vmem>>, vector<1x6x2xi32>
    tpu.vector_store %arg8[%435, %c0_108, %c0_109], %434 {strides = array<i32>} : memref<8x6x2xi32, #tpu.memory_space<vmem>>, vector<1x6x2xi32>,
    %c7_i32_110 = arith.constant 7 : i32
    %437 = vector.broadcast %22 : vector<1x2xi32> to vector<6x2xi32>
    %438 = arith.cmpi eq, %23, %437 : vector<6x2xi32>
    %439 = arith.extui %438 : vector<6x2xi1> to vector<6x2xi32>
    %440 = arith.sitofp %439 : vector<6x2xi32> to vector<6x2xf32>
    %441 = vector.broadcast %1 : vector<6x1xf32> to vector<6x2xf32>
    %442 = arith.mulf %441, %440 : vector<6x2xf32>
    %cst_111 = arith.constant dense<0.000000e+00> : vector<2xf32>
    %443 = vector.multi_reduction <add>, %442, %cst_111 [0] : vector<6x2xf32> to vector<2xf32>
    %444 = vector.shape_cast %443 : vector<2xf32> to vector<1x2xf32>
    %445 = arith.addf %406, %444 : vector<1x2xf32>
    %446 = vector.broadcast %1 : vector<6x1xf32> to vector<6x2xf32>
    %447 = arith.addf %420, %446 : vector<6x2xf32>
    %cst_112 = arith.constant dense<0xFF800000> : vector<2xf32>
    %448 = vector.multi_reduction <maximumf>, %447, %cst_112 [0] : vector<6x2xf32> to vector<2xf32>
    %449 = vector.shape_cast %448 : vector<2xf32> to vector<1x2xf32>
    %450 = vector.broadcast %449 : vector<1x2xf32> to vector<6x2xf32>
    %451 = arith.subf %447, %450 : vector<6x2xf32>
    %452 = math.exp %451 : vector<6x2xf32>
    %cst_113 = arith.constant dense<0.000000e+00> : vector<2xf32>
    %453 = vector.multi_reduction <add>, %452, %cst_113 [0] : vector<6x2xf32> to vector<2xf32>
    %454 = vector.shape_cast %453 : vector<2xf32> to vector<1x2xf32>
    %455 = math.log %454 : vector<1x2xf32>
    %456 = arith.addf %449, %455 : vector<1x2xf32>
    %457 = arith.subf %456, %445 : vector<1x2xf32>
    %c0_114 = arith.constant 0 : index
    %c0_115 = arith.constant 0 : index
    %458 = vector.load %arg7[%c0_114, %c0_115] : memref<1x2xf32, #tpu.memory_space<vmem>>, vector<1x2xf32>
    tpu.vector_store %arg7[%c0_114, %c0_115], %457 {strides = array<i32>} : memref<1x2xf32, #tpu.memory_space<vmem>>, vector<1x2xf32>,
    %459 = vector.broadcast %1 : vector<6x1xf32> to vector<6x2xf32>
    %460 = arith.addf %433, %459 : vector<6x2xf32>
    %cst_116 = arith.constant dense<0xFF800000> : vector<2xf32>
    %461 = vector.multi_reduction <maximumf>, %460, %cst_116 [0] : vector<6x2xf32> to vector<2xf32>
    %462 = vector.shape_cast %461 : vector<2xf32> to vector<1x2xf32>
    %463 = vector.broadcast %462 : vector<1x2xf32> to vector<6x2xf32>
    %464 = arith.cmpf oeq, %460, %463 : vector<6x2xf32>
    %c6_i32_117 = arith.constant 6 : i32
    %465 = vector.broadcast %c6_i32_117 : i32 to vector<6x2xi32>
    %466 = arith.select %464, %23, %465 : vector<6x2xi1>, vector<6x2xi32>
    %cst_118 = arith.constant dense<2147483647> : vector<2xi32>
    %467 = vector.multi_reduction <minsi>, %466, %cst_118 [0] : vector<6x2xi32> to vector<2xi32>
    %468 = vector.shape_cast %467 : vector<2xi32> to vector<1x2xi32>
    %c7_i32_119 = arith.constant 7 : i32
    %469 = vector.broadcast %c7_i32_119 : i32 to vector<1x2xi32>
    %470 = arith.cmpi eq, %12, %469 : vector<1x2xi32>
    %c5_i32_120 = arith.constant 5 : i32
    %471 = vector.broadcast %c5_i32_120 : i32 to vector<1x2xi32>
    %472 = arith.select %470, %468, %471 : vector<1x2xi1>, vector<1x2xi32>
    %473 = vector.shape_cast %472 : vector<1x2xi32> to vector<1x1x2xi32>
    %c7 = arith.constant 7 : index
    %c0_121 = arith.constant 0 : index
    %c0_122 = arith.constant 0 : index
    %474 = vector.load %arg6[%c7, %c0_121, %c0_122] : memref<8x1x2xi32, #tpu.memory_space<vmem>>, vector<1x1x2xi32>
    tpu.vector_store %arg6[%c7, %c0_121, %c0_122], %473 {strides = array<i32>} : memref<8x1x2xi32, #tpu.memory_space<vmem>>, vector<1x1x2xi32>,
    %c5_i32_123 = arith.constant 5 : i32
    %c0_i32 = arith.constant 0 : i32
    %c6_i32_124 = arith.constant 6 : i32
    %475 = arith.subi %c6_i32_124, %c0_i32 : i32
    %c1_i32_125 = arith.constant 1 : i32
    %476 = arith.addi %475, %c1_i32_125 : i32
    %477 = arith.index_cast %476 : i32 to index
    %c0_126 = arith.constant 0 : index
    %c0_127 = arith.constant 0 : index
    %478 = vector.load %arg8[%477, %c0_126, %c0_127] : memref<8x6x2xi32, #tpu.memory_space<vmem>>, vector<1x6x2xi32>
    %479 = vector.shape_cast %478 : vector<1x6x2xi32> to vector<6x2xi32>
    %480 = vector.broadcast %468 : vector<1x2xi32> to vector<6x2xi32>
    %481 = arith.cmpi eq, %23, %480 : vector<6x2xi32>
    %c0_i32_128 = arith.constant 0 : i32
    %482 = vector.broadcast %c0_i32_128 : i32 to vector<6x2xi32>
    %483 = arith.select %481, %479, %482 : vector<6x2xi1>, vector<6x2xi32>
    %cst_129 = arith.constant dense<0> : vector<2xi32>
    %484 = vector.multi_reduction <add>, %483, %cst_129 [0] : vector<6x2xi32> to vector<2xi32>
    %485 = vector.shape_cast %484 : vector<2xi32> to vector<1x2xi32>
    %486 = vector.broadcast %475 : i32 to vector<1x2xi32>
    %487 = arith.cmpi slt, %486, %12 : vector<1x2xi32>
    %488 = arith.select %487, %485, %468 : vector<1x2xi1>, vector<1x2xi32>
    %489 = vector.broadcast %475 : i32 to vector<1x2xi32>
    %490 = arith.cmpi sle, %489, %12 : vector<1x2xi32>
    %491 = vector.broadcast %c5_i32_123 : i32 to vector<1x2xi32>
    %492 = arith.select %490, %488, %491 : vector<1x2xi1>, vector<1x2xi32>
    %493 = vector.shape_cast %492 : vector<1x2xi32> to vector<1x1x2xi32>
    %494 = arith.index_cast %475 : i32 to index
    %c0_130 = arith.constant 0 : index
    %c0_131 = arith.constant 0 : index
    %495 = vector.load %arg6[%494, %c0_130, %c0_131] : memref<8x1x2xi32, #tpu.memory_space<vmem>>, vector<1x1x2xi32>
    tpu.vector_store %arg6[%494, %c0_130, %c0_131], %493 {strides = array<i32>} : memref<8x1x2xi32, #tpu.memory_space<vmem>>, vector<1x1x2xi32>,
    %c1_i32_132 = arith.constant 1 : i32
    %c6_i32_133 = arith.constant 6 : i32
    %496 = arith.subi %c6_i32_133, %c1_i32_132 : i32
    %c1_i32_134 = arith.constant 1 : i32
    %497 = arith.addi %496, %c1_i32_134 : i32
    %498 = arith.index_cast %497 : i32 to index
    %c0_135 = arith.constant 0 : index
    %c0_136 = arith.constant 0 : index
    %499 = vector.load %arg8[%498, %c0_135, %c0_136] : memref<8x6x2xi32, #tpu.memory_space<vmem>>, vector<1x6x2xi32>
    %500 = vector.shape_cast %499 : vector<1x6x2xi32> to vector<6x2xi32>
    %501 = vector.broadcast %488 : vector<1x2xi32> to vector<6x2xi32>
    %502 = arith.cmpi eq, %23, %501 : vector<6x2xi32>
    %c0_i32_137 = arith.constant 0 : i32
    %503 = vector.broadcast %c0_i32_137 : i32 to vector<6x2xi32>
    %504 = arith.select %502, %500, %503 : vector<6x2xi1>, vector<6x2xi32>
    %cst_138 = arith.constant dense<0> : vector<2xi32>
    %505 = vector.multi_reduction <add>, %504, %cst_138 [0] : vector<6x2xi32> to vector<2xi32>
    %506 = vector.shape_cast %505 : vector<2xi32> to vector<1x2xi32>
    %507 = vector.broadcast %496 : i32 to vector<1x2xi32>
    %508 = arith.cmpi slt, %507, %12 : vector<1x2xi32>
    %509 = arith.select %508, %506, %468 : vector<1x2xi1>, vector<1x2xi32>
    %510 = vector.broadcast %496 : i32 to vector<1x2xi32>
    %511 = arith.cmpi sle, %510, %12 : vector<1x2xi32>
    %512 = vector.broadcast %c5_i32_123 : i32 to vector<1x2xi32>
    %513 = arith.select %511, %509, %512 : vector<1x2xi1>, vector<1x2xi32>
    %514 = vector.shape_cast %513 : vector<1x2xi32> to vector<1x1x2xi32>
    %515 = arith.index_cast %496 : i32 to index
    %c0_139 = arith.constant 0 : index
    %c0_140 = arith.constant 0 : index
    %516 = vector.load %arg6[%515, %c0_139, %c0_140] : memref<8x1x2xi32, #tpu.memory_space<vmem>>, vector<1x1x2xi32>
    tpu.vector_store %arg6[%515, %c0_139, %c0_140], %514 {strides = array<i32>} : memref<8x1x2xi32, #tpu.memory_space<vmem>>, vector<1x1x2xi32>,
    %c2_i32_141 = arith.constant 2 : i32
    %c6_i32_142 = arith.constant 6 : i32
    %517 = arith.subi %c6_i32_142, %c2_i32_141 : i32
    %c1_i32_143 = arith.constant 1 : i32
    %518 = arith.addi %517, %c1_i32_143 : i32
    %519 = arith.index_cast %518 : i32 to index
    %c0_144 = arith.constant 0 : index
    %c0_145 = arith.constant 0 : index
    %520 = vector.load %arg8[%519, %c0_144, %c0_145] : memref<8x6x2xi32, #tpu.memory_space<vmem>>, vector<1x6x2xi32>
    %521 = vector.shape_cast %520 : vector<1x6x2xi32> to vector<6x2xi32>
    %522 = vector.broadcast %509 : vector<1x2xi32> to vector<6x2xi32>
    %523 = arith.cmpi eq, %23, %522 : vector<6x2xi32>
    %c0_i32_146 = arith.constant 0 : i32
    %524 = vector.broadcast %c0_i32_146 : i32 to vector<6x2xi32>
    %525 = arith.select %523, %521, %524 : vector<6x2xi1>, vector<6x2xi32>
    %cst_147 = arith.constant dense<0> : vector<2xi32>
    %526 = vector.multi_reduction <add>, %525, %cst_147 [0] : vector<6x2xi32> to vector<2xi32>
    %527 = vector.shape_cast %526 : vector<2xi32> to vector<1x2xi32>
    %528 = vector.broadcast %517 : i32 to vector<1x2xi32>
    %529 = arith.cmpi slt, %528, %12 : vector<1x2xi32>
    %530 = arith.select %529, %527, %468 : vector<1x2xi1>, vector<1x2xi32>
    %531 = vector.broadcast %517 : i32 to vector<1x2xi32>
    %532 = arith.cmpi sle, %531, %12 : vector<1x2xi32>
    %533 = vector.broadcast %c5_i32_123 : i32 to vector<1x2xi32>
    %534 = arith.select %532, %530, %533 : vector<1x2xi1>, vector<1x2xi32>
    %535 = vector.shape_cast %534 : vector<1x2xi32> to vector<1x1x2xi32>
    %536 = arith.index_cast %517 : i32 to index
    %c0_148 = arith.constant 0 : index
    %c0_149 = arith.constant 0 : index
    %537 = vector.load %arg6[%536, %c0_148, %c0_149] : memref<8x1x2xi32, #tpu.memory_space<vmem>>, vector<1x1x2xi32>
    tpu.vector_store %arg6[%536, %c0_148, %c0_149], %535 {strides = array<i32>} : memref<8x1x2xi32, #tpu.memory_space<vmem>>, vector<1x1x2xi32>,
    %c3_i32_150 = arith.constant 3 : i32
    %c6_i32_151 = arith.constant 6 : i32
    %538 = arith.subi %c6_i32_151, %c3_i32_150 : i32
    %c1_i32_152 = arith.constant 1 : i32
    %539 = arith.addi %538, %c1_i32_152 : i32
    %540 = arith.index_cast %539 : i32 to index
    %c0_153 = arith.constant 0 : index
    %c0_154 = arith.constant 0 : index
    %541 = vector.load %arg8[%540, %c0_153, %c0_154] : memref<8x6x2xi32, #tpu.memory_space<vmem>>, vector<1x6x2xi32>
    %542 = vector.shape_cast %541 : vector<1x6x2xi32> to vector<6x2xi32>
    %543 = vector.broadcast %530 : vector<1x2xi32> to vector<6x2xi32>
    %544 = arith.cmpi eq, %23, %543 : vector<6x2xi32>
    %c0_i32_155 = arith.constant 0 : i32
    %545 = vector.broadcast %c0_i32_155 : i32 to vector<6x2xi32>
    %546 = arith.select %544, %542, %545 : vector<6x2xi1>, vector<6x2xi32>
    %cst_156 = arith.constant dense<0> : vector<2xi32>
    %547 = vector.multi_reduction <add>, %546, %cst_156 [0] : vector<6x2xi32> to vector<2xi32>
    %548 = vector.shape_cast %547 : vector<2xi32> to vector<1x2xi32>
    %549 = vector.broadcast %538 : i32 to vector<1x2xi32>
    %550 = arith.cmpi slt, %549, %12 : vector<1x2xi32>
    %551 = arith.select %550, %548, %468 : vector<1x2xi1>, vector<1x2xi32>
    %552 = vector.broadcast %538 : i32 to vector<1x2xi32>
    %553 = arith.cmpi sle, %552, %12 : vector<1x2xi32>
    %554 = vector.broadcast %c5_i32_123 : i32 to vector<1x2xi32>
    %555 = arith.select %553, %551, %554 : vector<1x2xi1>, vector<1x2xi32>
    %556 = vector.shape_cast %555 : vector<1x2xi32> to vector<1x1x2xi32>
    %557 = arith.index_cast %538 : i32 to index
    %c0_157 = arith.constant 0 : index
    %c0_158 = arith.constant 0 : index
    %558 = vector.load %arg6[%557, %c0_157, %c0_158] : memref<8x1x2xi32, #tpu.memory_space<vmem>>, vector<1x1x2xi32>
    tpu.vector_store %arg6[%557, %c0_157, %c0_158], %556 {strides = array<i32>} : memref<8x1x2xi32, #tpu.memory_space<vmem>>, vector<1x1x2xi32>,
    %c4_i32_159 = arith.constant 4 : i32
    %c6_i32_160 = arith.constant 6 : i32
    %559 = arith.subi %c6_i32_160, %c4_i32_159 : i32
    %c1_i32_161 = arith.constant 1 : i32
    %560 = arith.addi %559, %c1_i32_161 : i32
    %561 = arith.index_cast %560 : i32 to index
    %c0_162 = arith.constant 0 : index
    %c0_163 = arith.constant 0 : index
    %562 = vector.load %arg8[%561, %c0_162, %c0_163] : memref<8x6x2xi32, #tpu.memory_space<vmem>>, vector<1x6x2xi32>
    %563 = vector.shape_cast %562 : vector<1x6x2xi32> to vector<6x2xi32>
    %564 = vector.broadcast %551 : vector<1x2xi32> to vector<6x2xi32>
    %565 = arith.cmpi eq, %23, %564 : vector<6x2xi32>
    %c0_i32_164 = arith.constant 0 : i32
    %566 = vector.broadcast %c0_i32_164 : i32 to vector<6x2xi32>
    %567 = arith.select %565, %563, %566 : vector<6x2xi1>, vector<6x2xi32>
    %cst_165 = arith.constant dense<0> : vector<2xi32>
    %568 = vector.multi_reduction <add>, %567, %cst_165 [0] : vector<6x2xi32> to vector<2xi32>
    %569 = vector.shape_cast %568 : vector<2xi32> to vector<1x2xi32>
    %570 = vector.broadcast %559 : i32 to vector<1x2xi32>
    %571 = arith.cmpi slt, %570, %12 : vector<1x2xi32>
    %572 = arith.select %571, %569, %468 : vector<1x2xi1>, vector<1x2xi32>
    %573 = vector.broadcast %559 : i32 to vector<1x2xi32>
    %574 = arith.cmpi sle, %573, %12 : vector<1x2xi32>
    %575 = vector.broadcast %c5_i32_123 : i32 to vector<1x2xi32>
    %576 = arith.select %574, %572, %575 : vector<1x2xi1>, vector<1x2xi32>
    %577 = vector.shape_cast %576 : vector<1x2xi32> to vector<1x1x2xi32>
    %578 = arith.index_cast %559 : i32 to index
    %c0_166 = arith.constant 0 : index
    %c0_167 = arith.constant 0 : index
    %579 = vector.load %arg6[%578, %c0_166, %c0_167] : memref<8x1x2xi32, #tpu.memory_space<vmem>>, vector<1x1x2xi32>
    tpu.vector_store %arg6[%578, %c0_166, %c0_167], %577 {strides = array<i32>} : memref<8x1x2xi32, #tpu.memory_space<vmem>>, vector<1x1x2xi32>,
    %c5_i32_168 = arith.constant 5 : i32
    %c6_i32_169 = arith.constant 6 : i32
    %580 = arith.subi %c6_i32_169, %c5_i32_168 : i32
    %c1_i32_170 = arith.constant 1 : i32
    %581 = arith.addi %580, %c1_i32_170 : i32
    %582 = arith.index_cast %581 : i32 to index
    %c0_171 = arith.constant 0 : index
    %c0_172 = arith.constant 0 : index
    %583 = vector.load %arg8[%582, %c0_171, %c0_172] : memref<8x6x2xi32, #tpu.memory_space<vmem>>, vector<1x6x2xi32>
    %584 = vector.shape_cast %583 : vector<1x6x2xi32> to vector<6x2xi32>
    %585 = vector.broadcast %572 : vector<1x2xi32> to vector<6x2xi32>
    %586 = arith.cmpi eq, %23, %585 : vector<6x2xi32>
    %c0_i32_173 = arith.constant 0 : i32
    %587 = vector.broadcast %c0_i32_173 : i32 to vector<6x2xi32>
    %588 = arith.select %586, %584, %587 : vector<6x2xi1>, vector<6x2xi32>
    %cst_174 = arith.constant dense<0> : vector<2xi32>
    %589 = vector.multi_reduction <add>, %588, %cst_174 [0] : vector<6x2xi32> to vector<2xi32>
    %590 = vector.shape_cast %589 : vector<2xi32> to vector<1x2xi32>
    %591 = vector.broadcast %580 : i32 to vector<1x2xi32>
    %592 = arith.cmpi slt, %591, %12 : vector<1x2xi32>
    %593 = arith.select %592, %590, %468 : vector<1x2xi1>, vector<1x2xi32>
    %594 = vector.broadcast %580 : i32 to vector<1x2xi32>
    %595 = arith.cmpi sle, %594, %12 : vector<1x2xi32>
    %596 = vector.broadcast %c5_i32_123 : i32 to vector<1x2xi32>
    %597 = arith.select %595, %593, %596 : vector<1x2xi1>, vector<1x2xi32>
    %598 = vector.shape_cast %597 : vector<1x2xi32> to vector<1x1x2xi32>
    %599 = arith.index_cast %580 : i32 to index
    %c0_175 = arith.constant 0 : index
    %c0_176 = arith.constant 0 : index
    %600 = vector.load %arg6[%599, %c0_175, %c0_176] : memref<8x1x2xi32, #tpu.memory_space<vmem>>, vector<1x1x2xi32>
    tpu.vector_store %arg6[%599, %c0_175, %c0_176], %598 {strides = array<i32>} : memref<8x1x2xi32, #tpu.memory_space<vmem>>, vector<1x1x2xi32>,
    %c6_i32_177 = arith.constant 6 : i32
    %c6_i32_178 = arith.constant 6 : i32
    %601 = arith.subi %c6_i32_178, %c6_i32_177 : i32
    %c1_i32_179 = arith.constant 1 : i32
    %602 = arith.addi %601, %c1_i32_179 : i32
    %603 = arith.index_cast %602 : i32 to index
    %c0_180 = arith.constant 0 : index
    %c0_181 = arith.constant 0 : index
    %604 = vector.load %arg8[%603, %c0_180, %c0_181] : memref<8x6x2xi32, #tpu.memory_space<vmem>>, vector<1x6x2xi32>
    %605 = vector.shape_cast %604 : vector<1x6x2xi32> to vector<6x2xi32>
    %606 = vector.broadcast %593 : vector<1x2xi32> to vector<6x2xi32>
    %607 = arith.cmpi eq, %23, %606 : vector<6x2xi32>
    %c0_i32_182 = arith.constant 0 : i32
    %608 = vector.broadcast %c0_i32_182 : i32 to vector<6x2xi32>
    %609 = arith.select %607, %605, %608 : vector<6x2xi1>, vector<6x2xi32>
    %cst_183 = arith.constant dense<0> : vector<2xi32>
    %610 = vector.multi_reduction <add>, %609, %cst_183 [0] : vector<6x2xi32> to vector<2xi32>
    %611 = vector.shape_cast %610 : vector<2xi32> to vector<1x2xi32>
    %612 = vector.broadcast %601 : i32 to vector<1x2xi32>
    %613 = arith.cmpi slt, %612, %12 : vector<1x2xi32>
    %614 = arith.select %613, %611, %468 : vector<1x2xi1>, vector<1x2xi32>
    %615 = vector.broadcast %601 : i32 to vector<1x2xi32>
    %616 = arith.cmpi sle, %615, %12 : vector<1x2xi32>
    %617 = vector.broadcast %c5_i32_123 : i32 to vector<1x2xi32>
    %618 = arith.select %616, %614, %617 : vector<1x2xi1>, vector<1x2xi32>
    %619 = vector.shape_cast %618 : vector<1x2xi32> to vector<1x1x2xi32>
    %620 = arith.index_cast %601 : i32 to index
    %c0_184 = arith.constant 0 : index
    %c0_185 = arith.constant 0 : index
    %621 = vector.load %arg6[%620, %c0_184, %c0_185] : memref<8x1x2xi32, #tpu.memory_space<vmem>>, vector<1x1x2xi32>
    tpu.vector_store %arg6[%620, %c0_184, %c0_185], %619 {strides = array<i32>} : memref<8x1x2xi32, #tpu.memory_space<vmem>>, vector<1x1x2xi32>,
    %c7_i32_186 = arith.constant 7 : i32
    return
  }
  func.func @transform_0(%arg0: i32) -> (i32, i32, i32) {
    %c0_i32 = arith.constant 0 : i32
    %c0_i32_0 = arith.constant 0 : i32
    %c0_i32_1 = arith.constant 0 : i32
    return %c0_i32, %c0_i32_0, %arg0 : i32, i32, i32
  }
  func.func @transform_1(%arg0: i32) -> (i32, i32, i32) {
    %c0_i32 = arith.constant 0 : i32
    %c0_i32_0 = arith.constant 0 : i32
    %c0_i32_1 = arith.constant 0 : i32
    return %c0_i32, %c0_i32_0, %arg0 : i32, i32, i32
  }
  func.func @transform_2(%arg0: i32) -> (i32, i32) {
    %c0_i32 = arith.constant 0 : i32
    %c0_i32_0 = arith.constant 0 : i32
    %c0_i32_1 = arith.constant 0 : i32
    return %c0_i32, %c0_i32_0 : i32, i32
  }
  func.func @transform_3(%arg0: i32) -> (i32, i32) {
    %c0_i32 = arith.constant 0 : i32
    %c0_i32_0 = arith.constant 0 : i32
    %c0_i32_1 = arith.constant 0 : i32
    return %c0_i32, %c0_i32_0 : i32, i32
  }
  func.func @transform_4(%arg0: i32) -> (i32, i32) {
    %c0_i32 = arith.constant 0 : i32
    %c0_i32_0 = arith.constant 0 : i32
    %c0_i32_1 = arith.constant 0 : i32
    return %c0_i32, %c0_i32_0 : i32, i32
  }
  func.func @transform_5(%arg0: i32) -> (i32, i32, i32) {
    %c0_i32 = arith.constant 0 : i32
    %c0_i32_0 = arith.constant 0 : i32
    %c0_i32_1 = arith.constant 0 : i32
    return %c0_i32, %c0_i32_0, %arg0 : i32, i32, i32
  }
  func.func @transform_6(%arg0: i32) -> (i32, i32) {
    %c0_i32 = arith.constant 0 : i32
    %c0_i32_0 = arith.constant 0 : i32
    return %c0_i32, %arg0 : i32, i32
  }
}

</mosaic_0001>

<bundles_post_ra>
// kernel: tpu_custom_call.1
= control target key start
LH: loop header
LB: loop body
LE: loop exit
PB: predicated region body
PF: predicated region fallthrough
CT: control target
= control target key end

     0   :  { %v26_v1 = vlaneseq  ;;  %v5026_v2 = vmov 0   ;;  %s5019_s0 = inlined_call_operand.vmem [shape: f32[8,6,2], index: 0, kind: input, shape index: {}]   ;;  %s5020_s1 = inlined_call_operand.vmem [shape: s32[8,1,2], index: 1, kind: input, shape index: {}]   ;;  %s5021_s2 = inlined_call_operand.vmem [shape: f32[6,1], index: 2, kind: input, shape index: {}]   ;;  %s5022_s3 = inlined_call_operand.vmem [shape: f32[6,1], index: 3, kind: input, shape index: {}]   ;;  %s5023_s4 = inlined_call_operand.vmem [shape: f32[6,6], index: 4, kind: input, shape index: {}]   ;;  %s5024_s5 = inlined_call_operand.vmem [shape: s32[8,1,2], index: 5, kind: output, shape index: {0}]   ;;  %s5025_s6 = inlined_call_operand.hbm [shape: f32[1,2], index: 6, kind: output, shape index: {1}]  }
   0x1   :  { %v23_v0 = vld [vmem:[%s5021_s2] sm:$0x3f]  ;;  %3077 = vset.pattern.permute.xlu0 %v5026_v2  ;;  %3078 = vset.pattern.permute.xlu1 %v5026_v2 }
   0x2   :  { %12 = vsyncpa [#allocation4], 0  ;;  %187 = vperm.xlu0 %3077, %v23_v0   ;;  %v3254_v3 = vshrl.u32 %v26_v1, 7  ;;  %v3259_v4 = vld [vmem:[%s5020_s1] sm:$0x1]  ;;  %v5028_v21 = vmov 0.0  }
   0x3   :  { %v25_v5 = vld [vmem:[%s5023_s4] sm:$0x3f]  ;;  %vm76_vm0 = vcmp.ne.s32.totalorder %v3259_v4, 5  ;;  %v3309_v25 = vld [vmem:[%s5020_s1 + $0x6] sm:$0x1]  ;;  %vm100_vm5 = vcmask 8192   ;;  %v142_v53 = vcvt.s32.f32 %v3259_v4 }
   0x4   :  { %5065 = vst [vmem:[#allocation6_spill] sm:$0xff] %v3254_v3  ;;  %v3267_v6 = vld [vmem:[%s5020_s1 + $0x1] sm:$0x1]  ;;  %v3272_v7 = vld [vmem:[%s5020_s1 + $0x2] sm:$0x1]  ;;  %v35_v8 = vsub.s32 1, %v3254_v3 }
   0x5   :  { %v56_v9 = vsub.s32 4, %v3254_v3  ;;  %v3277_v10 = vsub.s32 0, %v3254_v3  ;;  %v3282_v11 = vld [vmem:[%s5020_s1 + $0x3] sm:$0x1]  ;;  %v63_v12 = vsub.s32 5, %v3254_v3  ;;  %vm77_vm1 = vcmp.ne.s32.totalorder %v3267_v6, 5 }
   0x6   :  { %v36_v13 = vrot.slane %v25_v5, %v35_v8  ;;  %v3290_v15 = vld [vmem:[%s5020_s1 + $0x4] sm:$0x1]  ;;  %vm78_vm2 = vcmp.ne.s32.totalorder %v3272_v7, 5  ;;  %v42_v16 = vsub.s32 2, %v3254_v3  ;;  %vm79_vm3 = vcmp.ne.s32.totalorder %v3282_v11, 5 }
   0x7   :  { %v29_v14 = vrot.slane %v25_v5, %v3277_v10  ;;  %v57_v17 = vrot.slane %v25_v5, %v56_v9  ;;  %v64_v18 = vrot.slane %v25_v5, %v63_v12  ;;  %v49_v19 = vsub.s32 3, %v3254_v3  ;;  %v3300_v20 = vld [vmem:[%s5020_s1 + $0x5] sm:$0x1]  ;;  %v3319_v32 = vld [vmem:[%s5020_s1 + $0x7] sm:$0x1] }
   0x8   :  { %38 = vbcast.lane.b32.xlu1 %v36_v13, 256  ;;  %v3013_v22 = vsel %vm76_vm0, 1.0, %v5028_v21  ;;  %vm80_vm4 = vcmp.ne.s32.totalorder %v3290_v15, 5  ;;  %v3014_v23 = vsel %vm77_vm1, 1.0, %v5028_v21  ;;  %v3015_v24 = vsel %vm78_vm2, 1.0, %v5028_v21 }
   0x9   :  { %31 = vbcast.lane.b32.xlu0 %v29_v14, 256  ;;  %v3016_v26 = vsel %vm79_vm3, 1.0, %v5028_v21  ;;  %vm81_vm6 = vcmp.ne.s32.totalorder %v3300_v20, 5  ;;  %v101_v27 = vsel %vm100_vm5, %v3013_v22, 0.0  ;;  %v102_v28 = vsel %vm100_vm5, %v3014_v23, 0.0 }
   0xa   :  { %v104_v29 = vsel %vm100_vm5, %v3015_v24, 0.0  ;;  %v43_v30 = vrot.slane %v25_v5, %v42_v16  ;;  %v50_v31 = vrot.slane %v25_v5, %v49_v19  ;;  %v3017_v33 = vsel %vm80_vm4, 1.0, %v5028_v21  ;;  %v24_v41 = vld [vmem:[%s5022_s3] sm:$0x3f] }
   0xb   :  { %v103_v34 = vadd.f32 %v102_v28, %v101_v27  ;;  %vm82_vm7 = vcmp.ne.s32.totalorder %v3309_v25, 5  ;;  %v106_v35 = vsel %vm100_vm5, %v3016_v26, 0.0  ;;  %v3018_v36 = vsel %vm81_vm6, 1.0, %v5028_v21 }
   0xc   :  { %59 = vbcast.lane.b32.xlu1 %v57_v17, 256  ;;  %vm83_vm8 = vcmp.ne.s32.totalorder %v3319_v32, 5  ;;  %v108_v38 = vsel %vm100_vm5, %v3017_v33, 0.0  ;;  %v3019_v39 = vsel %vm82_vm7, 1.0, %v5028_v21  ;;  %v110_v42 = vsel %vm100_vm5, %v3018_v36, 0.0 }
   0xd   :  { %66 = vbcast.lane.b32.xlu0 %v64_v18, 256  ;;  %v105_v37 = vadd.f32 %v104_v29, %v103_v34  ;;  %v3020_v43 = vsel %vm83_vm8, 1.0, %v5028_v21  ;;  %v112_v45 = vsel %vm100_vm5, %v3019_v39, 0.0  ;;  %v143_v54 = vcvt.s32.f32 %v3267_v6  ;;  %v3030_v34 = vld [vmem:[%s5020_s1] ss:$0 sm:$0xff] }
   0xe   :  { %v114_v47 = vsel %vm100_vm5, %v3020_v43, 0.0  ;;  %v144_v55 = vcvt.s32.f32 %v3272_v7  ;;  %v145_v56 = vcvt.s32.f32 %v3282_v11  ;;  %v146_v57 = vcvt.s32.f32 %v3290_v15  ;;  %v3403_v43 = vld [vmem:[%s5020_s1 + $0x3] sm:$0x1] }
   0xf   :  { %v107_v40 = vadd.f32 %v106_v35, %v105_v37  ;;  %v147_v63 = vcvt.s32.f32 %v3300_v20  ;;  %v148_v7 = vcvt.s32.f32 %v3309_v25  ;;  %v149_v15 = vcvt.s32.f32 %v3319_v32  ;;  %v3379_v35 = vld [vmem:[%s5020_s1 + $0x1] sm:$0x1] }
  0x10   :  { %45 = vbcast.lane.b32.xlu1 %v43_v30, 256  ;;  %v3211_v32 = vmov 1966171168   ;;  %vm182_vm1 = vcmp.eq.s32.totalorder %v3254_v3, %v3030_v34  ;;  %v208_v37 = vrot.slane %v3379_v35, %v3277_v10  ;;  %vm204_vm4 = vcmp.ne.s32.totalorder %v3379_v35, 5  ;;  %v3183_v35 = vld [vmem:[%s5020_s1 + $0x5] ss:$0 sm:$0xff] }
  0x11   :  { %52 = vbcast.lane.b32.xlu0 %v50_v31, 256  ;;  %v109_v44 = vadd.f32 %v108_v38, %v107_v40  ;;  %v221_v33 = vunpack.c.l.s4 %v3211_v32  ;;  %v3387_v38 = vld [vmem:[%s5020_s1 + $0x2] sm:$0x1]  ;;  %v3390_v39 = vsel %vm182_vm1, 1.0, %v5028_v21 }
  0x12   :  { %vm209_vm2 = vcmp.eq.s32.totalorder %v3254_v3, %v208_v37  ;;  %vm493_vm8 = vcmp.ne.s32.totalorder %v3387_v38, 5 }
  0x13   :  { %v111_v46 = vadd.f32 %v110_v42, %v109_v44  ;;  %v222_v36 = vunpack.c.0.s8 %v221_v33  ;;  %v497_v42 = vrot.slane %v3387_v38, %v3277_v10  ;;  %v3508_v33 = vsel %vm204_vm4, 1.0, %v5028_v21  ;;  %v3603_v38 = vld [vmem:[%s5019_s0 + $0x18] sm:$0x3f] }
  0x14   :  { %2802 = vperm.xlu1 %3078, %v24_v41   ;;  %v219_v41 = vcombine.high %v3390_v39, %v3390_v39 }
  0x15   :  { %v113_v48 = vadd.f32 %v112_v45, %v111_v46  ;;  %v3393_v40 = vsub.s32 %v222_v36, %v3254_v3  ;;  %v3408_v45 = vsel %vm209_vm2, 1.0, %v5028_v21  ;;  %vm498_vm3 = vcmp.eq.s32.totalorder %v3254_v3, %v497_v42 }
  0x17   :  { %v115_v49 = vadd.f32 %v114_v47, %v113_v48  ;;  %v226_v44 = vrot.slane %v3390_v39, %v3393_v40  ;;  %v233_v46 = vrot.slane %v219_v41, %v3393_v40  ;;  %v508_v47 = vcombine.high %v3408_v45, %v3408_v45 }
  0x18   :  { %v881_v48 = vrot.slane %v3403_v43, %v3277_v10 }
  0x19   :  { %v3068_v50 = vtrunc.f32 %v115_v49  ;;  %v234_v49 = vcombine.high %v226_v44, %v226_v44 }
  0x1a   :  { %vm882_vm6 = vcmp.eq.s32.totalorder %v3254_v3, %v881_v48 }
  0x1b   :  { %v3069_v51 = vcvt.f32.s32 %v3068_v50  ;;  %v515_v50 = vrot.slane %v3408_v45, %v3393_v40 }
  0x1d   :  { %v3335_v52 = vadd.s32 4294967295, %v3069_v51  ;;  %v235_v51 = vcombine.high %v233_v46, %v233_v46 }
  0x1f   :  { %5066 = vst [vmem:[#allocation7_spill] sm:$0xff] %v3335_v52  ;;  %vm118_vm9 = vcmp.eq.s32.totalorder %v3335_v52, 0  ;;  %vm119_vm10 = vcmp.eq.s32.totalorder %v3335_v52, 1  ;;  %vm120_vm11 = vcmp.eq.s32.totalorder %v3335_v52, 2  ;;  %vm121_vm12 = vcmp.eq.s32.totalorder %v3335_v52, 3 }
  0x20   :  { %vm122_vm13 = vcmp.eq.s32.totalorder %v3335_v52, 4  ;;  %vm123_vm14 = vcmp.eq.s32.totalorder %v3335_v52, 5  ;;  %v3022_v58 = vsel %vm118_vm9, 1.0, %v5028_v21  ;;  %v3023_v59 = vsel %vm119_vm10, 1.0, %v5028_v21 }
  0x21   :  { %v3024_v60 = vsel %vm120_vm11, 1.0, %v5028_v21  ;;  %v3025_v61 = vsel %vm121_vm12, 1.0, %v5028_v21  ;;  %vm124_vm15 = vcmp.eq.s32.totalorder %v3335_v52, 6  ;;  %v3026_v62 = vsel %vm122_vm13, 1.0, %v5028_v21 }
  0x22   :  { %v150_v0 = vmul.f32 %v3022_v58, %v142_v53  ;;  %v151_v1 = vmul.f32 %v3023_v59, %v143_v54  ;;  %v152_v4 = vmul.f32 %v3024_v60, %v144_v55  ;;  %v153_v5 = vmul.f32 %v3025_v61, %v145_v56 }
  0x23   :  { %vm125_vm0 = vcmp.eq.s32.totalorder %v3335_v52, 7  ;;  %v3027_v6 = vsel %vm123_vm14, 1.0, %v5028_v21  ;;  %v154_v8 = vmul.f32 %v3026_v62, %v146_v57  ;;  %v3028_v13 = vsel %vm124_vm15, 1.0, %v5028_v21  ;;  %v3432_v57 = vld [vmem:[%s5020_s1 + $0x4] sm:$0x1] }
  0x24   :  { %v158_v9 = vsel %vm100_vm5, %v150_v0, 0.0  ;;  %v159_v11 = vsel %vm100_vm5, %v151_v1, 0.0  ;;  %v161_v12 = vsel %vm100_vm5, %v152_v4, 0.0  ;;  %v155_v16 = vmul.f32 %v3027_v6, %v147_v63  ;;  %5068 = vst [vmem:[#allocation9_spill] sm:$0xff] %v3432_v57 }
  0x25   :  { %v160_v14 = vadd.f32 %v159_v11, %v158_v9  ;;  %v163_v17 = vsel %vm100_vm5, %v153_v5, 0.0  ;;  %v3029_v18 = vsel %vm125_vm0, 1.0, %v5028_v21  ;;  %v156_v20 = vmul.f32 %v3028_v13, %v148_v7  ;;  %v3672_v13 = vld [vmem:[%s5020_s1 + $0x6] ss:$0 sm:$0xff] }
  0x26   :  { %v165_v22 = vsel %vm100_vm5, %v154_v8, 0.0  ;;  %v157_v24 = vmul.f32 %v3029_v18, %v149_v15  ;;  %v167_v25 = vsel %vm100_vm5, %v155_v16, 0.0  ;;  %v3420_v53 = vrot.slane %v226_v44, %v3393_v40  ;;  %5085 = vst [vmem:[#allocation26_spill] sm:$0xff] %v3672_v13 }
  0x27   :  { %v162_v19 = vadd.f32 %v161_v12, %v160_v14  ;;  %v169_v27 = vsel %vm100_vm5, %v156_v20, 0.0  ;;  %v3423_v54 = vsel %vm498_vm3, 1.0, %v5028_v21  ;;  %v522_v55 = vrot.slane %v508_v47, %v3393_v40 }
  0x28   :  { %v171_v29 = vsel %vm100_vm5, %v157_v24, 0.0  ;;  %v892_v56 = vcombine.high %v3423_v54, %v3423_v54  ;;  %v249_v58 = vrot.slane %v233_v46, %v3393_v40  ;;  %v3436_v59 = vrot.slane %v234_v49, %v3393_v40 }
  0x29   :  { %v164_v23 = vadd.f32 %v163_v17, %v162_v19  ;;  %v3441_v60 = vsel %vm204_vm4, 1, %v5026_v2  ;;  %v523_v61 = vcombine.high %v515_v50, %v515_v50  ;;  %v3444_v62 = vrot.slane %v235_v51, %v3393_v40 }
  0x2a   :  { %v264_v63 = vcombine.high %v3420_v53, %v3420_v53  ;;  %v3449_v0 = vsel %vm882_vm6, 1.0, %v5028_v21  ;;  %v1265_v1 = vrot.slane %v3432_v57, %v3277_v10  ;;  %v265_v4 = vcombine.high %v3436_v59, %v3436_v59 }
  0x2b   :  { %v166_v26 = vadd.f32 %v165_v22, %v164_v23  ;;  %5069 = vst [vmem:[#allocation10_spill] sm:$0xff] %v3449_v0  ;;  %v524_v5 = vcombine.high %v522_v55, %v522_v55  ;;  %v899_v6 = vrot.slane %v3423_v54, %v3393_v40  ;;  %v906_v7 = vrot.slane %v892_v56, %v3393_v40 }
  0x2c   :  { %v3461_v9 = vrot.slane %v249_v58, %v3277_v10  ;;  %v3464_v11 = vrot.slane %v515_v50, %v3393_v40  ;;  %v1276_v12 = vcombine.high %v3449_v0, %v3449_v0  ;;  %v538_v15 = vrot.slane %v522_v55, %v3393_v40 }
  0x2d   :  { %v168_v28 = vadd.f32 %v167_v25, %v166_v26  ;;  %v3474_v16 = vrot.slane %v523_v61, %v3393_v40  ;;  %v3477_v17 = vrot.slane %v264_v63, %v3277_v10  ;;  %vm1266_vm7 = vcmp.eq.s32.totalorder %v3254_v3, %v1265_v1 }
  0x2e   :  { %v3483_v19 = vrot.slane %v265_v4, %v3277_v10  ;;  %v907_v20 = vcombine.high %v899_v6, %v899_v6  ;;  %v908_v22 = vcombine.high %v906_v7, %v906_v7  ;;  %v1283_v23 = vrot.slane %v3449_v0, %v3393_v40 }
  0x2f   :  { %v170_v30 = vadd.f32 %v169_v27, %v168_v28  ;;  %v3488_v24 = vrot.slane %v524_v5, %v3393_v40  ;;  %v553_v25 = vcombine.high %v3464_v11, %v3464_v11  ;;  %v3493_v26 = vrot.slane %v899_v6, %v3393_v40 }
  0x30   :  { %v1290_v27 = vrot.slane %v1276_v12, %v3393_v40  ;;  %v554_v28 = vcombine.high %v3474_v16, %v3474_v16  ;;  %v3503_v32 = vsel %vm1266_vm7, 1.0, %v5028_v21  ;;  %v3511_v34 = vrot.slane %v538_v15, %v3277_v10 }
  0x31   :  { %v3371_v31 = vadd.f32 %v171_v29, %v170_v30  ;;  %5070 = vst [vmem:[#allocation11_spill] sm:$0xff] %v3503_v32  ;;  %v922_v36 = vrot.slane %v906_v7, %v3393_v40  ;;  %v1660_v37 = vcombine.high %v3503_v32, %v3503_v32  ;;  %v3517_v41 = vrot.slane %v907_v20, %v3393_v40 }
  0x32   :  { %v3520_v42 = vrot.slane %v908_v22, %v3393_v40  ;;  %v1291_v44 = vcombine.high %v1283_v23, %v1283_v23  ;;  %v3523_v46 = vrot.slane %v1283_v23, %v3393_v40  ;;  %v3529_v47 = vrot.slane %v553_v25, %v3277_v10 }
  0x33   :  { %5067 = vst [vmem:[#allocation8_spill] sm:$0xff] %v3371_v31  ;;  %v937_v48 = vcombine.high %v3493_v26, %v3493_v26  ;;  %v1292_v49 = vcombine.high %v1290_v27, %v1290_v27  ;;  %v1667_v50 = vrot.slane %v3503_v32, %v3393_v40  ;;  %v3536_v51 = vrot.slane %v554_v28, %v3277_v10 }
  0x34   :  { %5071 = vst [vmem:[#allocation12_spill] sm:$0xff] %v3523_v46  ;;  %v938_v56 = vcombine.high %v3517_v41, %v3517_v41  ;;  %v3546_v61 = vrot.slane %v922_v36, %v3277_v10  ;;  %v1674_v63 = vrot.slane %v1660_v37, %v3393_v40  ;;  %v946_v1 = vrot.slane %v3517_v41, %v3277_v10  ;;  %v3581_v41 = vld [vmem:[%s5019_s0 + $0x8] sm:$0x3f] }
  0x35   :  { %v1313_v5 = vrot.slane %v1291_v44, %v3393_v40  ;;  %v1321_v6 = vcombine.high %v3523_v46, %v3523_v46  ;;  %v3557_v7 = vrot.slane %v937_v48, %v3277_v10  ;;  %v1306_v12 = vrot.slane %v1290_v27, %v3393_v40 }
  0x36   :  { %v3561_v15 = vrot.slane %v1292_v49, %v3393_v40  ;;  %v1675_v20 = vcombine.high %v1667_v50, %v1667_v50  ;;  %v3566_v22 = vsel %vm493_vm8, 1, %v5026_v2  ;;  %v3569_v23 = vrot.slane %v938_v56, %v3277_v10  ;;  %v3620_v56 = vld [vmem:[%s5019_s0 + $0x28] sm:$0x3f] }
  0x37   :  { %v1322_v25 = vcombine.high %v1313_v5, %v1313_v5  ;;  %v3572_v28 = vrot.slane %v1667_v50, %v3393_v40  ;;  %vm1650_vm9 = vcmp.eq.s32.totalorder %v3254_v3, %v3183_v35  ;;  %v1676_v37 = vcombine.high %v1674_v63, %v1674_v63  ;;  %v3596_v50 = vld [vmem:[%s5019_s0 + $0x10] sm:$0x3f] }
  0x38   :  { %5072 = vst [vmem:[#allocation13_spill] sm:$0xff] %v3561_v15  ;;  %v3586_v44 = vsel %vm493_vm8, 1.0, %v5028_v21  ;;  %vm877_vm10 = vcmp.ne.s32.totalorder %v3403_v43, 5  ;;  %v1330_v48 = vrot.slane %v1313_v5, %v3277_v10  ;;  %v3591_v49 = vrot.slane %v1321_v6, %v3277_v10  ;;  %v3608_v5 = vld [vmem:[%s5019_s0 + $0x20] sm:$0x3f] }
  0x39   :  { %5073 = vst [vmem:[#allocation14_spill] sm:$0xff] %v3572_v28  ;;  %5074 = vst [vmem:[#allocation15_spill] sm:$0xff] %v3586_v44  ;;  %vm192_vm11 = vcmask 13312   ;;  %v1342_v6 = vrot.slane %v1306_v12, %v3277_v10  ;;  %v1697_v27 = vrot.slane %v1675_v20, %v3393_v40  ;;  %v3615_v4 = vrot.slane %v1322_v25, %v3277_v10 }
  0x3a   :  { %5075 = vst [vmem:[#allocation16_spill] sm:$0xff] %v3591_v49  ;;  %v3625_v14 = vsel %vm1650_vm9, 1.0, %v5028_v21  ;;  %v1690_v12 = vrot.slane %v1674_v63, %v3393_v40  ;;  %v1705_v36 = vcombine.high %v3572_v28, %v3572_v28  ;;  %v3635_v20 = vsel %vm877_vm10, 1, %v5026_v2 }
  0x3b   :  { %5076 = vst [vmem:[#allocation17_spill] sm:$0xff] %v3615_v4  ;;  %5077 = vst [vmem:[#allocation18_spill] sm:$0xff] %v3625_v14  ;;  %vm1261_vm12 = vcmp.ne.s32.totalorder %v3432_v57, 5  ;;  %v3639_v25 = vrot.slane %v1676_v37, %v3393_v40  ;;  %v1706_v35 = vcombine.high %v1697_v27, %v1697_v27  ;;  %v3660_v37 = vsel %vm877_vm10, 1.0, %v5028_v21 }
  0x3c   :  { %5079 = vst [vmem:[#allocation20_spill] sm:$0xff] %v3635_v20  ;;  %5083 = vst [vmem:[#allocation24_spill] sm:$0xff] %v3660_v37  ;;  %v1714_v30 = vrot.slane %v1697_v27, %v3277_v10  ;;  %v5086_v43 = vrot.slane %v3436_v59, %v3277_v10  ;;  %v5087_v52 = vrot.slane %v3474_v16, %v3277_v10 }
  0x3d   :  { %5080 = vst [vmem:[#allocation21_spill] sm:$0xff] %v3639_v25  ;;  %v3683_v31 = vrot.slane %v1705_v36, %v3277_v10  ;;  %v3686_v27 = vrot.slane %v1690_v12, %v3277_v10 }
  0x3f   :  { %5088 = vst [vmem:[#allocation27_spill] sm:$0xff] %v3683_v31  ;;  %5089 = vst [vmem:[#allocation28_spill] sm:$0xff] %v3686_v27 }
  0x7a   :  { %v3630_v58 = vpop.permute.xlu1 %38 }
  0x7b   :  { %5078 = vst [vmem:[#allocation19_spill] sm:$0xff] %v3630_v58  ;;  %v3643_v55 = vadd.f32 %v3581_v41, %v3630_v58  ;;  %v3647_v63 = vadd.f32 %v3596_v50, %v3630_v58  ;;  %v3651_v18 = vadd.f32 %v3603_v38, %v3630_v58  ;;  %v3655_v2 = vadd.f32 %v3608_v5, %v3630_v58 }
  0x7c   :  { %v3664_v29 = vadd.f32 %v3620_v56, %v3630_v58 }
  0x7d   :  { %5081 = vst [vmem:[#allocation22_spill] sm:$0xff] %v3651_v18  ;;  %5082 = vst [vmem:[#allocation23_spill] sm:$0xff] %v3655_v2  ;;  %v297_v21 = vmul.f32 %v5086_v43, %v3643_v55  ;;  %v586_v3 = vmul.f32 %v5087_v52, %v3647_v63  ;;  %v970_v13 = vmul.f32 %v946_v1, %v3651_v18  ;;  %v176_v52 = vld [vmem:[%s5019_s0] sm:$0x3f]  ;;  %v5093_v43 = vmov 0.0  }
  0x7e   :  { %5084 = vst [vmem:[#allocation25_spill] sm:$0xff] %v3664_v29  ;;  %v3688_v8 = vpop.permute.xlu1 %59  ;;  %v1354_v59 = vmul.f32 %v1330_v48, %v3655_v2  ;;  %v3708_v1 = vrot.slane %v1706_v35, %v3277_v10  ;;  %v3721_v14 = vsel %vm1261_vm12, 1.0, %v5093_v43  ;;  %v3724_v25 = vmul.f32 %v1714_v30, %v3664_v29 }
  0x7f   :  { %v3701_v16 = vadd.f32 %v3581_v41, %v3688_v8  ;;  %v3705_v36 = vadd.f32 %v3596_v50, %v3688_v8  ;;  %v3712_v48 = vadd.f32 %v3603_v38, %v3688_v8  ;;  %v3716_v12 = vadd.f32 %v3608_v5, %v3688_v8  ;;  %5094 = vst [vmem:[#allocation32_spill] sm:$0xff] %v3721_v14 }
  0x80   :  { %5090 = vst [vmem:[#allocation29_spill] sm:$0xff] %v3708_v1  ;;  %5095 = vst [vmem:[#allocation33_spill] sm:$0xff] %v3724_v25  ;;  %v303_v1 = vsel %vm192_vm11, %v297_v21, 0.0  ;;  %v3732_v31 = vsel %vm192_vm11, %v586_v3, 0.0  ;;  %v3743_v29 = vsel %vm192_vm11, %v970_v13, 0.0 }
  0x81   :  { %5091 = vst [vmem:[#allocation30_spill] sm:$0xff] %v3712_v48  ;;  %5092 = vst [vmem:[#allocation31_spill] sm:$0xff] %v3716_v12  ;;  %v188_v27 = vpop.permute.xlu0 %187  ;;  %v300_v35 = vmul.f32 %v3461_v9, %v3701_v16  ;;  %v589_v58 = vmul.f32 %v3511_v34, %v3705_v36  ;;  %v3740_v30 = vmul.f32 %v3546_v61, %v3712_v48  ;;  %v3746_v9 = vsel %vm192_vm11, %v1354_v59, 0.0 }
  0x82   :  { %v3734_v28 = vpop.permute.xlu1 %45  ;;  %v3736_v2 = vadd.f32 %v188_v27, %v176_v52  ;;  %5097 = vst [vmem:[#allocation35_spill] sm:$0xff] %v3746_v9  ;;  %v3758_v27 = vmul.f32 %v1342_v6, %v3716_v12 }
  0x83   :  { %5096 = vst [vmem:[#allocation34_spill] sm:$0xff] %v3734_v28  ;;  %v214_v21 = vadd.f32 %v3581_v41, %v3734_v28  ;;  %v3751_v3 = vsel %vm192_vm11, %v300_v35, 0.0  ;;  %v3755_v34 = vadd.f32 %v3596_v50, %v3734_v28  ;;  %v3767_v52 = vsel %vm192_vm11, %v589_v58, 0.0 }
  0x84   :  { %5098 = vst [vmem:[#allocation36_spill] sm:$0xff] %v3758_v27  ;;  %v191_v13 = vmul.f32 %v3390_v39, %v3736_v2  ;;  %v326_v61 = vcombine.high %v3736_v2, %v3736_v2  ;;  %v333_v59 = vrot.slane %v3736_v2, %v3393_v40  ;;  %v3778_v39 = vadd.f32 %v3603_v38, %v3734_v28 }
  0x85   :  { %v3769_v35 = vpop.permute.xlu0 %31  ;;  %v298_v43 = vmul.f32 %v3477_v17, %v214_v21  ;;  %v3774_v6 = vmul.f32 %v3529_v47, %v3755_v34  ;;  %v3782_v14 = vadd.f32 %v3608_v5, %v3734_v28  ;;  %v5100_v28 = vrot.slane %v3420_v53, %v3277_v10 }
  0x86   :  { %v193_v25 = vsel %vm192_vm11, %v191_v13, 0.0  ;;  %v212_v58 = vadd.f32 %v3581_v41, %v3769_v35  ;;  %v340_v12 = vrot.slane %v326_v61, %v3393_v40  ;;  %v341_v17 = vcombine.high %v333_v59, %v333_v59 }
  0x87   :  { %5099 = vst [vmem:[#allocation37_spill] sm:$0xff] %v3782_v14  ;;  %v194_v32 = vrot.slane %v193_v25, 4  ;;  %v305_v47 = vsel %vm192_vm11, %v298_v43, 0.0  ;;  %v349_v9 = vrot.slane %v333_v59, %v3393_v40  ;;  %v3792_v20 = vadd.f32 %v3596_v50, %v3769_v35 }
  0x88   :  { %v296_v37 = vmul.f32 %v5100_v28, %v212_v58  ;;  %v342_v13 = vcombine.high %v340_v12, %v340_v12  ;;  %v356_v48 = vrot.slane %v340_v12, %v3393_v40  ;;  %v363_v18 = vrot.slane %v341_v17, %v3393_v40 }
  0x89   :  { %v3799_v61 = vpop.permute.xlu0 %66  ;;  %v195_v0 = vadd.f32 %v194_v32, %v193_v25  ;;  %v371_v57 = vcombine.high %v349_v9, %v349_v9  ;;  %v376_v43 = vrot.slane %v349_v9, %v3277_v10  ;;  %v5101_v59 = vrot.slane %v3464_v11, %v3277_v10 }
  0x8a   :  { %v217_v53 = vadd.f32 %v3581_v41, %v3799_v61  ;;  %v302_v28 = vsel %vm192_vm11, %v296_v37, 0.0  ;;  %v370_v12 = vrot.slane %v342_v13, %v3393_v40  ;;  %v372_v15 = vcombine.high %v363_v18, %v363_v18 }
  0x8b   :  { %v585_v44 = vmul.f32 %v5101_v59, %v3792_v20  ;;  %v196_v17 = vrot.slane %v195_v0, 2  ;;  %v304_v4 = vadd.f32 %v303_v1, %v302_v28  ;;  %v380_v32 = vrot.slane %v363_v18, %v3277_v10 }
  0x8c   :  { %v384_v25 = vrot.slane %v371_v57, %v3277_v10  ;;  %v5102_v9 = vrot.slane %v3444_v62, %v3277_v10  ;;  %v388_v11 = vrot.slane %v372_v15, %v3277_v10  ;;  %v392_v59 = vrot.slane %v356_v48, %v3277_v10 }
  0x8d   :  { %v396_v27 = vrot.slane %v370_v12, %v3277_v10  ;;  %v3818_v37 = vpop.permute.xlu0 %52  ;;  %v197_v13 = vadd.f32 %v196_v17, %v195_v0  ;;  %v306_v49 = vadd.f32 %v305_v47, %v304_v4  ;;  %v3820_v14 = vadd.f32 %v376_v43, %v212_v58 }
  0x8e   :  { %v301_v46 = vmul.f32 %v5102_v9, %v217_v53  ;;  %v3823_v18 = vadd.f32 %v380_v32, %v3643_v55  ;;  %v215_v57 = vadd.f32 %v3581_v41, %v3818_v37  ;;  %v3828_v1 = vadd.f32 %v384_v25, %v214_v21 }
  0x8f   :  { %v3831_v15 = vadd.f32 %v392_v59, %v3701_v16  ;;  %v198_v48 = vrot.slane %v197_v13, 1  ;;  %v3833_v28 = vadd.f32 %v396_v27, %v217_v53  ;;  %v409_v0 = vsel %vm192_vm11, %v3820_v14, -inf }
  0x90   :  { %v311_v62 = vsel %vm192_vm11, %v301_v46, 0.0  ;;  %v410_v55 = vsel %vm192_vm11, %v3823_v18, -inf  ;;  %v299_v4 = vmul.f32 %v3483_v19, %v215_v57  ;;  %v3840_v58 = vadd.f32 %v388_v11, %v215_v57 }
  0x91   :  { %v411_v46 = vsel %vm192_vm11, %v3828_v1, -inf  ;;  %v413_v41 = vsel %vm192_vm11, %v3831_v15, -inf  ;;  %v3846_v16 = vadd.f32 %v198_v48, %v197_v13  ;;  %v415_v27 = vsel %vm192_vm11, %v3833_v28, -inf }
  0x92   :  { %v414_v21 = vmax.f32 %v409_v0, %v413_v41  ;;  %v3852_v47 = vadd.f32 %v3596_v50, %v3818_v37  ;;  %v307_v19 = vsel %vm192_vm11, %v299_v4, 0.0  ;;  %v412_v43 = vsel %vm192_vm11, %v3840_v58, -inf }
  0x93   :  { %v416_v53 = vmax.f32 %v410_v55, %v415_v27  ;;  %v3859_v12 = vadd.f32 %v3596_v50, %v3799_v61  ;;  %v308_v17 = vadd.f32 %v307_v19, %v306_v49  ;;  %v418_v32 = vmax.f32 %v411_v46, %v412_v43 }
  0x94   :  { %v588_v25 = vmul.f32 %v3536_v51, %v3852_v47  ;;  %v591_v9 = vsel %vm192_vm11, %v585_v44, 0.0  ;;  %v5103_v59 = vrot.slane %v3488_v24, %v3277_v10  ;;  %v594_v48 = vsel %vm192_vm11, %v3774_v6, 0.0 }
  0x95   :  { %v417_v11 = vmax.f32 %v414_v21, %v416_v53  ;;  %v593_v57 = vadd.f32 %v3732_v31, %v591_v9  ;;  %v310_v50 = vadd.f32 %v3751_v3, %v308_v17  ;;  %v3877_v51 = vadd.f32 %v3603_v38, %v3769_v35 }
  0x96   :  { %v590_v13 = vmul.f32 %v5103_v59, %v3859_v12  ;;  %v3873_v49 = vsel %vm192_vm11, %v588_v25, 0.0  ;;  %v3881_v44 = vadd.f32 %v3603_v38, %v3818_v37  ;;  %v3890_v3 = vadd.f32 %v3603_v38, %v3799_v61 }
  0x97   :  { %v3883_v24 = vmax.f32 %v417_v11, %v418_v32  ;;  %v595_v0 = vadd.f32 %v594_v48, %v593_v57  ;;  %v312_v6 = vadd.f32 %v311_v62, %v310_v50  ;;  %v5104_v55 = vrot.slane %v3493_v26, %v3277_v10 }
  0x98   :  { %v3886_v31 = vsel %vm192_vm11, %v590_v13, 0.0  ;;  %v3898_v46 = vmul.f32 %v3557_v7, %v3778_v39  ;;  %v3902_v41 = vmul.f32 %v3569_v23, %v3881_v44  ;;  %v5105_v7 = vrot.slane %v3441_v60, %v3277_v10 }
  0x99   :  { %v969_v4 = vmul.f32 %v5104_v55, %v3877_v51  ;;  %v420_v21 = vsub.f32 %v3820_v14, %v3883_v24  ;;  %v421_v38 = vsub.f32 %v3823_v18, %v3883_v24  ;;  %v422_v62 = vsub.f32 %v3828_v1, %v3883_v24 }
  0x9a   :  { %v423_v26 = vsub.f32 %v3840_v58, %v3883_v24  ;;  %vm3915_vm13 = vcmp.eq.s32.totalorder %v5105_v7, 1  ;;  %v313_v23 = vmul.f32 %v3408_v45, %v312_v6  ;;  %v424_v19 = vsub.f32 %v3831_v15, %v3883_v24 }
  0x9b   :  { %v425_v43 = vsub.f32 %v3833_v28, %v3883_v24  ;;  %vm458_vm14 = vcmp.eq.f32.partialorder %v3820_v14, %v3883_v24  ;;  %v426_v53 = vmul.f32 1.442695, %v420_v21  ;;  %v428_v17 = vmul.f32 1.442695, %v421_v38 }
  0x9c   :  { %v430_v32 = vmul.f32 1.442695, %v422_v62  ;;  %vm459_vm15 = vcmp.eq.f32.partialorder %v3823_v18, %v3883_v24  ;;  %v314_v60 = vsel %vm192_vm11, %v313_v23, 0.0  ;;  %v432_v25 = vmul.f32 1.442695, %v423_v26 }
  0x9d   :  { %v434_v9 = vmul.f32 1.442695, %v424_v19  ;;  %vm460_vm1 = vcmp.eq.f32.partialorder %v3828_v1, %v3883_v24  ;;  %v315_v45 = vrot.slane %v314_v60, 4  ;;  %3079 = vpow2.f32 %v426_v53 }
  0x9e   :  { %v436_v11 = vmul.f32 1.442695, %v425_v43  ;;  %vm461_vm2 = vcmp.eq.f32.partialorder %v3840_v58, %v3883_v24  ;;  %3081 = vpow2.f32 %v428_v17  ;;  %vm462_vm3 = vcmp.eq.f32.partialorder %v3831_v15, %v3883_v24 }
  0x9f   :  { %vm463_vm4 = vcmp.eq.f32.partialorder %v3833_v28, %v3883_v24  ;;  %v5059_v59 = vmov 6   ;;  %v316_v1 = vadd.f32 %v315_v45, %v314_v60  ;;  %3083 = vpow2.f32 %v430_v32 }
  0xa0   :  { %v464_v13 = vsel %vm458_vm14, 0, %v5059_v59  ;;  %v465_v58 = vsel %vm459_vm15, 1, %v5059_v59  ;;  %v466_v57 = vsel %vm460_vm1, 2, %v5059_v59  ;;  %3085 = vpow2.f32 %v432_v25 }
  0xa1   :  { %v467_v15 = vsel %vm461_vm2, 3, %v5059_v59  ;;  %v468_v28 = vsel %vm462_vm3, 4, %v5059_v59  ;;  %v469_v48 = vsel %vm463_vm4, 5, %v5059_v59  ;;  %v317_v50 = vrot.slane %v316_v1, 2 }
  0xa2   :  { %3087 = vpow2.f32 %v434_v9  ;;  %v470_v14 = vsel %vm192_vm11, %v464_v13, 2147483647  ;;  %v471_v6 = vsel %vm192_vm11, %v465_v58, 2147483647  ;;  %v472_v55 = vsel %vm192_vm11, %v466_v57, 2147483647 }
  0xa3   :  { %3089 = vpow2.f32 %v436_v11  ;;  %v473_v18 = vsel %vm192_vm11, %v467_v15, 2147483647  ;;  %v474_v21 = vsel %vm192_vm11, %v468_v28, 2147483647  ;;  %v318_v38 = vadd.f32 %v317_v50, %v316_v1 }
  0xa4   :  { %vm475_vm6 = vcmp.lt.s32.totalorder %v470_v14, %v474_v21  ;;  %v477_v62 = vsel %vm192_vm11, %v469_v48, 2147483647  ;;  %vm482_vm7 = vcmp.lt.s32.totalorder %v472_v55, %v473_v18  ;;  %v3959_v23 = vsel %vm3915_vm13, %v3883_v24, %v3736_v2 }
  0xa5   :  { %v476_v26 = vsel %vm475_vm6, %v470_v14, %v474_v21  ;;  %vm478_vm8 = vcmp.lt.s32.totalorder %v471_v6, %v477_v62  ;;  %v483_v7 = vsel %vm482_vm7, %v472_v55, %v473_v18  ;;  %v319_v19 = vrot.slane %v318_v38, 1 }
  0xa6   :  { %v479_v43 = vsel %vm478_vm8, %v471_v6, %v477_v62  ;;  %v597_v53 = vadd.f32 %v3873_v49, %v595_v0  ;;  %v748_v17 = vcombine.high %v3959_v23, %v3959_v23  ;;  %v755_v32 = vrot.slane %v3959_v23, %v3393_v40 }
  0xa7   :  { %vm480_vm9 = vcmp.lt.s32.totalorder %v476_v26, %v479_v43  ;;  %v5108_v60 = vrot.slane %v3520_v42, %v3277_v10  ;;  %v975_v9 = vsel %vm192_vm11, %v969_v4, 0.0  ;;  %v3080_v45 = vpop.eup %3079  ;;  %v320_v11 = vadd.f32 %v319_v19, %v318_v38 }
  0xa8   :  { %v481_v13 = vsel %vm480_vm9, %v476_v26, %v479_v43  ;;  %v599_v49 = vadd.f32 %v3767_v52, %v597_v53  ;;  %v762_v0 = vrot.slane %v748_v17, %v3393_v40  ;;  %v3082_v1 = vpop.eup %3081  ;;  %v438_v58 = vsel %vm192_vm11, %v3080_v45, 0.0 }
  0xa9   :  { %v3970_v25 = vmul.f32 %v5108_v60, %v3890_v3  ;;  %vm484_vm10 = vcmp.lt.s32.totalorder %v481_v13, %v483_v7  ;;  %v763_v57 = vcombine.high %v755_v32, %v755_v32  ;;  %v771_v15 = vrot.slane %v755_v32, %v3393_v40  ;;  %v3084_v28 = vpop.eup %3083 }
  0xaa   :  { %v323_v42 = vmul.f32 %v3508_v33, %v320_v11  ;;  %v439_v48 = vsel %vm192_vm11, %v3082_v1, 0.0  ;;  %v485_v4 = vsel %vm484_vm10, %v481_v13, %v483_v7  ;;  %v601_v50 = vadd.f32 %v3886_v31, %v599_v49  ;;  %v3086_v14 = vpop.eup %3085 }
  0xab   :  { %v440_v6 = vadd.f32 %v439_v48, %v438_v58  ;;  %v441_v52 = vsel %vm192_vm11, %v3084_v28, 0.0  ;;  %488 = vst.msk [vmem:[#allocation2 + $0x8] sm:$0x3f] %vm192_vm11, %v485_v4  ;;  %v764_v55 = vcombine.high %v762_v0, %v762_v0  ;;  %v778_v18 = vrot.slane %v762_v0, %v3393_v40 }
  0xac   :  { %v3088_v21 = vpop.eup %3087  ;;  %v3984_v38 = vadd.f32 %v323_v42, %v3846_v16  ;;  %v443_v33 = vsel %vm192_vm11, %v3086_v14, 0.0  ;;  %v602_v62 = vmul.f32 %v3423_v54, %v601_v50  ;;  %v785_v26 = vrot.slane %v763_v57, %v3393_v40 }
  0xad   :  { %v3090_v31 = vpop.eup %3089  ;;  %v442_v7 = vadd.f32 %v441_v52, %v440_v6  ;;  %v445_v19 = vsel %vm192_vm11, %v3088_v21, 0.0  ;;  %v792_v43 = vrot.slane %v764_v55, %v3393_v40  ;;  %v793_v53 = vcombine.high %v771_v15, %v771_v15 }
  0xae   :  { %v447_v17 = vsel %vm192_vm11, %v3090_v31, 0.0  ;;  %v603_v32 = vsel %vm192_vm11, %v602_v62, 0.0  ;;  %v794_v60 = vcombine.high %v785_v26, %v785_v26  ;;  %v798_v16 = vrot.slane %v771_v15, %v3277_v10 }
  0xaf   :  { %v444_v45 = vadd.f32 %v443_v33, %v442_v7  ;;  %v604_v11 = vrot.slane %v603_v32, 4  ;;  %v802_v54 = vrot.slane %v785_v26, %v3277_v10  ;;  %v806_v13 = vrot.slane %v793_v53, %v3277_v10 }
  0xb0   :  { %v810_v49 = vrot.slane %v794_v60, %v3277_v10  ;;  %v814_v0 = vrot.slane %v778_v18, %v3277_v10  ;;  %v818_v1 = vrot.slane %v792_v43, %v3277_v10  ;;  %v825_v58 = vadd.f32 %v798_v16, %v3792_v20 }
  0xb1   :  { %v446_v57 = vadd.f32 %v445_v19, %v444_v45  ;;  %v605_v28 = vadd.f32 %v604_v11, %v603_v32  ;;  %v826_v42 = vadd.f32 %v802_v54, %v3647_v63  ;;  %v827_v15 = vadd.f32 %v806_v13, %v3755_v34 }
  0xb2   :  { %v828_v48 = vadd.f32 %v810_v49, %v3852_v47  ;;  %v829_v4 = vadd.f32 %v814_v0, %v3705_v36  ;;  %v830_v50 = vadd.f32 %v818_v1, %v3859_v12  ;;  %v831_v14 = vsel %vm192_vm11, %v825_v58, -inf  ;;  %v5112_v0 = vld [vmem:[#allocation37_spill] sm:$0xff] }
  0xb3   :  { %v448_v6 = vadd.f32 %v447_v17, %v446_v57  ;;  %v606_v52 = vrot.slane %v605_v28, 2  ;;  %v832_v55 = vsel %vm192_vm11, %v826_v42, -inf  ;;  %v833_v18 = vsel %vm192_vm11, %v827_v15, -inf  ;;  %v5114_v57 = vld [vmem:[#allocation36_spill] sm:$0xff] }
  0xb4   :  { %v5109_v21 = vrot.slane %v3566_v22, %v3277_v10  ;;  %v834_v62 = vsel %vm192_vm11, %v828_v48, -inf  ;;  %v835_v26 = vsel %vm192_vm11, %v829_v4, -inf  ;;  %v837_v31 = vsel %vm192_vm11, %v830_v50, -inf }
  0xb5   :  { %v977_v7 = vadd.f32 %v3743_v29, %v975_v9  ;;  %3091 = vlog2.f32 %v448_v6  ;;  %v607_v19 = vadd.f32 %v606_v52, %v605_v28  ;;  %v836_v43 = vmax.f32 %v831_v14, %v835_v26  ;;  %v5120_v26 = vld [vmem:[#allocation15_spill] sm:$0xff] }
  0xb6   :  { %vm4011_vm14 = vcmp.eq.s32.totalorder %v5109_v21, 1  ;;  %v838_v53 = vmax.f32 %v832_v55, %v837_v31  ;;  %v840_v17 = vmax.f32 %v833_v18, %v834_v62  ;;  %v978_v22 = vsel %vm192_vm11, %v3898_v46, 0.0  ;;  %v5117_v55 = vld [vmem:[#allocation17_spill] sm:$0xff] }
  0xb7   :  { %v982_v32 = vsel %vm192_vm11, %v3740_v30, 0.0  ;;  %v4025_v60 = vadd.f32 %v3620_v56, %v3688_v8  ;;  %v608_v16 = vrot.slane %v607_v19, 1  ;;  %v980_v29 = vsel %vm192_vm11, %v3902_v41, 0.0  ;;  %v5113_v41 = vld [vmem:[#allocation16_spill] sm:$0xff] }
  0xb8   :  { %v839_v45 = vmax.f32 %v836_v43, %v838_v53  ;;  %v4031_v9 = vadd.f32 %v3608_v5, %v3769_v35  ;;  %v979_v11 = vadd.f32 %v978_v22, %v977_v7  ;;  %v984_v46 = vsel %vm192_vm11, %v3970_v25, 0.0  ;;  %v5115_v25 = vld [vmem:[#allocation12_spill] sm:$0xff] }
  0xb9   :  { %v4037_v30 = vadd.f32 %v3608_v5, %v3818_v37  ;;  %v4041_v54 = vadd.f32 %v3608_v5, %v3799_v61  ;;  %v609_v13 = vadd.f32 %v608_v16, %v607_v19  ;;  %v1355_v1 = vmul.f32 %v5113_v41, %v5112_v0  ;;  %v5118_v5 = vld [vmem:[#allocation13_spill] sm:$0xff] }
  0xba   :  { %v841_v49 = vmax.f32 %v839_v45, %v840_v17  ;;  %v4047_v28 = vsel %vm192_vm11, %v5114_v57, 0.0  ;;  %v981_v14 = vadd.f32 %v980_v29, %v979_v11  ;;  %v5116_v6 = vrot.slane %v5115_v25, %v3277_v10 }
  0xbb   :  { %v4055_v18 = vmul.f32 %v5117_v55, %v4037_v30  ;;  %v5119_v21 = vrot.slane %v5118_v5, %v3277_v10  ;;  %v612_v31 = vmul.f32 %v5120_v26, %v609_v13  ;;  %v4085_v41 = vsel %vm192_vm11, %v1355_v1, 0.0 }
  0xbc   :  { %v1353_v52 = vmul.f32 %v5116_v6, %v4031_v9  ;;  %vm842_vm15 = vcmp.eq.f32.partialorder %v825_v58, %v841_v49  ;;  %vm843_vm1 = vcmp.eq.f32.partialorder %v826_v42, %v841_v49  ;;  %vm844_vm2 = vcmp.eq.f32.partialorder %v827_v15, %v841_v49 }
  0xbd   :  { %v4061_v62 = vmul.f32 %v5119_v21, %v4041_v54  ;;  %vm845_vm3 = vcmp.eq.f32.partialorder %v828_v48, %v841_v49  ;;  %vm846_vm4 = vcmp.eq.f32.partialorder %v829_v4, %v841_v49  ;;  %vm847_vm6 = vcmp.eq.f32.partialorder %v830_v50, %v841_v49 }
  0xbe   :  { %v848_v7 = vsel %vm842_vm15, 0, %v5059_v59  ;;  %v4066_v19 = vadd.f32 %v612_v31, %v3984_v38  ;;  %v849_v43 = vsel %vm843_vm1, 1, %v5059_v59  ;;  %v850_v53 = vsel %vm844_vm2, 2, %v5059_v59 }
  0xbf   :  { %v851_v17 = vsel %vm845_vm3, 3, %v5059_v59  ;;  %v852_v22 = vsel %vm846_vm4, 4, %v5059_v59  ;;  %v853_v58 = vsel %vm847_vm6, 5, %v5059_v59  ;;  %v854_v42 = vsel %vm192_vm11, %v848_v7, 2147483647  ;;  %v3092_v48 = vpop.eup %3091  ;;  %v5123_v7 = vld [vmem:[#allocation10_spill] sm:$0xff] }
  0xc0   :  { %v855_v15 = vsel %vm192_vm11, %v849_v43, 2147483647  ;;  %v856_v4 = vsel %vm192_vm11, %v850_v53, 2147483647  ;;  %v857_v38 = vsel %vm192_vm11, %v851_v17, 2147483647  ;;  %v4081_v16 = vsel %vm4011_vm14, %v841_v49, %v3959_v23 }
  0xc1   :  { %v858_v50 = vsel %vm192_vm11, %v852_v22, 2147483647  ;;  %v450_v45 = vmul.f32 0.6931472, %v3092_v48  ;;  %v861_v29 = vsel %vm192_vm11, %v853_v58, 2147483647  ;;  %vm866_vm8 = vcmp.lt.s32.totalorder %v856_v4, %v857_v38 }
  0xc2   :  { %vm859_vm7 = vcmp.lt.s32.totalorder %v854_v42, %v858_v50  ;;  %vm862_vm9 = vcmp.lt.s32.totalorder %v855_v15, %v861_v29  ;;  %v983_v13 = vadd.f32 %v982_v32, %v981_v14  ;;  %v1132_v6 = vcombine.high %v4081_v16, %v4081_v16 }
  0xc3   :  { %v860_v11 = vsel %vm859_vm7, %v854_v42, %v858_v50  ;;  %v451_v57 = vadd.f32 %v450_v45, %v3883_v24  ;;  %v863_v25 = vsel %vm862_vm9, %v855_v15, %v861_v29  ;;  %v1139_v23 = vrot.slane %v4081_v16, %v3393_v40 }
  0xc4   :  { %vm864_vm10 = vcmp.lt.s32.totalorder %v860_v11, %v863_v25  ;;  %v867_v49 = vsel %vm866_vm8, %v856_v4, %v857_v38  ;;  %v985_v55 = vadd.f32 %v984_v46, %v983_v13  ;;  %v5121_v5 = vmov 0  }
  0xc5   :  { %v4095_v26 = vsel %vm1261_vm12, 1, %v5121_v5  ;;  %v4100_v32 = vsel %vm3915_vm13, %v451_v57, %v3736_v2  ;;  %v865_v24 = vsel %vm864_vm10, %v860_v11, %v863_v25  ;;  %v1146_v1 = vrot.slane %v1132_v6, %v3393_v40 }
  0xc6   :  { %v1147_v14 = vcombine.high %v1139_v23, %v1139_v23  ;;  %v615_v31 = vcombine.high %v4100_v32, %v4100_v32  ;;  %v622_v46 = vrot.slane %v4100_v32, %v3393_v40  ;;  %vm868_vm15 = vcmp.lt.s32.totalorder %v865_v24, %v867_v49 }
  0xc7   :  { %v986_v43 = vmul.f32 %v5123_v7, %v985_v55  ;;  %v869_v53 = vsel %vm868_vm15, %v865_v24, %v867_v49  ;;  %v1148_v17 = vcombine.high %v1146_v1, %v1146_v1  ;;  %v1155_v22 = vrot.slane %v1139_v23, %v3393_v40 }
  0xc8   :  { %v4110_v2 = vsel %vm192_vm11, %v1353_v52, 0.0  ;;  %v629_v27 = vrot.slane %v615_v31, %v3393_v40  ;;  %v630_v58 = vcombine.high %v622_v46, %v622_v46  ;;  %v638_v42 = vrot.slane %v622_v46, %v3393_v40  ;;  %872 = vst.msk [vmem:[#allocation2 + $0x10] sm:$0x3f] %vm192_vm11, %v869_v53 }
  0xc9   :  { %v987_v15 = vsel %vm192_vm11, %v986_v43, 0.0  ;;  %v1162_v4 = vrot.slane %v1146_v1, %v3393_v40  ;;  %v1169_v38 = vrot.slane %v1147_v14, %v3393_v40  ;;  %v1176_v50 = vrot.slane %v1148_v17, %v3393_v40 }
  0xca   :  { %v988_v48 = vrot.slane %v987_v15, 4  ;;  %v631_v45 = vcombine.high %v629_v27, %v629_v27  ;;  %v645_v52 = vrot.slane %v629_v27, %v3393_v40  ;;  %v652_v29 = vrot.slane %v630_v58, %v3393_v40 }
  0xcb   :  { %v660_v11 = vcombine.high %v638_v42, %v638_v42  ;;  %v665_v13 = vrot.slane %v638_v42, %v3277_v10  ;;  %v1177_v25 = vcombine.high %v1155_v22, %v1155_v22  ;;  %v1178_v6 = vcombine.high %v1169_v38, %v1169_v38 }
  0xcc   :  { %v989_v57 = vadd.f32 %v988_v48, %v987_v15  ;;  %v659_v23 = vrot.slane %v631_v45, %v3393_v40  ;;  %v661_v49 = vcombine.high %v652_v29, %v652_v29  ;;  %v669_v55 = vrot.slane %v652_v29, %v3277_v10 }
  0xcd   :  { %v673_v21 = vrot.slane %v660_v11, %v3277_v10  ;;  %v681_v24 = vrot.slane %v645_v52, %v3277_v10  ;;  %v692_v1 = vadd.f32 %v665_v13, %v3792_v20  ;;  %v1182_v31 = vrot.slane %v1155_v22, %v3277_v10 }
  0xce   :  { %v990_v14 = vrot.slane %v989_v57, 2  ;;  %v677_v46 = vrot.slane %v661_v49, %v3277_v10  ;;  %v685_v7 = vrot.slane %v659_v23, %v3277_v10  ;;  %v693_v43 = vadd.f32 %v669_v55, %v3647_v63 }
  0xcf   :  { %v694_v53 = vadd.f32 %v673_v21, %v3755_v34  ;;  %v696_v17 = vadd.f32 %v681_v24, %v3705_v36  ;;  %v698_v27 = vsel %vm192_vm11, %v692_v1, -inf  ;;  %v1186_v42 = vrot.slane %v1169_v38, %v3277_v10 }
  0xd0   :  { %v991_v58 = vadd.f32 %v990_v14, %v989_v57  ;;  %v695_v20 = vadd.f32 %v677_v46, %v3852_v47  ;;  %v697_v15 = vadd.f32 %v685_v7, %v3859_v12  ;;  %v699_v22 = vsel %vm192_vm11, %v693_v43, -inf  ;;  %v5126_v14 = vld [vmem:[#allocation24_spill] sm:$0xff] }
  0xd1   :  { %v1190_v48 = vrot.slane %v1177_v25, %v3277_v10  ;;  %v702_v45 = vsel %vm192_vm11, %v696_v17, -inf  ;;  %v1194_v34 = vrot.slane %v1178_v6, %v3277_v10  ;;  %v1198_v36 = vrot.slane %v1162_v4, %v3277_v10  ;;  %v5124_v25 = vld [vmem:[#allocation22_spill] sm:$0xff] }
  0xd2   :  { %v992_v63 = vrot.slane %v991_v58, 1  ;;  %v700_v52 = vsel %vm192_vm11, %v694_v53, -inf  ;;  %v701_v29 = vsel %vm192_vm11, %v695_v20, -inf  ;;  %v704_v38 = vsel %vm192_vm11, %v697_v15, -inf  ;;  %v5125_v4 = vld [vmem:[#allocation30_spill] sm:$0xff] }
  0xd3   :  { %v1202_v47 = vrot.slane %v1176_v50, %v3277_v10  ;;  %v703_v12 = vmax.f32 %v698_v27, %v702_v45  ;;  %v705_v11 = vmax.f32 %v699_v22, %v704_v38  ;;  %v1209_v57 = vadd.f32 %v1182_v31, %v3877_v51  ;;  %v5131_v38 = vld [vmem:[#allocation35_spill] sm:$0xff] }
  0xd4   :  { %v993_v13 = vadd.f32 %v992_v63, %v991_v58  ;;  %v1210_v23 = vadd.f32 %v1186_v42, %v5124_v25  ;;  %v1211_v49 = vadd.f32 %v1190_v48, %v3778_v39  ;;  %v1212_v6 = vadd.f32 %v1194_v34, %v3881_v44  ;;  %v5127_v63 = vld [vmem:[#allocation20_spill] sm:$0xff] }
  0xd5   :  { %v1213_v55 = vadd.f32 %v1198_v36, %v5125_v4  ;;  %v706_v21 = vmax.f32 %v703_v12, %v705_v11  ;;  %v707_v24 = vmax.f32 %v700_v52, %v701_v29  ;;  %v1214_v7 = vadd.f32 %v1202_v47, %v3890_v3 }
  0xd6   :  { %v996_v46 = vmul.f32 %v5126_v14, %v993_v13  ;;  %v1215_v50 = vsel %vm192_vm11, %v1209_v57, -inf  ;;  %v1216_v27 = vsel %vm192_vm11, %v1210_v23, -inf  ;;  %v1364_v58 = vsel %vm192_vm11, %v4055_v18, 0.0 }
  0xd7   :  { %v1219_v31 = vsel %vm192_vm11, %v1213_v55, -inf  ;;  %v4158_v42 = vmax.f32 %v706_v21, %v707_v24  ;;  %v1218_v48 = vsel %vm192_vm11, %v1212_v6, -inf  ;;  %v1221_v45 = vsel %vm192_vm11, %v1214_v7, -inf }
  0xd8   :  { %v4161_v22 = vadd.f32 %v996_v46, %v4066_v19  ;;  %v5128_v34 = vrot.slane %v5127_v63, %v3277_v10  ;;  %v1217_v52 = vsel %vm192_vm11, %v1211_v49, -inf  ;;  %v1220_v29 = vmax.f32 %v1215_v50, %v1219_v31 }
  0xd9   :  { %v1222_v18 = vmax.f32 %v1216_v27, %v1221_v45  ;;  %v1361_v47 = vadd.f32 %v5131_v38, %v4110_v2  ;;  %v709_v19 = vsub.f32 %v692_v1, %v4158_v42  ;;  %v710_v12 = vsub.f32 %v693_v43, %v4158_v42 }
  0xda   :  { %vm4168_vm12 = vcmp.eq.s32.totalorder %v5128_v34, 1  ;;  %v711_v11 = vsub.f32 %v694_v53, %v4158_v42  ;;  %v712_v13 = vsub.f32 %v695_v20, %v4158_v42  ;;  %v713_v21 = vsub.f32 %v696_v17, %v4158_v42 }
  0xdb   :  { %v714_v24 = vsub.f32 %v697_v15, %v4158_v42  ;;  %v1223_v14 = vmax.f32 %v1220_v29, %v1222_v18  ;;  %v1224_v46 = vmax.f32 %v1217_v52, %v1218_v48  ;;  %v715_v63 = vmul.f32 1.442695, %v709_v19 }
  0xdc   :  { %v717_v50 = vmul.f32 1.442695, %v710_v12  ;;  %v719_v27 = vmul.f32 1.442695, %v711_v11  ;;  %v1363_v31 = vadd.f32 %v4085_v41, %v1361_v47  ;;  %v721_v2 = vmul.f32 1.442695, %v712_v13 }
  0xdd   :  { %v1225_v45 = vmax.f32 %v1223_v14, %v1224_v46  ;;  %v1368_v1 = vsel %vm192_vm11, %v4061_v62, 0.0  ;;  %v1512_v43 = vrot.slane %v4095_v26, %v3277_v10  ;;  %3093 = vpow2.f32 %v715_v63  ;;  %v5146_v26 = vld [vmem:[#allocation29_spill] sm:$0xff] }
  0xde   :  { %v723_v53 = vmul.f32 1.442695, %v713_v21  ;;  %v725_v17 = vmul.f32 1.442695, %v714_v24  ;;  %v1365_v20 = vadd.f32 %v1364_v58, %v1363_v31  ;;  %3095 = vpow2.f32 %v717_v50 }
  0xdf   :  { %vm1226_vm13 = vcmp.eq.f32.partialorder %v1209_v57, %v1225_v45  ;;  %vm1227_vm1 = vcmp.eq.f32.partialorder %v1210_v23, %v1225_v45  ;;  %vm1228_vm2 = vcmp.eq.f32.partialorder %v1211_v49, %v1225_v45  ;;  %3097 = vpow2.f32 %v719_v27  ;;  %v5134_v27 = vld [vmem:[#allocation11_spill] sm:$0xff] }
  0xe0   :  { %vm1229_vm3 = vcmp.eq.f32.partialorder %v1212_v6, %v1225_v45  ;;  %vm1230_vm4 = vcmp.eq.f32.partialorder %v1213_v55, %v1225_v45  ;;  %vm1231_vm6 = vcmp.eq.f32.partialorder %v1214_v7, %v1225_v45  ;;  %3099 = vpow2.f32 %v721_v2 }
  0xe1   :  { %v1232_v41 = vsel %vm1226_vm13, 0, %v5059_v59  ;;  %v1233_v62 = vsel %vm1227_vm1, 1, %v5059_v59  ;;  %v1234_v15 = vsel %vm1228_vm2, 2, %v5059_v59  ;;  %3101 = vpow2.f32 %v723_v53 }
  0xe2   :  { %v1235_v48 = vsel %vm1229_vm3, 3, %v5059_v59  ;;  %v1236_v58 = vsel %vm1230_vm4, 4, %v5059_v59  ;;  %v1237_v57 = vsel %vm1231_vm6, 5, %v5059_v59  ;;  %3103 = vpow2.f32 %v725_v17 }
  0xe3   :  { %v1238_v23 = vsel %vm192_vm11, %v1232_v41, 2147483647  ;;  %v1239_v49 = vsel %vm192_vm11, %v1233_v62, 2147483647  ;;  %v1240_v6 = vsel %vm192_vm11, %v1234_v15, 2147483647  ;;  %v4201_v52 = vsel %vm4168_vm12, %v1225_v45, %v4081_v16 }
  0xe4   :  { %v1241_v55 = vsel %vm192_vm11, %v1235_v48, 2147483647  ;;  %v1242_v7 = vsel %vm192_vm11, %v1236_v58, 2147483647  ;;  %v1245_v34 = vsel %vm192_vm11, %v1237_v57, 2147483647  ;;  %v1367_v29 = vadd.f32 %v4047_v28, %v1365_v20 }
  0xe5   :  { %vm1243_vm7 = vcmp.lt.s32.totalorder %v1238_v23, %v1242_v7  ;;  %vm1246_vm8 = vcmp.lt.s32.totalorder %v1239_v49, %v1245_v34  ;;  %vm1250_vm9 = vcmp.lt.s32.totalorder %v1240_v6, %v1241_v55  ;;  %v1516_v47 = vcombine.high %v4201_v52, %v4201_v52  ;;  %v5132_v28 = vld [vmem:[#allocation34_spill] sm:$0xff] }
  0xe6   :  { %v1244_v18 = vsel %vm1243_vm7, %v1238_v23, %v1242_v7  ;;  %v1247_v38 = vsel %vm1246_vm8, %v1239_v49, %v1245_v34  ;;  %v4208_v19 = vadd.f32 %v3620_v56, %v3769_v35  ;;  %v1251_v12 = vsel %vm1250_vm9, %v1240_v6, %v1241_v55 }
  0xe7   :  { %vm1248_vm10 = vcmp.lt.s32.totalorder %v1244_v18, %v1247_v38  ;;  %v1369_v11 = vadd.f32 %v1368_v1, %v1367_v29  ;;  %v1523_v16 = vrot.slane %v4201_v52, %v3393_v40  ;;  %v3094_v13 = vpop.eup %3093  ;;  %v1530_v24 = vrot.slane %v1516_v47, %v3393_v40 }
  0xe8   :  { %v1249_v21 = vsel %vm1248_vm10, %v1244_v18, %v1247_v38  ;;  %v4215_v14 = vadd.f32 %v3620_v56, %v5132_v28  ;;  %v4219_v46 = vadd.f32 %v3620_v56, %v3818_v37  ;;  %v3096_v63 = vpop.eup %3095  ;;  %v727_v50 = vsel %vm192_vm11, %v3094_v13, 0.0 }
  0xe9   :  { %vm1252_vm15 = vcmp.lt.s32.totalorder %v1249_v21, %v1251_v12  ;;  %v1370_v31 = vmul.f32 %v5134_v27, %v1369_v11  ;;  %v1531_v2 = vcombine.high %v1523_v16, %v1523_v16  ;;  %v3098_v45 = vpop.eup %3097  ;;  %v728_v1 = vsel %vm192_vm11, %v3096_v63, 0.0 }
  0xea   :  { %5133 = vst [vmem:[#allocation37_spill] sm:$0xff] %v4219_v46  ;;  %v1253_v53 = vsel %vm1252_vm15, %v1249_v21, %v1251_v12  ;;  %v1532_v17 = vcombine.high %v1530_v24, %v1530_v24  ;;  %v1539_v20 = vrot.slane %v1523_v16, %v3393_v40  ;;  %v3100_v41 = vpop.eup %3099  ;;  %v729_v62 = vadd.f32 %v728_v1, %v727_v50 }
  0xeb   :  { %1256 = vst.msk [vmem:[#allocation2 + $0x18] sm:$0x3f] %vm192_vm11, %v1253_v53  ;;  %v1371_v15 = vsel %vm192_vm11, %v1370_v31, 0.0  ;;  %v1546_v48 = vrot.slane %v1530_v24, %v3393_v40  ;;  %v4230_v58 = vadd.f32 %v3620_v56, %v3799_v61  ;;  %v3102_v57 = vpop.eup %3101  ;;  %v730_v23 = vsel %vm192_vm11, %v3098_v45, 0.0  ;;  %v5136_v31 = vld [vmem:[#allocation23_spill] sm:$0xff] }
  0xec   :  { %v1372_v49 = vrot.slane %v1371_v15, 4  ;;  %v1553_v6 = vrot.slane %v1531_v2, %v3393_v40  ;;  %v1560_v55 = vrot.slane %v1532_v17, %v3393_v40  ;;  %v3104_v7 = vpop.eup %3103  ;;  %v731_v34 = vadd.f32 %v730_v23, %v729_v62  ;;  %v5137_v53 = vld [vmem:[#allocation31_spill] sm:$0xff] }
  0xed   :  { %5135 = vst [vmem:[#allocation16_spill] sm:$0xff] %v4230_v58  ;;  %v732_v29 = vsel %vm192_vm11, %v3100_v41, 0.0  ;;  %v1561_v18 = vcombine.high %v1539_v20, %v1539_v20  ;;  %v1566_v38 = vrot.slane %v1539_v20, %v3277_v10  ;;  %v734_v47 = vsel %vm192_vm11, %v3102_v57, 0.0 }
  0xee   :  { %v1373_v12 = vadd.f32 %v1372_v49, %v1371_v15  ;;  %v1562_v56 = vcombine.high %v1553_v6, %v1553_v6  ;;  %v1570_v11 = vrot.slane %v1553_v6, %v3277_v10  ;;  %v733_v16 = vadd.f32 %v732_v29, %v731_v34 }
  0xef   :  { %v1574_v13 = vrot.slane %v1561_v18, %v3277_v10  ;;  %v1582_v21 = vrot.slane %v1546_v48, %v3277_v10  ;;  %v1586_v24 = vrot.slane %v1560_v55, %v3277_v10  ;;  %v1593_v27 = vadd.f32 %v1566_v38, %v4031_v9 }
  0xf0   :  { %v1374_v63 = vrot.slane %v1373_v12, 2  ;;  %v1578_v50 = vrot.slane %v1562_v56, %v3277_v10  ;;  %v1594_v2 = vadd.f32 %v1570_v11, %v5136_v31  ;;  %v735_v45 = vadd.f32 %v734_v47, %v733_v16  ;;  %v5138_v47 = vld [vmem:[#allocation14_spill] sm:$0xff]  ;;  %v5140_v11 = vld [vmem:[#allocation27_spill] sm:$0xff] }
  0xf1   :  { %v1595_v1 = vadd.f32 %v1574_v13, %v5112_v0  ;;  %v1597_v17 = vadd.f32 %v1582_v21, %v5137_v53  ;;  %v1598_v20 = vadd.f32 %v1586_v24, %v4041_v54  ;;  %v736_v41 = vsel %vm192_vm11, %v3104_v7, 0.0  ;;  %v4258_v7 = vld [vmem:[%s5019_s0 + $0x30] sm:$0x3f] }
  0xf2   :  { %v1375_v62 = vadd.f32 %v1374_v63, %v1373_v12  ;;  %v1596_v15 = vadd.f32 %v1578_v50, %v4037_v30  ;;  %v1599_v48 = vsel %vm192_vm11, %v1593_v27, -inf  ;;  %v737_v57 = vadd.f32 %v736_v41, %v735_v45  ;;  %v5141_v63 = vld [vmem:[#allocation33_spill] sm:$0xff]  ;;  %v3181_v41 = vld [vmem:[%s5020_s1 + $0x5] sm:$0x1] }
  0xf3   :  { %v1600_v23 = vsel %vm192_vm11, %v1594_v2, -inf  ;;  %v1603_v49 = vsel %vm192_vm11, %v1597_v17, -inf  ;;  %v1605_v6 = vsel %vm192_vm11, %v1598_v20, -inf  ;;  %v1601_v38 = vsel %vm192_vm11, %v1595_v1, -inf }
  0xf4   :  { %v1376_v55 = vrot.slane %v1375_v62, 1  ;;  %v1602_v34 = vsel %vm192_vm11, %v1596_v15, -inf  ;;  %v1604_v29 = vmax.f32 %v1599_v48, %v1603_v49  ;;  %v1606_v18 = vmax.f32 %v1600_v23, %v1605_v6  ;;  %v5145_v23 = vld [vmem:[#allocation32_spill] sm:$0xff] }
  0xf5   :  { %3105 = vlog2.f32 %v737_v57  ;;  %v5139_v12 = vrot.slane %v5138_v47, %v3277_v10  ;;  %v1739_v16 = vmul.f32 %v5140_v11, %v4215_v14  ;;  %v1608_v24 = vmax.f32 %v1601_v38, %v1602_v34 }
  0xf6   :  { %v1377_v13 = vadd.f32 %v1376_v55, %v1375_v62  ;;  %v1607_v21 = vmax.f32 %v1604_v29, %v1606_v18  ;;  %v1744_v50 = vsel %vm192_vm11, %v5141_v63, 0.0  ;;  %vm4272_vm13 = vcmp.eq.s32.totalorder %v1512_v43, 1  ;;  %v5144_v62 = vld [vmem:[#allocation19_spill] sm:$0xff]  ;;  %v5147_v55 = vld [vmem:[#allocation28_spill] sm:$0xff]  ;;  %v5148_v29 = vld [vmem:[#allocation21_spill] sm:$0xff] }
  0xf7   :  { %v1737_v56 = vmul.f32 %v5139_v12, %v4208_v19  ;;  %vm1645_vm1 = vcmp.ne.s32.totalorder %v3181_v41, 5  ;;  %v4282_v57 = vadd.f32 %v4258_v7, %v5144_v62  ;;  %v1740_v43 = vmul.f32 %v5146_v26, %v4219_v46 }
  0xf8   :  { %v1380_v49 = vmul.f32 %v5145_v23, %v1377_v13  ;;  %v1609_v6 = vmax.f32 %v1607_v21, %v1608_v24  ;;  %v1741_v34 = vmul.f32 %v5147_v55, %v4025_v60  ;;  %v5149_v18 = vrot.slane %v5148_v29, %v3277_v10 }
  0xf9   :  { %v1743_v48 = vsel %vm192_vm11, %v1737_v56, 0.0  ;;  %v1746_v12 = vsel %vm192_vm11, %v1739_v16, 0.0  ;;  %v4296_v56 = vsel %vm1645_vm1, 1, %v5121_v5 }
  0xfa   :  { %v1742_v38 = vmul.f32 %v5149_v18, %v4230_v58  ;;  %v1745_v47 = vadd.f32 %v1744_v50, %v1743_v48  ;;  %v4299_v11 = vadd.f32 %v1380_v49, %v4161_v22  ;;  %vm1610_vm2 = vcmp.eq.f32.partialorder %v1593_v27, %v1609_v6 }
  0xfb   :  { %vm1611_vm3 = vcmp.eq.f32.partialorder %v1594_v2, %v1609_v6  ;;  %vm1612_vm4 = vcmp.eq.f32.partialorder %v1595_v1, %v1609_v6  ;;  %vm1613_vm6 = vcmp.eq.f32.partialorder %v1596_v15, %v1609_v6  ;;  %vm1614_vm7 = vcmp.eq.f32.partialorder %v1597_v17, %v1609_v6 }
  0xfc   :  { %vm1615_vm8 = vcmp.eq.f32.partialorder %v1598_v20, %v1609_v6  ;;  %v1616_v13 = vsel %vm1610_vm2, 0, %v5059_v59  ;;  %v1617_v21 = vsel %vm1611_vm3, 1, %v5059_v59  ;;  %v1618_v24 = vsel %vm1612_vm4, 2, %v5059_v59 }
  0xfd   :  { %v1619_v16 = vsel %vm1613_vm6, 3, %v5059_v59  ;;  %v1620_v63 = vsel %vm1614_vm7, 4, %v5059_v59  ;;  %v1621_v50 = vsel %vm1615_vm8, 5, %v5059_v59  ;;  %v1622_v22 = vsel %vm192_vm11, %v1616_v13, 2147483647 }
  0xfe   :  { %v1623_v27 = vsel %vm192_vm11, %v1617_v21, 2147483647  ;;  %v1748_v2 = vsel %vm192_vm11, %v1740_v43, 0.0  ;;  %v1624_v1 = vsel %vm192_vm11, %v1618_v24, 2147483647  ;;  %v4316_v15 = vsel %vm4272_vm13, %v1609_v6, %v4201_v52 }
  0xff   :  { %v1625_v17 = vsel %vm192_vm11, %v1619_v16, 2147483647  ;;  %v1626_v20 = vsel %vm192_vm11, %v1620_v63, 2147483647  ;;  %v3106_v48 = vpop.eup %3105  ;;  %v1629_v23 = vsel %vm192_vm11, %v1621_v50, 2147483647  ;;  %v1747_v49 = vadd.f32 %v1746_v12, %v1745_v47 }
 0x100   :  { %vm1627_vm9 = vcmp.lt.s32.totalorder %v1622_v22, %v1626_v20  ;;  %vm1634_vm10 = vcmp.lt.s32.totalorder %v1624_v1, %v1625_v17  ;;  %v739_v26 = vmul.f32 0.6931472, %v3106_v48  ;;  %vm1630_vm15 = vcmp.lt.s32.totalorder %v1623_v27, %v1629_v23 }
 0x101   :  { %v1628_v55 = vsel %vm1627_vm9, %v1622_v22, %v1626_v20  ;;  %v1750_v43 = vsel %vm192_vm11, %v1741_v34, 0.0  ;;  %v1631_v29 = vsel %vm1630_vm15, %v1623_v27, %v1629_v23  ;;  %v1749_v18 = vadd.f32 %v1748_v2, %v1747_v49  ;;  %v5151_v49 = vld [vmem:[#allocation18_spill] sm:$0xff] }
 0x102   :  { %v1900_v13 = vcombine.high %v4316_v15, %v4316_v15  ;;  %v1907_v52 = vrot.slane %v4316_v15, %v3393_v40  ;;  %v740_v6 = vadd.f32 %v739_v26, %v4158_v42  ;;  %vm1632_vm2 = vcmp.lt.s32.totalorder %v1628_v55, %v1631_v29 }
 0x103   :  { %v1635_v21 = vsel %vm1634_vm10, %v1624_v1, %v1625_v17  ;;  %v1752_v24 = vsel %vm192_vm11, %v1742_v38, 0.0  ;;  %v1633_v47 = vsel %vm1632_vm2, %v1628_v55, %v1631_v29  ;;  %v1751_v12 = vadd.f32 %v1750_v43, %v1749_v18 }
 0x104   :  { %v1914_v16 = vrot.slane %v1900_v13, %v3393_v40  ;;  %v1915_v63 = vcombine.high %v1907_v52, %v1907_v52  ;;  %v4330_v34 = vsel %vm4011_vm14, %v740_v6, %v4100_v32  ;;  %vm1636_vm3 = vcmp.lt.s32.totalorder %v1633_v47, %v1635_v21 }
 0x105   :  { %v5150_v50 = vmov 0.0   ;;  %v1923_v42 = vrot.slane %v1907_v52, %v3393_v40  ;;  %v999_v38 = vcombine.high %v4330_v34, %v4330_v34  ;;  %v1006_v27 = vrot.slane %v4330_v34, %v3393_v40 }
 0x106   :  { %v4334_v22 = vsel %vm1645_vm1, 1.0, %v5150_v50  ;;  %v1637_v2 = vsel %vm1636_vm3, %v1633_v47, %v1635_v21  ;;  %v1753_v1 = vadd.f32 %v1752_v24, %v1751_v12  ;;  %v1916_v32 = vcombine.high %v1914_v16, %v1914_v16 }
 0x107   :  { %1640 = vst.msk [vmem:[#allocation2 + $0x20] sm:$0x3f] %vm192_vm11, %v1637_v2  ;;  %v1937_v41 = vrot.slane %v1915_v63, %v3393_v40  ;;  %v4347_v17 = vadd.f32 %v4258_v7, %v3769_v35  ;;  %v1013_v20 = vrot.slane %v999_v38, %v3393_v40  ;;  %v1014_v48 = vcombine.high %v1006_v27, %v1006_v27 }
 0x108   :  { %v1022_v23 = vrot.slane %v1006_v27, %v3393_v40  ;;  %v1754_v26 = vmul.f32 %v5151_v49, %v1753_v1  ;;  %v1930_v55 = vrot.slane %v1914_v16, %v3393_v40  ;;  %v1944_v43 = vrot.slane %v1916_v32, %v3393_v40 }
 0x109   :  { %v1945_v29 = vcombine.high %v1923_v42, %v1923_v42  ;;  %v1946_v18 = vcombine.high %v1937_v41, %v1937_v41  ;;  %v1015_v13 = vcombine.high %v1013_v20, %v1013_v20  ;;  %v1029_v52 = vrot.slane %v1013_v20, %v3393_v40 }
 0x10a   :  { %v1036_v6 = vrot.slane %v1014_v48, %v3393_v40  ;;  %v1044_v21 = vcombine.high %v1022_v23, %v1022_v23  ;;  %v1049_v24 = vrot.slane %v1022_v23, %v3277_v10  ;;  %v1755_v47 = vsel %vm192_vm11, %v1754_v26, 0.0 }
 0x10b   :  { %v1950_v12 = vrot.slane %v1923_v42, %v3277_v10  ;;  %v1954_v63 = vrot.slane %v1937_v41, %v3277_v10  ;;  %v1043_v16 = vrot.slane %v1015_v13, %v3393_v40  ;;  %v1065_v1 = vrot.slane %v1029_v52, %v3277_v10 }
 0x10c   :  { %v1045_v38 = vcombine.high %v1036_v6, %v1036_v6  ;;  %v1053_v27 = vrot.slane %v1036_v6, %v3277_v10  ;;  %v1057_v2 = vrot.slane %v1044_v21, %v3277_v10  ;;  %v1076_v32 = vadd.f32 %v1049_v24, %v3877_v51 }
 0x10d   :  { %v1756_v20 = vrot.slane %v1755_v47, 4  ;;  %v1958_v48 = vrot.slane %v1945_v29, %v3277_v10  ;;  %v1069_v42 = vrot.slane %v1043_v16, %v3277_v10  ;;  %v1962_v26 = vrot.slane %v1946_v18, %v3277_v10 }
 0x10e   :  { %v1061_v23 = vrot.slane %v1045_v38, %v3277_v10  ;;  %v1077_v41 = vadd.f32 %v1053_v27, %v5124_v25  ;;  %v1078_v13 = vadd.f32 %v1057_v2, %v3778_v39  ;;  %v1080_v6 = vadd.f32 %v1065_v1, %v5125_v4 }
 0x10f   :  { %v1757_v21 = vadd.f32 %v1756_v20, %v1755_v47  ;;  %v1966_v52 = vrot.slane %v1930_v55, %v3277_v10  ;;  %v1081_v24 = vadd.f32 %v1069_v42, %v3890_v3  ;;  %v1082_v29 = vsel %vm192_vm11, %v1076_v32, -inf }
 0x110   :  { %v1079_v51 = vadd.f32 %v1061_v23, %v3881_v44  ;;  %v1970_v38 = vrot.slane %v1944_v43, %v3277_v10  ;;  %v1083_v16 = vsel %vm192_vm11, %v1077_v41, -inf  ;;  %v1086_v25 = vsel %vm192_vm11, %v1080_v6, -inf  ;;  %v5152_v44 = vld [vmem:[#allocation25_spill] sm:$0xff] }
 0x111   :  { %v1758_v18 = vrot.slane %v1757_v21, 2  ;;  %v4380_v39 = vadd.f32 %v1950_v12, %v4208_v19  ;;  %v1087_v47 = vmax.f32 %v1082_v29, %v1086_v25  ;;  %v1088_v55 = vsel %vm192_vm11, %v1081_v24, -inf }
 0x112   :  { %v1085_v4 = vsel %vm192_vm11, %v1079_v51, -inf  ;;  %v1978_v27 = vadd.f32 %v1954_v63, %v5152_v44  ;;  %v1089_v3 = vmax.f32 %v1083_v16, %v1088_v55  ;;  %v1979_v1 = vadd.f32 %v1958_v48, %v4215_v14 }
 0x113   :  { %v1759_v2 = vadd.f32 %v1758_v18, %v1757_v21  ;;  %v1980_v43 = vadd.f32 %v1962_v26, %v4219_v46  ;;  %v1084_v20 = vsel %vm192_vm11, %v1078_v13, -inf  ;;  %v1981_v23 = vadd.f32 %v1966_v52, %v4025_v60 }
 0x114   :  { %v1982_v12 = vadd.f32 %v1970_v38, %v4230_v58  ;;  %v4392_v42 = vadd.f32 %v4258_v7, %v5132_v28  ;;  %v1090_v29 = vmax.f32 %v1087_v47, %v1089_v3  ;;  %v1091_v25 = vmax.f32 %v1084_v20, %v1085_v4 }
 0x115   :  { %v1760_v59 = vrot.slane %v1759_v2, 1  ;;  %v1986_v63 = vsel %vm192_vm11, %v1980_v43, -inf  ;;  %v1983_v48 = vsel %vm192_vm11, %v4380_v39, -inf  ;;  %v1984_v26 = vsel %vm192_vm11, %v1978_v27, -inf }
 0x116   :  { %v1987_v21 = vsel %vm192_vm11, %v1981_v23, -inf  ;;  %v1989_v52 = vsel %vm192_vm11, %v1982_v12, -inf  ;;  %v4400_v16 = vmax.f32 %v1090_v29, %v1091_v25  ;;  %v1985_v18 = vsel %vm192_vm11, %v1979_v1, -inf }
 0x117   :  { %v1761_v38 = vadd.f32 %v1760_v59, %v1759_v2  ;;  %v1990_v55 = vmax.f32 %v1984_v26, %v1989_v52  ;;  %v1988_v47 = vmax.f32 %v1983_v48, %v1987_v21  ;;  %v1992_v4 = vmax.f32 %v1985_v18, %v1986_v63 }
 0x118   :  { %v2044_v3 = vcombine.high %v5151_v49, %v5151_v49  ;;  %v2051_v20 = vrot.slane %v5151_v49, %v3393_v40  ;;  %v1093_v33 = vsub.f32 %v1076_v32, %v4400_v16  ;;  %v1094_v58 = vsub.f32 %v1077_v41, %v4400_v16 }
 0x119   :  { %v1095_v46 = vsub.f32 %v1078_v13, %v4400_v16  ;;  %v1096_v29 = vsub.f32 %v1079_v51, %v4400_v16  ;;  %v1097_v59 = vsub.f32 %v1080_v6, %v4400_v16  ;;  %v1098_v2 = vsub.f32 %v1081_v24, %v4400_v16 }
 0x11a   :  { %v1764_v25 = vmul.f32 %v4334_v22, %v1761_v38  ;;  %v1991_v63 = vmax.f32 %v1988_v47, %v1990_v55  ;;  %v1099_v48 = vmul.f32 1.442695, %v1093_v33  ;;  %v1101_v26 = vmul.f32 1.442695, %v1094_v58 }
 0x11b   :  { %v1103_v21 = vmul.f32 1.442695, %v1095_v46  ;;  %v2058_v49 = vrot.slane %v2044_v3, %v3393_v40  ;;  %v1105_v52 = vmul.f32 1.442695, %v1096_v29  ;;  %v4420_v41 = vadd.f32 %v4258_v7, %v3818_v37 }
 0x11c   :  { %v4416_v32 = vadd.f32 %v1764_v25, %v4299_v11  ;;  %v4424_v13 = vadd.f32 %v4258_v7, %v3688_v8  ;;  %3107 = vpow2.f32 %v1099_v48  ;;  %v1107_v22 = vmul.f32 1.442695, %v1097_v59 }
 0x11d   :  { %5153 = vst [vmem:[#allocation36_spill] sm:$0xff] %v4420_v41  ;;  %v4426_v6 = vmax.f32 %v1991_v63, %v1992_v4  ;;  %v4430_v46 = vadd.f32 %v4258_v7, %v3799_v61  ;;  %3109 = vpow2.f32 %v1101_v26  ;;  %v1109_v58 = vmul.f32 1.442695, %v1098_v2 }
 0x11e   :  { %v2059_v11 = vcombine.high %v2051_v20, %v2051_v20  ;;  %v2060_v33 = vcombine.high %v2058_v49, %v2058_v49  ;;  %3111 = vpow2.f32 %v1103_v21  ;;  %v5155_v7 = vrot.slane %v4296_v56, %v3277_v10 }
 0x11f   :  { %5154 = vst [vmem:[#allocation12_spill] sm:$0xff] %v4430_v46  ;;  %vm1994_vm14 = vcmp.eq.f32.partialorder %v4380_v39, %v4426_v6  ;;  %vm1995_vm1 = vcmp.eq.f32.partialorder %v1978_v27, %v4426_v6  ;;  %vm1996_vm4 = vcmp.eq.f32.partialorder %v1979_v1, %v4426_v6  ;;  %3113 = vpow2.f32 %v1105_v52 }
 0x120   :  { %vm1997_vm6 = vcmp.eq.f32.partialorder %v1980_v43, %v4426_v6  ;;  %vm1998_vm7 = vcmp.eq.f32.partialorder %v1981_v23, %v4426_v6  ;;  %vm1999_vm8 = vcmp.eq.f32.partialorder %v1982_v12, %v4426_v6  ;;  %3115 = vpow2.f32 %v1107_v22 }
 0x121   :  { %vm4442_vm9 = vcmp.eq.s32.totalorder %v5155_v7, 1  ;;  %v5158_v24 = vmov 6   ;;  %v2067_v38 = vrot.slane %v2051_v20, %v3393_v40  ;;  %3117 = vpow2.f32 %v1109_v58 }
 0x122   :  { %v2000_v39 = vsel %vm1994_vm14, 0, %v5158_v24  ;;  %v2001_v27 = vsel %vm1995_vm1, 1, %v5158_v24  ;;  %v2002_v1 = vsel %vm1996_vm4, 2, %v5158_v24  ;;  %v2003_v43 = vsel %vm1997_vm6, 3, %v5158_v24 }
 0x123   :  { %v2004_v23 = vsel %vm1998_vm7, 4, %v5158_v24  ;;  %v2005_v12 = vsel %vm1999_vm8, 5, %v5158_v24  ;;  %v2006_v56 = vsel %vm192_vm11, %v2000_v39, 2147483647  ;;  %v2007_v18 = vsel %vm192_vm11, %v2001_v27, 2147483647 }
 0x124   :  { %v2008_v55 = vsel %vm192_vm11, %v2002_v1, 2147483647  ;;  %v2009_v47 = vsel %vm192_vm11, %v2003_v43, 2147483647  ;;  %v2010_v4 = vsel %vm192_vm11, %v2004_v23, 2147483647  ;;  %v2081_v29 = vrot.slane %v2059_v11, %v3393_v40 }
 0x125   :  { %v2013_v3 = vsel %vm192_vm11, %v2005_v12, 2147483647  ;;  %vm2011_vm10 = vcmp.lt.s32.totalorder %v2006_v56, %v2010_v4  ;;  %vm2018_vm2 = vcmp.lt.s32.totalorder %v2008_v55, %v2009_v47  ;;  %v2074_v20 = vrot.slane %v2058_v49, %v3393_v40 }
 0x126   :  { %vm2014_vm15 = vcmp.lt.s32.totalorder %v2007_v18, %v2013_v3  ;;  %v2012_v59 = vsel %vm2011_vm10, %v2006_v56, %v2010_v4  ;;  %v2088_v25 = vrot.slane %v2060_v33, %v3393_v40  ;;  %v2089_v63 = vcombine.high %v2067_v38, %v2067_v38  ;;  %v3108_v48 = vpop.eup %3107 }
 0x127   :  { %v2015_v2 = vsel %vm2014_vm15, %v2007_v18, %v2013_v3  ;;  %v2090_v26 = vcombine.high %v2081_v29, %v2081_v29  ;;  %v2094_v21 = vrot.slane %v2067_v38, %v3277_v10  ;;  %v2098_v52 = vrot.slane %v2081_v29, %v3277_v10  ;;  %v3110_v22 = vpop.eup %3109  ;;  %v5159_v29 = vld [vmem:[#allocation8_spill] sm:$0xff] }
 0x128   :  { %vm2016_vm3 = vcmp.lt.s32.totalorder %v2012_v59, %v2015_v2  ;;  %v1111_v58 = vsel %vm192_vm11, %v3108_v48, 0.0  ;;  %v2019_v7 = vsel %vm2018_vm2, %v2008_v55, %v2009_v47  ;;  %v2102_v39 = vrot.slane %v2089_v63, %v3277_v10  ;;  %v3112_v49 = vpop.eup %3111 }
 0x129   :  { %v2017_v11 = vsel %vm2016_vm3, %v2012_v59, %v2015_v2  ;;  %v1112_v27 = vsel %vm192_vm11, %v3110_v22, 0.0  ;;  %v2106_v33 = vrot.slane %v2090_v26, %v3277_v10  ;;  %v2110_v1 = vrot.slane %v2074_v20, %v3277_v10  ;;  %v3114_v43 = vpop.eup %3113 }
 0x12a   :  { %vm2020_vm14 = vcmp.lt.s32.totalorder %v2017_v11, %v2019_v7  ;;  %v1113_v23 = vadd.f32 %v1112_v27, %v1111_v58  ;;  %v2114_v38 = vrot.slane %v2088_v25, %v3277_v10  ;;  %v2121_v56 = vmul.f32 %v2094_v21, %v4347_v17  ;;  %v3116_v18 = vpop.eup %3115 }
 0x12b   :  { %v2021_v12 = vsel %vm2020_vm14, %v2017_v11, %v2019_v7  ;;  %v1114_v55 = vsel %vm192_vm11, %v3112_v49, 0.0  ;;  %v2122_v47 = vmul.f32 %v2098_v52, %v4282_v57  ;;  %v2123_v4 = vmul.f32 %v2102_v39, %v4392_v42  ;;  %v3118_v63 = vpop.eup %3117  ;;  %v5161_v11 = vld [vmem:[#allocation26_spill] sm:$0xff] }
 0x12c   :  { %2024 = vst.msk [vmem:[#allocation2 + $0x28] sm:$0x3f] %vm192_vm11, %v2021_v12  ;;  %v2124_v3 = vmul.f32 %v2106_v33, %v4420_v41  ;;  %v5160_v20 = vtrunc.f32 %v5159_v29  ;;  %v1115_v2 = vadd.f32 %v1114_v55, %v1113_v23  ;;  %v4484_v25 = vsel %vm4442_vm9, %v4426_v6, %v4316_v15  ;;  %v5162_v7 = vld [vmem:[#allocation6_spill] sm:$0xff] }
 0x12d   :  { %v1116_v48 = vsel %vm192_vm11, %v3114_v43, 0.0  ;;  %v2127_v26 = vsel %vm192_vm11, %v2121_v56, 0.0  ;;  %v2128_v21 = vsel %vm192_vm11, %v2122_v47, 0.0  ;;  %v2130_v52 = vsel %vm192_vm11, %v2123_v4, 0.0  ;;  %v3182_v43 = vld [vmem:[%s5020_s1 + $0x6] sm:$0x1] }
 0x12e   :  { %v4478_v59 = vcvt.f32.s32 %v5160_v20  ;;  %v1117_v22 = vadd.f32 %v1116_v48, %v1115_v2  ;;  %v1118_v58 = vsel %vm192_vm11, %v3116_v18, 0.0  ;;  %vm2034_vm1 = vcmp.eq.s32.totalorder %v5162_v7, %v5161_v11 }
 0x12f   :  { %v2129_v39 = vadd.f32 %v2128_v21, %v2127_v26  ;;  %v2125_v49 = vmul.f32 %v2110_v1, %v4424_v13  ;;  %v2126_v15 = vmul.f32 %v2114_v38, %v4430_v46  ;;  %v2132_v6 = vsel %vm192_vm11, %v2124_v3, 0.0 }
 0x130   :  { %v2284_v27 = vcombine.high %v4484_v25, %v4484_v25  ;;  %v1119_v33 = vadd.f32 %v1118_v58, %v1117_v22  ;;  %vm2029_vm4 = vcmp.ne.s32.totalorder %v3182_v43, 5  ;;  %v2291_v12 = vrot.slane %v4484_v25, %v3393_v40 }
 0x131   :  { %v2131_v23 = vadd.f32 %v2130_v52, %v2129_v39  ;;  %v1120_v56 = vsel %vm192_vm11, %v3118_v63, 0.0  ;;  %v3054_v1 = vsel %vm2034_vm1, 1.0, %v5150_v50  ;;  %v4507_v38 = vsel %vm2029_vm4, 1, %v5121_v5  ;;  %v4525_v39 = vld [vmem:[%s5020_s1 + $0x7] sm:$0x1] }
 0x132   :  { %v2298_v18 = vrot.slane %v2284_v27, %v3393_v40  ;;  %v1121_v55 = vadd.f32 %v1120_v56, %v1119_v33  ;;  %v2299_v4 = vcombine.high %v2291_v12, %v2291_v12  ;;  %v2307_v3 = vrot.slane %v2291_v12, %v3393_v40  ;;  %v3056_v33 = vld [vmem:[%s5019_s0 + $0x38] sm:$0x3f] }
 0x133   :  { %v2133_v47 = vadd.f32 %v2132_v6, %v2131_v23  ;;  %v2134_v29 = vsel %vm192_vm11, %v2125_v49, 0.0  ;;  %v2136_v20 = vsel %vm192_vm11, %v2126_v15, 0.0  ;;  %v4517_v52 = vsel %vm2029_vm4, 1.0, %v5150_v50 }
 0x134   :  { %v2300_v2 = vcombine.high %v2298_v18, %v2298_v18  ;;  %v2314_v63 = vrot.slane %v2298_v18, %v3393_v40  ;;  %3119 = vlog2.f32 %v1121_v55  ;;  %v2321_v26 = vrot.slane %v2299_v4, %v3393_v40 }
 0x135   :  { %v2135_v48 = vadd.f32 %v2134_v29, %v2133_v47  ;;  %v2329_v21 = vcombine.high %v2307_v3, %v2307_v3  ;;  %v2334_v58 = vrot.slane %v2307_v3, %v3277_v10  ;;  %v2280_v43 = vrot.slane %v4507_v38, %v3277_v10 }
 0x136   :  { %v2328_v22 = vrot.slane %v2300_v2, %v3393_v40  ;;  %v2350_v11 = vrot.slane %v2314_v63, %v3277_v10  ;;  %v2330_v15 = vcombine.high %v2321_v26, %v2321_v26  ;;  %v2338_v6 = vrot.slane %v2321_v26, %v3277_v10 }
 0x137   :  { %v2137_v49 = vadd.f32 %v2136_v20, %v2135_v48  ;;  %v2342_v27 = vrot.slane %v2329_v21, %v3277_v10  ;;  %v2361_v12 = vadd.f32 %v2334_v58, %v4347_v17  ;;  %v4545_v20 = vadd.f32 %v3056_v33, %v3769_v35 }
 0x138   :  { %v2354_v23 = vrot.slane %v2328_v22, %v3277_v10  ;;  %v2365_v56 = vadd.f32 %v2350_v11, %v4424_v13  ;;  %v2346_v55 = vrot.slane %v2330_v15, %v3277_v10  ;;  %v2362_v47 = vadd.f32 %v2338_v6, %v4282_v57 }
 0x139   :  { %v2138_v18 = vmul.f32 %v3054_v1, %v2137_v49  ;;  %v2363_v3 = vadd.f32 %v2342_v27, %v4392_v42  ;;  %v4550_v48 = vadd.f32 %v3056_v33, %v5144_v62  ;;  %v4553_v26 = vadd.f32 %v3056_v33, %v5132_v28 }
 0x13a   :  { %v2366_v29 = vadd.f32 %v2354_v23, %v4430_v46  ;;  %v2371_v38 = vsel %vm192_vm11, %v2365_v56, -inf  ;;  %v2364_v63 = vadd.f32 %v2346_v55, %v4420_v41  ;;  %v2367_v22 = vsel %vm192_vm11, %v2361_v12, -inf }
 0x13b   :  { %v2139_v2 = vsel %vm192_vm11, %v2138_v18, 0.0  ;;  %v2368_v58 = vsel %vm192_vm11, %v2362_v47, -inf  ;;  %v2372_v49 = vmax.f32 %v2367_v22, %v2371_v38  ;;  %v2428_v6 = vcombine.high %v3054_v1, %v3054_v1 }
 0x13c   :  { %v2140_v21 = vrot.slane %v2139_v2, 4  ;;  %v2373_v11 = vsel %vm192_vm11, %v2366_v29, -inf  ;;  %v2370_v35 = vsel %vm192_vm11, %v2364_v63, -inf  ;;  %v2369_v23 = vsel %vm192_vm11, %v2363_v3, -inf }
 0x13d   :  { %v2374_v15 = vmax.f32 %v2368_v58, %v2373_v11  ;;  %v4561_v62 = vadd.f32 %v3056_v33, %v3818_v37  ;;  %v2435_v28 = vrot.slane %v3054_v1, %v3393_v40  ;;  %v2376_v4 = vmax.f32 %v2369_v23, %v2370_v35 }
 0x13e   :  { %v2141_v27 = vadd.f32 %v2140_v21, %v2139_v2  ;;  %v3120_v18 = vpop.eup %3119  ;;  %v4565_v46 = vadd.f32 %v3056_v33, %v3688_v8  ;;  %v4568_v41 = vrot.slane %v2428_v6, %v3393_v40  ;;  %v4576_v37 = vadd.f32 %v3056_v33, %v3799_v61 }
 0x13f   :  { %v2375_v55 = vmax.f32 %v2372_v49, %v2374_v15  ;;  %v1123_v38 = vmul.f32 0.6931472, %v3120_v18  ;;  %v2443_v58 = vcombine.high %v2435_v28, %v2435_v28  ;;  %v4571_v2 = vrot.slane %v2435_v28, %v3393_v40 }
 0x140   :  { %v2142_v22 = vrot.slane %v2141_v27, 2  ;;  %v2444_v1 = vcombine.high %v4568_v41, %v4568_v41  ;;  %v2458_v8 = vrot.slane %v4568_v41, %v3393_v40  ;;  %vm4603_vm3 = vcmp.eq.s32.totalorder %v2280_v43, 1 }
 0x141   :  { %v4573_v21 = vmax.f32 %v2375_v55, %v2376_v4  ;;  %v1124_v11 = vadd.f32 %v1123_v38, %v4400_v16  ;;  %v4584_v49 = vrot.slane %v2443_v58, %v3393_v40  ;;  %v2473_v15 = vcombine.high %v4571_v2, %v4571_v2 }
 0x142   :  { %v2143_v35 = vadd.f32 %v2142_v22, %v2141_v27 }
 0x143   :  { %vm2378_vm6 = vcmp.eq.f32.partialorder %v2361_v12, %v4573_v21  ;;  %vm2379_vm7 = vcmp.eq.f32.partialorder %v2362_v47, %v4573_v21  ;;  %vm2380_vm8 = vcmp.eq.f32.partialorder %v2363_v3, %v4573_v21  ;;  %vm2381_vm10 = vcmp.eq.f32.partialorder %v2364_v63, %v4573_v21 }
 0x144   :  { %v4595_v61 = vsel %vm4168_vm12, %v1124_v11, %v4330_v34  ;;  %v2144_v16 = vrot.slane %v2143_v35, 1  ;;  %vm2382_vm15 = vcmp.eq.f32.partialorder %v2365_v56, %v4573_v21  ;;  %vm2383_vm2 = vcmp.eq.f32.partialorder %v2366_v29, %v4573_v21 }
 0x145   :  { %v1383_v33 = vcombine.high %v4595_v61, %v4595_v61  ;;  %v1390_v12 = vrot.slane %v4595_v61, %v3393_v40  ;;  %v2384_v4 = vsel %vm2378_vm6, 0, %v5158_v24  ;;  %v2385_v36 = vsel %vm2379_vm7, 1, %v5158_v24 }
 0x146   :  { %v2145_v34 = vadd.f32 %v2144_v16, %v2143_v35  ;;  %v2386_v3 = vsel %vm2380_vm8, 2, %v5158_v24  ;;  %v2387_v56 = vsel %vm2381_vm10, 3, %v5158_v24  ;;  %v2388_v29 = vsel %vm2382_vm15, 4, %v5158_v24 }
 0x147   :  { %v1397_v63 = vrot.slane %v1383_v33, %v3393_v40  ;;  %v1398_v6 = vcombine.high %v1390_v12, %v1390_v12  ;;  %v1406_v27 = vrot.slane %v1390_v12, %v3393_v40  ;;  %v2389_v43 = vsel %vm2383_vm2, 5, %v5158_v24 }
 0x148   :  { %v2148_v23 = vmul.f32 %v4517_v52, %v2145_v34  ;;  %v2390_v28 = vsel %vm192_vm11, %v2384_v4, 2147483647  ;;  %v2391_v18 = vsel %vm192_vm11, %v2385_v36, 2147483647  ;;  %v2392_v55 = vsel %vm192_vm11, %v2386_v3, 2147483647 }
 0x149   :  { %v1399_v38 = vcombine.high %v1397_v63, %v1397_v63  ;;  %v1413_v22 = vrot.slane %v1397_v63, %v3393_v40  ;;  %v1420_v58 = vrot.slane %v1398_v6, %v3393_v40  ;;  %v1428_v11 = vcombine.high %v1406_v27, %v1406_v27 }
 0x14a   :  { %v1433_v35 = vrot.slane %v1406_v27, %v3277_v10  ;;  %v4623_v16 = vadd.f32 %v2148_v23, %v4416_v32  ;;  %v2393_v33 = vsel %vm192_vm11, %v2387_v56, 2147483647  ;;  %v2394_v52 = vsel %vm192_vm11, %v2388_v29, 2147483647 }
 0x14b   :  { %v1427_v12 = vrot.slane %v1399_v38, %v3393_v40  ;;  %v1429_v4 = vcombine.high %v1420_v58, %v1420_v58  ;;  %v1437_v36 = vrot.slane %v1420_v58, %v3277_v10  ;;  %v1441_v34 = vrot.slane %v1428_v11, %v3277_v10 }
 0x14c   :  { %v1449_v3 = vrot.slane %v1413_v22, %v3277_v10  ;;  %v1460_v63 = vadd.f32 %v1433_v35, %v4031_v9  ;;  %vm2395_vm12 = vcmp.lt.s32.totalorder %v2390_v28, %v2394_v52  ;;  %v2397_v6 = vsel %vm192_vm11, %v2389_v43, 2147483647 }
 0x14d   :  { %v1445_v32 = vrot.slane %v1429_v4, %v3277_v10  ;;  %v1453_v56 = vrot.slane %v1427_v12, %v3277_v10  ;;  %v1461_v29 = vadd.f32 %v1437_v36, %v5136_v31  ;;  %v1462_v27 = vadd.f32 %v1441_v34, %v5112_v0 }
 0x14e   :  { %v1464_v23 = vadd.f32 %v1449_v3, %v5137_v53  ;;  %v1466_v38 = vsel %vm192_vm11, %v1460_v63, -inf  ;;  %v2396_v58 = vsel %vm2395_vm12, %v2390_v28, %v2394_v52  ;;  %vm2398_vm14 = vcmp.lt.s32.totalorder %v2391_v18, %v2397_v6 }
 0x14f   :  { %v1463_v22 = vadd.f32 %v1445_v32, %v4037_v30  ;;  %v1465_v9 = vadd.f32 %v1453_v56, %v4041_v54  ;;  %v1467_v43 = vsel %vm192_vm11, %v1461_v29, -inf  ;;  %v1468_v11 = vsel %vm192_vm11, %v1462_v27, -inf }
 0x150   :  { %v1470_v35 = vsel %vm192_vm11, %v1464_v23, -inf  ;;  %v2399_v12 = vsel %vm2398_vm14, %v2391_v18, %v2397_v6  ;;  %vm2402_vm1 = vcmp.lt.s32.totalorder %v2392_v55, %v2393_v33  ;;  %v4648_v0 = vsel %vm4603_vm3, %v4573_v21, %v4484_v25 }
 0x151   :  { %v5165_v31 = vrot.slane %v4525_v39, %v3277_v10  ;;  %v1469_v54 = vsel %vm192_vm11, %v1463_v22, -inf  ;;  %v1471_v53 = vmax.f32 %v1466_v38, %v1470_v35  ;;  %v1472_v28 = vsel %vm192_vm11, %v1465_v9, -inf }
 0x152   :  { %vm2400_vm6 = vcmp.lt.s32.totalorder %v2396_v58, %v2399_v12  ;;  %v1473_v18 = vmax.f32 %v1467_v43, %v1472_v28  ;;  %v1475_v52 = vmax.f32 %v1468_v11, %v1469_v54  ;;  %v2403_v36 = vsel %vm2402_vm1, %v2392_v55, %v2393_v33 }
 0x153   :  { %vm4654_vm4 = vcmp.eq.s32.totalorder %v5162_v7, %v5165_v31  ;;  %v2401_v4 = vsel %vm2400_vm6, %v2396_v58, %v2399_v12  ;;  %v2472_v25 = vrot.slane %v2444_v1, %v3393_v40  ;;  %v2474_v21 = vcombine.high %v4584_v49, %v4584_v49 }
 0x154   :  { %vm2404_vm7 = vcmp.lt.s32.totalorder %v2401_v4, %v2403_v36  ;;  %v2478_v34 = vrot.slane %v4571_v2, %v3277_v10  ;;  %v1474_v3 = vmax.f32 %v1471_v53, %v1473_v18  ;;  %v2482_v32 = vrot.slane %v4584_v49, %v3277_v10 }
 0x155   :  { %v2405_v6 = vsel %vm2404_vm7, %v2401_v4, %v2403_v36  ;;  %v2486_v55 = vrot.slane %v2473_v15, %v3277_v10  ;;  %v2490_v1 = vrot.slane %v2474_v21, %v3277_v10  ;;  %v2494_v33 = vrot.slane %v2458_v8, %v3277_v10 }
 0x156   :  { %2408 = vst.msk [vmem:[#allocation2 + $0x30] sm:$0x3f] %vm192_vm11, %v2405_v6  ;;  %v2505_v56 = vmul.f32 %v2478_v34, %v4545_v20  ;;  %v2796_v38 = vrot.slane %v4478_v59, %v3277_v10  ;;  %v4683_v49 = vmax.f32 %v1474_v3, %v1475_v52  ;;  %v2498_v58 = vrot.slane %v2472_v25, %v3277_v10 }
 0x157   :  { %v2506_v2 = vmul.f32 %v2482_v32, %v4550_v48  ;;  %v2507_v15 = vmul.f32 %v2486_v55, %v4553_v26  ;;  %v2508_v43 = vmul.f32 %v2490_v1, %v4561_v62  ;;  %v2509_v11 = vmul.f32 %v2494_v33, %v4565_v46 }
 0x158   :  { %v2511_v41 = vsel %vm192_vm11, %v2505_v56, 0.0  ;;  %v2668_v8 = vcombine.high %v4648_v0, %v4648_v0  ;;  %v1477_v35 = vsub.f32 %v1460_v63, %v4683_v49  ;;  %v1478_v59 = vsub.f32 %v1461_v29, %v4683_v49 }
 0x159   :  { %v1479_v12 = vsub.f32 %v1462_v27, %v4683_v49  ;;  %v1480_v31 = vsub.f32 %v1463_v22, %v4683_v49  ;;  %v1481_v54 = vsub.f32 %v1464_v23, %v4683_v49  ;;  %v1482_v53 = vsub.f32 %v1465_v9, %v4683_v49 }
 0x15a   :  { %v2512_v28 = vsel %vm192_vm11, %v2506_v2, 0.0  ;;  %v2514_v18 = vsel %vm192_vm11, %v2507_v15, 0.0  ;;  %v1483_v52 = vmul.f32 1.442695, %v1477_v35  ;;  %v1485_v4 = vmul.f32 1.442695, %v1478_v59 }
 0x15b   :  { %v1487_v36 = vmul.f32 1.442695, %v1479_v12  ;;  %v2513_v25 = vadd.f32 %v2512_v28, %v2511_v41  ;;  %v1489_v21 = vmul.f32 1.442695, %v1480_v31  ;;  %v3058_v63 = vsel %vm4654_vm4, 1.0, %v5150_v50 }
 0x15c   :  { %v2510_v29 = vmul.f32 %v2498_v58, %v4576_v37  ;;  %v2675_v27 = vrot.slane %v4648_v0, %v3393_v40  ;;  %3121 = vpow2.f32 %v1483_v52  ;;  %v1491_v23 = vmul.f32 1.442695, %v1481_v54 }
 0x15d   :  { %vm2413_vm8 = vcmp.ne.s32.totalorder %v4525_v39, 5  ;;  %v2515_v22 = vadd.f32 %v2514_v18, %v2513_v25  ;;  %v2516_v9 = vsel %vm192_vm11, %v2508_v43, 0.0  ;;  %3123 = vpow2.f32 %v1485_v4 }
 0x15e   :  { %v1493_v34 = vmul.f32 1.442695, %v1482_v53  ;;  %v2682_v3 = vrot.slane %v2668_v8, %v3393_v40  ;;  %vm4711_vm10 = vcmp.eq.s32.totalorder %v5162_v7, %v2796_v38  ;;  %3125 = vpow2.f32 %v1487_v36 }
 0x15f   :  { %v2517_v6 = vadd.f32 %v2516_v9, %v2515_v22  ;;  %v2518_v32 = vsel %vm192_vm11, %v2509_v11, 0.0  ;;  %v2683_v55 = vcombine.high %v2675_v27, %v2675_v27  ;;  %3127 = vpow2.f32 %v1489_v21  ;;  %v4722_v11 = vpop.permute.xlu1 %2802 }
 0x160   :  { %v2684_v1 = vcombine.high %v2682_v3, %v2682_v3  ;;  %v2691_v33 = vrot.slane %v2675_v27, %v3393_v40  ;;  %v2698_v56 = vrot.slane %v2682_v3, %v3393_v40  ;;  %3129 = vpow2.f32 %v1491_v23 }
 0x161   :  { %v2519_v58 = vadd.f32 %v2518_v32, %v2517_v6  ;;  %v2520_v2 = vsel %vm192_vm11, %v2510_v29, 0.0  ;;  %v2705_v38 = vrot.slane %v2683_v55, %v3393_v40  ;;  %3131 = vpow2.f32 %v1493_v34 }
 0x162   :  { %v2712_v15 = vrot.slane %v2684_v1, %v3393_v40  ;;  %v2713_v43 = vcombine.high %v2691_v33, %v2691_v33  ;;  %v2718_v41 = vrot.slane %v2691_v33, %v3277_v10  ;;  %v2734_v12 = vrot.slane %v2698_v56, %v3277_v10 }
 0x163   :  { %v2521_v8 = vadd.f32 %v2520_v2, %v2519_v58  ;;  %v2714_v35 = vcombine.high %v2705_v38, %v2705_v38  ;;  %v2722_v59 = vrot.slane %v2705_v38, %v3277_v10  ;;  %v3060_v28 = vsel %vm4711_vm10, 1.0, %v5150_v50 }
 0x164   :  { %v2726_v31 = vrot.slane %v2713_v43, %v3277_v10  ;;  %v2738_v54 = vrot.slane %v2712_v15, %v3277_v10  ;;  %v2745_v53 = vadd.f32 %v2718_v41, %v4545_v20  ;;  %v2749_v36 = vadd.f32 %v2734_v12, %v4565_v46 }
 0x165   :  { %v2522_v18 = vmul.f32 %v3058_v63, %v2521_v8  ;;  %v2730_v52 = vrot.slane %v2714_v35, %v3277_v10  ;;  %v2746_v4 = vadd.f32 %v2722_v59, %v4550_v48  ;;  %v2530_v25 = vsel %vm2413_vm8, 1, %v5121_v5 }
 0x166   :  { %v2750_v21 = vadd.f32 %v2738_v54, %v4576_v37  ;;  %v2805_v29 = vmul.f32 %v3060_v28, %v4722_v11  ;;  %v3122_v27 = vpop.eup %3121  ;;  %v2747_v22 = vadd.f32 %v2726_v31, %v4553_v26  ;;  %v2755_v9 = vsel %vm192_vm11, %v2749_v36, -inf }
 0x167   :  { %v2523_v23 = vsel %vm192_vm11, %v2522_v18, 0.0  ;;  %v2748_v63 = vadd.f32 %v2730_v52, %v4561_v62  ;;  %v3124_v34 = vpop.eup %3123  ;;  %v1495_v3 = vsel %vm192_vm11, %v3122_v27, 0.0  ;;  %v2751_v6 = vsel %vm192_vm11, %v2745_v53, -inf }
 0x168   :  { %v2524_v30 = vrot.slane %v2523_v23, 4  ;;  %v2752_v5 = vsel %vm192_vm11, %v2746_v4, -inf  ;;  %v3126_v32 = vpop.eup %3125  ;;  %v1496_v55 = vsel %vm192_vm11, %v3124_v34, 0.0  ;;  %v2757_v33 = vsel %vm192_vm11, %v2750_v21, -inf }
 0x169   :  { %v2754_v1 = vsel %vm192_vm11, %v2748_v63, -inf  ;;  %v2806_v56 = vsel %vm192_vm11, %v2805_v29, 0.0  ;;  %v3128_v58 = vpop.eup %3127  ;;  %v1497_v2 = vadd.f32 %v1496_v55, %v1495_v3  ;;  %v2756_v15 = vmax.f32 %v2751_v6, %v2755_v9 }
 0x16a   :  { %v2525_v38 = vadd.f32 %v2524_v30, %v2523_v23  ;;  %v2758_v43 = vmax.f32 %v2752_v5, %v2757_v33  ;;  %v3130_v41 = vpop.eup %3129  ;;  %v1498_v8 = vsel %vm192_vm11, %v3126_v32, 0.0  ;;  %v2664_v35 = vrot.slane %v2530_v25, %v3277_v10 }
 0x16b   :  { %v2753_v59 = vsel %vm192_vm11, %v2747_v22, -inf  ;;  %v2807_v12 = vrot.slane %v2806_v56, 4  ;;  %v3132_v31 = vpop.eup %3131  ;;  %v1499_v54 = vadd.f32 %v1498_v8, %v1497_v2  ;;  %v1500_v29 = vsel %vm192_vm11, %v3128_v58, 0.0 }
 0x16c   :  { %v2526_v28 = vrot.slane %v2525_v38, 2  ;;  %v2759_v18 = vmax.f32 %v2756_v15, %v2758_v43  ;;  %v2760_v52 = vmax.f32 %v2753_v59, %v2754_v1  ;;  %v3059_v9 = vsel %vm2413_vm8, 1.0, %v5150_v50 }
 0x16d   :  { %v2808_v27 = vadd.f32 %v2807_v12, %v2806_v56  ;;  %v1501_v34 = vadd.f32 %v1500_v29, %v1499_v54  ;;  %v1502_v25 = vsel %vm192_vm11, %v3130_v41, 0.0  ;;  %v1504_v30 = vsel %vm192_vm11, %v3132_v31, 0.0 }
 0x16e   :  { %v2527_v23 = vadd.f32 %v2526_v28, %v2525_v38  ;;  %v2761_v3 = vmax.f32 %v2759_v18, %v2760_v52  ;;  %vm4760_vm15 = vcmp.eq.s32.totalorder %v2664_v35, 1 }
 0x16f   :  { %v2809_v5 = vrot.slane %v2808_v27, 2  ;;  %v1503_v32 = vadd.f32 %v1502_v25, %v1501_v34 }
 0x170   :  { %v2528_v55 = vrot.slane %v2527_v23, 1  ;;  %vm2762_vm2 = vcmp.eq.f32.partialorder %v2745_v53, %v2761_v3  ;;  %vm2763_vm12 = vcmp.eq.f32.partialorder %v2746_v4, %v2761_v3  ;;  %vm2764_vm14 = vcmp.eq.f32.partialorder %v2747_v22, %v2761_v3 }
 0x171   :  { %vm2765_vm1 = vcmp.eq.f32.partialorder %v2748_v63, %v2761_v3  ;;  %vm2766_vm4 = vcmp.eq.f32.partialorder %v2749_v36, %v2761_v3  ;;  %vm2767_vm6 = vcmp.eq.f32.partialorder %v2750_v21, %v2761_v3  ;;  %v1505_v39 = vadd.f32 %v1504_v30, %v1503_v32 }
 0x172   :  { %v2529_v50 = vadd.f32 %v2528_v55, %v2527_v23  ;;  %v2768_v1 = vsel %vm2762_vm2, 0, %v5158_v24  ;;  %v2769_v33 = vsel %vm2763_vm12, 1, %v5158_v24  ;;  %v2770_v56 = vsel %vm2764_vm14, 2, %v5158_v24 }
 0x173   :  { %v2771_v58 = vsel %vm2765_vm1, 3, %v5158_v24  ;;  %v2772_v2 = vsel %vm2766_vm4, 4, %v5158_v24  ;;  %v2773_v38 = vsel %vm2767_vm6, 5, %v5158_v24  ;;  %3133 = vlog2.f32 %v1505_v39 }
 0x174   :  { %v2532_v53 = vmul.f32 %v3059_v9, %v2529_v50  ;;  %v2774_v4 = vsel %vm192_vm11, %v2768_v1, 2147483647  ;;  %v2775_v36 = vsel %vm192_vm11, %v2769_v33, 2147483647  ;;  %v2776_v21 = vsel %vm192_vm11, %v2770_v56, 2147483647 }
 0x175   :  { %v2777_v22 = vsel %vm192_vm11, %v2771_v58, 2147483647  ;;  %v2778_v63 = vsel %vm192_vm11, %v2772_v2, 2147483647  ;;  %v2790_v15 = vsel %vm4760_vm15, %v2761_v3, %v4648_v0  ;;  %v2781_v24 = vsel %vm192_vm11, %v2773_v38, 2147483647 }
 0x176   :  { %v2533_v43 = vadd.f32 %v2532_v53, %v4623_v16  ;;  %vm2779_vm7 = vcmp.lt.s32.totalorder %v2774_v4, %v2778_v63  ;;  %vm2782_vm8 = vcmp.lt.s32.totalorder %v2775_v36, %v2781_v24  ;;  %vm2786_vm10 = vcmp.lt.s32.totalorder %v2776_v21, %v2777_v22 }
 0x177   :  { %v2780_v41 = vsel %vm2779_vm7, %v2774_v4, %v2778_v63  ;;  %v2810_v8 = vadd.f32 %v2809_v5, %v2808_v27  ;;  %v2783_v35 = vsel %vm2782_vm8, %v2775_v36, %v2781_v24  ;;  %v2837_v59 = vadd.f32 %v4722_v11, %v2790_v15 }
 0x178   :  { %vm2784_vm2 = vcmp.lt.s32.totalorder %v2780_v41, %v2783_v35  ;;  %v2787_v54 = vsel %vm2786_vm10, %v2776_v21, %v2777_v22 }
 0x179   :  { %v2811_v12 = vrot.slane %v2810_v8, 1  ;;  %v2785_v31 = vsel %vm2784_vm2, %v2780_v41, %v2783_v35  ;;  %v2838_v28 = vsel %vm192_vm11, %v2837_v59, -inf  ;;  %v5172_v35 = vld [vmem:[#allocation37_spill] sm:$0xff] }
 0x17a   :  { %vm2788_vm12 = vcmp.lt.s32.totalorder %v2785_v31, %v2787_v54  ;;  %v2839_v18 = vrot.slane %v2838_v28, 4 }
 0x17b   :  { %v2812_v0 = vadd.f32 %v2811_v12, %v2810_v8  ;;  %v2789_v16 = vsel %vm2788_vm12, %v2785_v31, %v2787_v54  ;;  %v5173_v12 = vld [vmem:[#allocation16_spill] sm:$0xff] }
 0x17c   :  { %2792 = vst.msk [vmem:[#allocation2 + $0x38] sm:$0x3f] %vm192_vm11, %v2789_v16  ;;  %v2840_v29 = vmax.f32 %v2838_v28, %v2839_v18 }
 0x17d   :  { %v4783_v52 = vadd.f32 %v2812_v0, %v2533_v43  ;;  %v3134_v34 = vpop.eup %3133 }
 0x17e   :  { %v1507_v27 = vmul.f32 0.6931472, %v3134_v34  ;;  %v2841_v23 = vrot.slane %v2840_v29, 2 }
 0x180   :  { %v1508_v9 = vadd.f32 %v1507_v27, %v4683_v49  ;;  %v2842_v3 = vmax.f32 %v2840_v29, %v2841_v23 }
 0x182   :  { %v4789_v25 = vsel %vm4272_vm13, %v1508_v9, %v4595_v61  ;;  %v2843_v30 = vrot.slane %v2842_v3, 1 }
 0x183   :  { %v1767_v5 = vcombine.high %v4789_v25, %v4789_v25  ;;  %v1774_v32 = vrot.slane %v4789_v25, %v3393_v40 }
 0x184   :  { %v2844_v55 = vmax.f32 %v2842_v3, %v2843_v30 }
 0x185   :  { %v1781_v39 = vrot.slane %v1767_v5, %v3393_v40  ;;  %v1782_v50 = vcombine.high %v1774_v32, %v1774_v32  ;;  %v1790_v1 = vrot.slane %v1774_v32, %v3393_v40 }
 0x186   :  { %vm2845_vm14 = vcmp.eq.f32.partialorder %v2837_v59, %v2844_v55 }
 0x187   :  { %v1783_v49 = vcombine.high %v1781_v39, %v1781_v39  ;;  %v1797_v33 = vrot.slane %v1781_v39, %v3393_v40  ;;  %v1804_v45 = vrot.slane %v1782_v50, %v3393_v40  ;;  %v1812_v61 = vcombine.high %v1790_v1, %v1790_v1 }
 0x188   :  { %v1817_v56 = vrot.slane %v1790_v1, %v3277_v10  ;;  %v2846_v58 = vsel %vm2845_vm14, %v5162_v7, 6 }
 0x189   :  { %v1811_v2 = vrot.slane %v1783_v49, %v3393_v40  ;;  %v1813_v38 = vcombine.high %v1804_v45, %v1804_v45  ;;  %v1821_v53 = vrot.slane %v1804_v45, %v3277_v10  ;;  %v1825_v4 = vrot.slane %v1812_v61, %v3277_v10 }
 0x18a   :  { %v1833_v36 = vrot.slane %v1797_v33, %v3277_v10  ;;  %v1844_v21 = vadd.f32 %v1817_v56, %v4208_v19  ;;  %v2847_v22 = vsel %vm192_vm11, %v2846_v58, 2147483647  ;;  %v2860_v56 = vld [vmem:[#allocation2 + $0x38] sm:$0x3f]  ;;  %v5174_v58 = vld [vmem:[#allocation7_spill] sm:$0xff] }
 0x18b   :  { %v1829_v63 = vrot.slane %v1813_v38, %v3277_v10  ;;  %v1837_v15 = vrot.slane %v1811_v2, %v3277_v10  ;;  %v1845_v43 = vadd.f32 %v1821_v53, %v5152_v44  ;;  %v2848_v41 = vrot.slane %v2847_v22, 4 }
 0x18c   :  { %v1848_v24 = vadd.f32 %v1833_v36, %v4025_v60  ;;  %v1846_v8 = vadd.f32 %v1825_v4, %v4215_v14  ;;  %v1850_v54 = vsel %vm192_vm11, %v1844_v21, -inf  ;;  %vm2872_vm7 = vcmp.ge.s32.totalorder %v5174_v58, 6 }
 0x18d   :  { %v1847_v59 = vadd.f32 %v1829_v63, %v5172_v35  ;;  %v1849_v31 = vadd.f32 %v1837_v15, %v5173_v12  ;;  %vm2849_vm13 = vcmp.lt.s32.totalorder %v2847_v22, %v2848_v41  ;;  %v1851_v28 = vsel %vm192_vm11, %v1845_v43, -inf }
 0x18e   :  { %v1854_v19 = vsel %vm192_vm11, %v1848_v24, -inf  ;;  %v2850_v18 = vsel %vm2849_vm13, %v2847_v22, %v2848_v41  ;;  %v1852_v14 = vsel %vm192_vm11, %v1846_v8, -inf  ;;  %vm2890_vm10 = vcmp.gt.s32.totalorder %v5174_v58, 5 }
 0x18f   :  { %v1853_v0 = vsel %vm192_vm11, %v1847_v59, -inf  ;;  %v1856_v44 = vsel %vm192_vm11, %v1849_v31, -inf  ;;  %v1855_v60 = vmax.f32 %v1850_v54, %v1854_v19  ;;  %v2851_v29 = vrot.slane %v2850_v18, 2 }
 0x190   :  { %v1857_v16 = vmax.f32 %v1851_v28, %v1856_v44  ;;  %v1859_v27 = vmax.f32 %v1852_v14, %v1853_v0  ;;  %vm2892_vm2 = vcmp.ge.s32.totalorder %v5174_v58, 5  ;;  %vm2912_vm14 = vcmp.ge.s32.totalorder %v5174_v58, 4 }
 0x191   :  { %vm2852_vm1 = vcmp.lt.s32.totalorder %v2850_v18, %v2851_v29 }
 0x192   :  { %v1858_v34 = vmax.f32 %v1855_v60, %v1857_v16  ;;  %v2853_v23 = vsel %vm2852_vm1, %v2850_v18, %v2851_v29  ;;  %vm2930_vm1 = vcmp.gt.s32.totalorder %v5174_v58, 3 }
 0x193   :  { %v2854_v3 = vrot.slane %v2853_v23, 1 }
 0x194   :  { %v4820_v9 = vmax.f32 %v1858_v34, %v1859_v27  ;;  %v2876_v34 = vld [vmem:[#allocation2 + $0x30] sm:$0x3f] }
 0x195   :  { %vm2855_vm4 = vcmp.lt.s32.totalorder %v2853_v23, %v2854_v3 }
 0x196   :  { %v1861_v30 = vsub.f32 %v1844_v21, %v4820_v9  ;;  %v1862_v5 = vsub.f32 %v1845_v43, %v4820_v9  ;;  %v1863_v32 = vsub.f32 %v1846_v8, %v4820_v9  ;;  %v1864_v55 = vsub.f32 %v1847_v59, %v4820_v9 }
 0x197   :  { %v1865_v39 = vsub.f32 %v1848_v24, %v4820_v9  ;;  %v4827_v33 = vsel %vm2855_vm4, %v2853_v23, %v2854_v3  ;;  %v1866_v45 = vsub.f32 %v1849_v31, %v4820_v9  ;;  %vm2932_vm4 = vcmp.ge.s32.totalorder %v5174_v58, 3 }
 0x198   :  { %v1867_v50 = vmul.f32 1.442695, %v1861_v30  ;;  %v1869_v1 = vmul.f32 1.442695, %v1862_v5  ;;  %v1871_v49 = vmul.f32 1.442695, %v1863_v32  ;;  %vm2861_vm6 = vcmp.eq.s32.totalorder %v5162_v7, %v4827_v33 }
 0x199   :  { %v1873_v61 = vmul.f32 1.442695, %v1864_v55  ;;  %v2857_v2 = vsel %vm125_vm0, %v4827_v33, 5  ;;  %v2862_v38 = vsel %vm2861_vm6, %v2860_v56, 0  ;;  %v1875_v53 = vmul.f32 1.442695, %v1865_v39 }
 0x19a   :  { %3135 = vpow2.f32 %v1867_v50  ;;  %3061 = vst.msk [vmem:[%s5024_s5 + $0x7] sm:$0x1] %vm100_vm5, %v2857_v2  ;;  %v2863_v4 = vsel %vm192_vm11, %v2862_v38, 0  ;;  %v1877_v21 = vmul.f32 1.442695, %v1866_v45  ;;  %vm2870_vm0 = vcmp.gt.s32.totalorder %v5174_v58, 6 }
 0x19b   :  { %3137 = vpow2.f32 %v1869_v1  ;;  %v2864_v36 = vrot.slane %v2863_v4, 4 }
 0x19c   :  { %3139 = vpow2.f32 %v1871_v49 }
 0x19d   :  { %3141 = vpow2.f32 %v1873_v61  ;;  %v2865_v22 = vadd.s32 %v2864_v36, %v2863_v4  ;;  %v2896_v4 = vld [vmem:[#allocation2 + $0x28] sm:$0x3f] }
 0x19e   :  { %3143 = vpow2.f32 %v1875_v53 }
 0x19f   :  { %v2866_v63 = vrot.slane %v2865_v22, 2  ;;  %3145 = vpow2.f32 %v1877_v21 }
 0x1a1   :  { %v2867_v15 = vadd.s32 %v2866_v63, %v2865_v22 }
 0x1a3   :  { %v2868_v24 = vrot.slane %v2867_v15, 1 }
 0x1a4   :  { %v3136_v43 = vpop.eup %3135 }
 0x1a5   :  { %v3138_v41 = vpop.eup %3137  ;;  %v1879_v8 = vsel %vm192_vm11, %v3136_v43, 0.0  ;;  %v2869_v12 = vadd.s32 %v2868_v24, %v2867_v15 }
 0x1a6   :  { %v3140_v35 = vpop.eup %3139  ;;  %v1880_v59 = vsel %vm192_vm11, %v3138_v41, 0.0 }
 0x1a7   :  { %v3142_v31 = vpop.eup %3141  ;;  %v1881_v54 = vadd.f32 %v1880_v59, %v1879_v8  ;;  %v1882_v19 = vsel %vm192_vm11, %v3140_v35, 0.0  ;;  %v2871_v28 = vsel %vm2870_vm0, %v2869_v12, %v4827_v33  ;;  %vm2950_vm0 = vcmp.gt.s32.totalorder %v5174_v58, 2 }
 0x1a8   :  { %v3144_v0 = vpop.eup %3143  ;;  %v2873_v18 = vsel %vm2872_vm7, %v2871_v28, 5  ;;  %v2880_v60 = vrot.slane %v2871_v28, %v3277_v10  ;;  %v1884_v16 = vsel %vm192_vm11, %v3142_v31, 0.0  ;;  %vm2952_vm7 = vcmp.ge.s32.totalorder %v5174_v58, 2 }
 0x1a9   :  { %v1883_v44 = vadd.f32 %v1882_v19, %v1881_v54  ;;  %3062 = vst.msk [vmem:[%s5024_s5 + $0x6] sm:$0x1] %vm100_vm5, %v2873_v18  ;;  %v3146_v29 = vpop.eup %3145  ;;  %v1886_v27 = vsel %vm192_vm11, %v3144_v0, 0.0 }
 0x1aa   :  { %vm2881_vm8 = vcmp.eq.s32.totalorder %v5162_v7, %v2880_v60  ;;  %v1888_v5 = vsel %vm192_vm11, %v3146_v29, 0.0 }
 0x1ab   :  { %v1885_v14 = vadd.f32 %v1884_v16, %v1883_v44  ;;  %v2882_v23 = vsel %vm2881_vm8, %v2876_v34, 0 }
 0x1ac   :  { %v2883_v30 = vsel %vm192_vm11, %v2882_v23, 0 }
 0x1ad   :  { %v1887_v3 = vadd.f32 %v1886_v27, %v1885_v14  ;;  %v2884_v32 = vrot.slane %v2883_v30, 4 }
 0x1af   :  { %v1889_v55 = vadd.f32 %v1888_v5, %v1887_v3  ;;  %v2885_v39 = vadd.s32 %v2884_v32, %v2883_v30  ;;  %v5175_v5 = vld [vmem:[#allocation36_spill] sm:$0xff] }
 0x1b1   :  { %3147 = vlog2.f32 %v1889_v55  ;;  %v2886_v50 = vrot.slane %v2885_v39, 2  ;;  %v5176_v55 = vld [vmem:[#allocation12_spill] sm:$0xff] }
 0x1b3   :  { %v2887_v1 = vadd.s32 %v2886_v50, %v2885_v39 }
 0x1b5   :  { %v2888_v49 = vrot.slane %v2887_v1, 1 }
 0x1b7   :  { %v2889_v45 = vadd.s32 %v2888_v49, %v2887_v1 }
 0x1b9   :  { %v2891_v61 = vsel %vm2890_vm10, %v2889_v45, %v4827_v33  ;;  %vm2970_vm10 = vcmp.gt.s32.totalorder %v5174_v58, 1 }
 0x1ba   :  { %v2893_v2 = vsel %vm2892_vm2, %v2891_v61, 5  ;;  %v2900_v38 = vrot.slane %v2891_v61, %v3277_v10  ;;  %vm2972_vm2 = vcmp.ge.s32.totalorder %v5174_v58, 1 }
 0x1bb   :  { %v3148_v56 = vpop.eup %3147  ;;  %3063 = vst.msk [vmem:[%s5024_s5 + $0x5] sm:$0x1] %vm100_vm5, %v2893_v2 }
 0x1bc   :  { %v1891_v53 = vmul.f32 0.6931472, %v3148_v56  ;;  %vm2901_vm12 = vcmp.eq.s32.totalorder %v5162_v7, %v2900_v38 }
 0x1bd   :  { %v2902_v21 = vsel %vm2901_vm12, %v2896_v4, 0  ;;  %v2916_v4 = vld [vmem:[#allocation2 + $0x20] sm:$0x3f]  ;;  %vm2990_vm12 = vcmp.gt.s32.totalorder %v5174_v58, 0 }
 0x1be   :  { %v1892_v36 = vadd.f32 %v1891_v53, %v4820_v9  ;;  %v2903_v22 = vsel %vm192_vm11, %v2902_v21, 0 }
 0x1bf   :  { %v2904_v15 = vrot.slane %v2903_v22, 4 }
 0x1c0   :  { %v4870_v63 = vsel %vm4442_vm9, %v1892_v36, %v4789_v25  ;;  %vm2910_vm9 = vcmp.gt.s32.totalorder %v5174_v58, 4 }
 0x1c1   :  { %v2151_v43 = vcombine.high %v4870_v63, %v4870_v63  ;;  %v2158_v24 = vrot.slane %v4870_v63, %v3393_v40  ;;  %v2905_v41 = vadd.s32 %v2904_v15, %v2903_v22 }
 0x1c3   :  { %v2165_v8 = vrot.slane %v2151_v43, %v3393_v40  ;;  %v2166_v35 = vcombine.high %v2158_v24, %v2158_v24  ;;  %v2174_v9 = vrot.slane %v2158_v24, %v3393_v40  ;;  %v2906_v59 = vrot.slane %v2905_v41, 2 }
 0x1c5   :  { %v2167_v12 = vcombine.high %v2165_v8, %v2165_v8  ;;  %v2181_v31 = vrot.slane %v2165_v8, %v3393_v40  ;;  %v2188_v51 = vrot.slane %v2166_v35, %v3393_v40  ;;  %v2196_v25 = vcombine.high %v2174_v9, %v2174_v9 }
 0x1c6   :  { %v2201_v54 = vrot.slane %v2174_v9, %v3277_v10  ;;  %v2907_v19 = vadd.s32 %v2906_v59, %v2905_v41 }
 0x1c7   :  { %v2195_v28 = vrot.slane %v2167_v12, %v3393_v40  ;;  %v2197_v0 = vcombine.high %v2188_v51, %v2188_v51  ;;  %v2205_v44 = vrot.slane %v2188_v51, %v3277_v10  ;;  %v2209_v18 = vrot.slane %v2196_v25, %v3277_v10 }
 0x1c8   :  { %v2217_v60 = vrot.slane %v2181_v31, %v3277_v10  ;;  %v2228_v16 = vadd.f32 %v2201_v54, %v4347_v17  ;;  %v2908_v29 = vrot.slane %v2907_v19, 1 }
 0x1c9   :  { %v2213_v14 = vrot.slane %v2197_v0, %v3277_v10  ;;  %v2221_v34 = vrot.slane %v2195_v28, %v3277_v10  ;;  %v2229_v27 = vadd.f32 %v2205_v44, %v4282_v57  ;;  %v2230_v30 = vadd.f32 %v2209_v18, %v4392_v42 }
 0x1ca   :  { %v2232_v23 = vadd.f32 %v2217_v60, %v4424_v13  ;;  %v2909_v3 = vadd.s32 %v2908_v29, %v2907_v19  ;;  %v2234_v39 = vsel %vm192_vm11, %v2228_v16, -inf }
 0x1cb   :  { %v2231_v32 = vadd.f32 %v2213_v14, %v5175_v5  ;;  %v2233_v17 = vadd.f32 %v2221_v34, %v5176_v55  ;;  %v2235_v57 = vsel %vm192_vm11, %v2229_v27, -inf  ;;  %v2236_v2 = vsel %vm192_vm11, %v2230_v30, -inf }
 0x1cc   :  { %v2238_v50 = vsel %vm192_vm11, %v2232_v23, -inf  ;;  %v2911_v1 = vsel %vm2910_vm9, %v2909_v3, %v4827_v33  ;;  %vm2992_vm9 = vcmp.ge.s32.totalorder %v5174_v58, 0 }
 0x1cd   :  { %v2237_v49 = vsel %vm192_vm11, %v2231_v32, -inf  ;;  %v2240_v13 = vsel %vm192_vm11, %v2233_v17, -inf  ;;  %v2913_v45 = vsel %vm2912_vm14, %v2911_v1, 5  ;;  %v2239_v61 = vmax.f32 %v2234_v39, %v2238_v50 }
 0x1ce   :  { %v2241_v56 = vmax.f32 %v2235_v57, %v2240_v13  ;;  %3064 = vst.msk [vmem:[%s5024_s5 + $0x4] sm:$0x1] %vm100_vm5, %v2913_v45  ;;  %v2920_v42 = vrot.slane %v2911_v1, %v3277_v10  ;;  %v2243_v53 = vmax.f32 %v2236_v2, %v2237_v49 }
 0x1d0   :  { %v2242_v38 = vmax.f32 %v2239_v61, %v2241_v56  ;;  %vm2921_vm13 = vcmp.eq.s32.totalorder %v5162_v7, %v2920_v42 }
 0x1d1   :  { %v2922_v36 = vsel %vm2921_vm13, %v2916_v4, 0 }
 0x1d2   :  { %v4908_v21 = vmax.f32 %v2242_v38, %v2243_v53  ;;  %v2923_v22 = vsel %vm192_vm11, %v2922_v36, 0 }
 0x1d3   :  { %v2924_v15 = vrot.slane %v2923_v22, 4 }
 0x1d4   :  { %v2245_v43 = vsub.f32 %v2228_v16, %v4908_v21  ;;  %v2246_v24 = vsub.f32 %v2229_v27, %v4908_v21  ;;  %v2247_v41 = vsub.f32 %v2230_v30, %v4908_v21  ;;  %v2248_v8 = vsub.f32 %v2231_v32, %v4908_v21 }
 0x1d5   :  { %v2249_v35 = vsub.f32 %v2232_v23, %v4908_v21  ;;  %v2925_v9 = vadd.s32 %v2924_v15, %v2923_v22  ;;  %v2250_v51 = vsub.f32 %v2233_v17, %v4908_v21  ;;  %v2936_v23 = vld [vmem:[#allocation2 + $0x18] sm:$0x3f] }
 0x1d6   :  { %v2251_v59 = vmul.f32 1.442695, %v2245_v43  ;;  %v2253_v12 = vmul.f32 1.442695, %v2246_v24  ;;  %v2255_v31 = vmul.f32 1.442695, %v2247_v41 }
 0x1d7   :  { %v2257_v25 = vmul.f32 1.442695, %v2248_v8  ;;  %v2926_v54 = vrot.slane %v2925_v9, 2  ;;  %v2259_v19 = vmul.f32 1.442695, %v2249_v35 }
 0x1d8   :  { %3149 = vpow2.f32 %v2251_v59  ;;  %v2261_v0 = vmul.f32 1.442695, %v2250_v51  ;;  %v2956_v41 = vld [vmem:[#allocation2 + $0x10] sm:$0x3f] }
 0x1d9   :  { %3151 = vpow2.f32 %v2253_v12  ;;  %v2927_v28 = vadd.s32 %v2926_v54, %v2925_v9 }
 0x1da   :  { %3153 = vpow2.f32 %v2255_v31 }
 0x1db   :  { %3155 = vpow2.f32 %v2257_v25  ;;  %v2928_v44 = vrot.slane %v2927_v28, 1 }
 0x1dc   :  { %3157 = vpow2.f32 %v2259_v19 }
 0x1dd   :  { %v2929_v18 = vadd.s32 %v2928_v44, %v2927_v28  ;;  %3159 = vpow2.f32 %v2261_v0 }
 0x1df   :  { %v2931_v60 = vsel %vm2930_vm1, %v2929_v18, %v4827_v33 }
 0x1e0   :  { %v2933_v16 = vsel %vm2932_vm4, %v2931_v60, 5  ;;  %v2940_v29 = vrot.slane %v2931_v60, %v3277_v10 }
 0x1e1   :  { %3065 = vst.msk [vmem:[%s5024_s5 + $0x3] sm:$0x1] %vm100_vm5, %v2933_v16 }
 0x1e2   :  { %v3150_v14 = vpop.eup %3149  ;;  %vm2941_vm6 = vcmp.eq.s32.totalorder %v5162_v7, %v2940_v29 }
 0x1e3   :  { %v3152_v34 = vpop.eup %3151  ;;  %v2263_v27 = vsel %vm192_vm11, %v3150_v14, 0.0  ;;  %v2942_v5 = vsel %vm2941_vm6, %v2936_v23, 0 }
 0x1e4   :  { %v3154_v3 = vpop.eup %3153  ;;  %v2264_v30 = vsel %vm192_vm11, %v3152_v34, 0.0  ;;  %v2943_v17 = vsel %vm192_vm11, %v2942_v5, 0 }
 0x1e5   :  { %v3156_v32 = vpop.eup %3155  ;;  %v2265_v55 = vadd.f32 %v2264_v30, %v2263_v27  ;;  %v2266_v39 = vsel %vm192_vm11, %v3154_v3, 0.0  ;;  %v2944_v50 = vrot.slane %v2943_v17, 4 }
 0x1e6   :  { %v3158_v1 = vpop.eup %3157  ;;  %v2268_v49 = vsel %vm192_vm11, %v3156_v32, 0.0 }
 0x1e7   :  { %v2267_v57 = vadd.f32 %v2266_v39, %v2265_v55  ;;  %v2945_v13 = vadd.s32 %v2944_v50, %v2943_v17  ;;  %v3160_v45 = vpop.eup %3159  ;;  %v2270_v56 = vsel %vm192_vm11, %v3158_v1, 0.0 }
 0x1e8   :  { %v2272_v38 = vsel %vm192_vm11, %v3160_v45, 0.0  ;;  %v2976_v45 = vld [vmem:[#allocation2 + $0x8] sm:$0x3f] }
 0x1e9   :  { %v2269_v61 = vadd.f32 %v2268_v49, %v2267_v57  ;;  %v2946_v42 = vrot.slane %v2945_v13, 2 }
 0x1eb   :  { %v2271_v2 = vadd.f32 %v2270_v56, %v2269_v61  ;;  %v2947_v53 = vadd.s32 %v2946_v42, %v2945_v13 }
 0x1ed   :  { %v2273_v4 = vadd.f32 %v2272_v38, %v2271_v2  ;;  %v2948_v36 = vrot.slane %v2947_v53, 1 }
 0x1ef   :  { %3161 = vlog2.f32 %v2273_v4  ;;  %v2949_v22 = vadd.s32 %v2948_v36, %v2947_v53 }
 0x1f1   :  { %v2951_v15 = vsel %vm2950_vm0, %v2949_v22, %v4827_v33 }
 0x1f2   :  { %v2953_v43 = vsel %vm2952_vm7, %v2951_v15, 5  ;;  %v2960_v24 = vrot.slane %v2951_v15, %v3277_v10 }
 0x1f3   :  { %3066 = vst.msk [vmem:[%s5024_s5 + $0x2] sm:$0x1] %vm100_vm5, %v2953_v43 }
 0x1f4   :  { %vm2961_vm8 = vcmp.eq.s32.totalorder %v5162_v7, %v2960_v24 }
 0x1f5   :  { %v2962_v8 = vsel %vm2961_vm8, %v2956_v41, 0 }
 0x1f6   :  { %v2963_v35 = vsel %vm192_vm11, %v2962_v8, 0 }
 0x1f7   :  { %v2964_v9 = vrot.slane %v2963_v35, 4 }
 0x1f9   :  { %v3162_v59 = vpop.eup %3161  ;;  %v2965_v31 = vadd.s32 %v2964_v9, %v2963_v35 }
 0x1fa   :  { %v2275_v12 = vmul.f32 0.6931472, %v3162_v59 }
 0x1fb   :  { %v2966_v25 = vrot.slane %v2965_v31, 2 }
 0x1fc   :  { %v2276_v51 = vadd.f32 %v2275_v12, %v4908_v21 }
 0x1fd   :  { %v2967_v19 = vadd.s32 %v2966_v25, %v2965_v31 }
 0x1fe   :  { %v4947_v54 = vsel %vm4603_vm3, %v2276_v51, %v4870_v63 }
 0x1ff   :  { %v2535_v28 = vcombine.high %v4947_v54, %v4947_v54  ;;  %v2542_v0 = vrot.slane %v4947_v54, %v3393_v40  ;;  %v2968_v44 = vrot.slane %v2967_v19, 1 }
 0x201   :  { %v2549_v18 = vrot.slane %v2535_v28, %v3393_v40  ;;  %v2550_v60 = vcombine.high %v2542_v0, %v2542_v0  ;;  %v2558_v16 = vrot.slane %v2542_v0, %v3393_v40  ;;  %v2969_v21 = vadd.s32 %v2968_v44, %v2967_v19 }
 0x203   :  { %v2551_v47 = vcombine.high %v2549_v18, %v2549_v18  ;;  %v2565_v63 = vrot.slane %v2549_v18, %v3393_v40  ;;  %v2572_v29 = vrot.slane %v2550_v60, %v3393_v40  ;;  %v2580_v14 = vcombine.high %v2558_v16, %v2558_v16 }
 0x204   :  { %v2585_v34 = vrot.slane %v2558_v16, %v3277_v10  ;;  %v2971_v27 = vsel %vm2970_vm10, %v2969_v21, %v4827_v33 }
 0x205   :  { %v2579_v23 = vrot.slane %v2551_v47, %v3393_v40  ;;  %v2581_v3 = vcombine.high %v2572_v29, %v2572_v29  ;;  %v2589_v30 = vrot.slane %v2572_v29, %v3277_v10  ;;  %v2593_v5 = vrot.slane %v2580_v14, %v3277_v10 }
 0x206   :  { %v2601_v32 = vrot.slane %v2565_v63, %v3277_v10  ;;  %v2612_v55 = vadd.f32 %v2585_v34, %v4545_v20  ;;  %v2973_v17 = vsel %vm2972_vm2, %v2971_v27, 5  ;;  %v2980_v39 = vrot.slane %v2971_v27, %v3277_v10 }
 0x207   :  { %v2597_v50 = vrot.slane %v2581_v3, %v3277_v10  ;;  %v2605_v1 = vrot.slane %v2579_v23, %v3277_v10  ;;  %v2613_v57 = vadd.f32 %v2589_v30, %v4550_v48  ;;  %3067 = vst.msk [vmem:[%s5024_s5 + $0x1] sm:$0x1] %vm100_vm5, %v2973_v17  ;;  %v2614_v20 = vadd.f32 %v2593_v5, %v4553_v26 }
 0x208   :  { %v2616_v40 = vadd.f32 %v2601_v32, %v4565_v46  ;;  %vm2981_vm3 = vcmp.eq.s32.totalorder %v5162_v7, %v2980_v39  ;;  %v2618_v10 = vsel %vm192_vm11, %v2612_v55, -inf }
 0x209   :  { %v2615_v49 = vadd.f32 %v2597_v50, %v4561_v62  ;;  %v2617_v13 = vadd.f32 %v2605_v1, %v4576_v37  ;;  %v2982_v61 = vsel %vm2981_vm3, %v2976_v45, 0  ;;  %v2619_v56 = vsel %vm192_vm11, %v2613_v57, -inf }
 0x20a   :  { %v2622_v48 = vsel %vm192_vm11, %v2616_v40, -inf  ;;  %v2983_v7 = vsel %vm192_vm11, %v2982_v61, 0  ;;  %v2620_v62 = vsel %vm192_vm11, %v2614_v20, -inf }
 0x20b   :  { %v2621_v42 = vsel %vm192_vm11, %v2615_v49, -inf  ;;  %v2624_v46 = vsel %vm192_vm11, %v2617_v13, -inf  ;;  %v2623_v2 = vmax.f32 %v2618_v10, %v2622_v48  ;;  %v2984_v38 = vrot.slane %v2983_v7, 4 }
 0x20c   :  { %v2625_v26 = vmax.f32 %v2619_v56, %v2624_v46  ;;  %v2627_v53 = vmax.f32 %v2620_v62, %v2621_v42 }
 0x20d   :  { %v2985_v4 = vadd.s32 %v2984_v38, %v2983_v7 }
 0x20e   :  { %v2626_v37 = vmax.f32 %v2623_v2, %v2625_v26 }
 0x20f   :  { %v2986_v22 = vrot.slane %v2985_v4, 2 }
 0x210   :  { %v2628_v36 = vmax.f32 %v2626_v37, %v2627_v53 }
 0x211   :  { %v2987_v35 = vadd.s32 %v2986_v22, %v2985_v4 }
 0x212   :  { %v2629_v15 = vsub.f32 %v2612_v55, %v2628_v36  ;;  %v2630_v43 = vsub.f32 %v2613_v57, %v2628_v36  ;;  %v2631_v24 = vsub.f32 %v2614_v20, %v2628_v36  ;;  %v2632_v41 = vsub.f32 %v2615_v49, %v2628_v36 }
 0x213   :  { %v2633_v8 = vsub.f32 %v2616_v40, %v2628_v36  ;;  %v2634_v31 = vsub.f32 %v2617_v13, %v2628_v36  ;;  %v2988_v25 = vrot.slane %v2987_v35, 1 }
 0x214   :  { %v2635_v9 = vmul.f32 1.442695, %v2629_v15  ;;  %v2637_v59 = vmul.f32 1.442695, %v2630_v43  ;;  %v2639_v12 = vmul.f32 1.442695, %v2631_v24 }
 0x215   :  { %v2641_v51 = vmul.f32 1.442695, %v2632_v41  ;;  %v2643_v19 = vmul.f32 1.442695, %v2633_v8  ;;  %v2989_v28 = vadd.s32 %v2988_v25, %v2987_v35  ;;  %v2645_v0 = vmul.f32 1.442695, %v2634_v31 }
 0x216   :  { %3163 = vpow2.f32 %v2635_v9 }
 0x217   :  { %3165 = vpow2.f32 %v2637_v59  ;;  %v2991_v44 = vsel %vm2990_vm12, %v2989_v28, %v4827_v33 }
 0x218   :  { %3167 = vpow2.f32 %v2639_v12  ;;  %v2993_v18 = vsel %vm2992_vm9, %v2991_v44, 5 }
 0x219   :  { %3169 = vpow2.f32 %v2641_v51  ;;  %2994 = vst.msk [vmem:[%s5024_s5] sm:$0x1] %vm100_vm5, %v2993_v18  ;;  %s3213_s5 = smov [#allocation3]  }
 0x21a   :  { %3171 = vpow2.f32 %v2643_v19  ;;  %s3003_s13 = sshll.u32 %s3213_s5, 4  ;;  %s3004_s13 = int_to_ptr.vmem [resolvable:$true] %s3003_s13 }
 0x21b   :  { %3173 = vpow2.f32 %v2645_v0  ;;  %s3185_s14 = scalar_lea.vmem %s3004_s13, 16  ;;  %s3189_s15 = scalar_lea.vmem %s3004_s13, 32 }
 0x21c   :  { %p3186_p0 = scmp.ne.s32.totalorder %s3004_s13, %s3185_s14  ;;  %p3190_p1 = scmp.lt.s32.totalorder %s3004_s13, %s3004_s13 }
 0x21d   :  { %p3191_p2 = scmp.lt.s32.totalorder %s3189_s15, %s3185_s14 }
 0x21f   :  { %p3192_p3 = por %p3191_p2, %p3190_p1 }
 0x220   :  { %v3164_v60 = vpop.eup %3163 }
 0x221   :  { %v3166_v16 = vpop.eup %3165  ;;  %v2647_v21 = vsel %vm192_vm11, %v3164_v60, 0.0  ;;  %p3193_p4 = pnand %p3192_p3, %p3186_p0 }
 0x222   :  { %v3168_v47 = vpop.eup %3167  ;;  %v2648_v63 = vsel %vm192_vm11, %v3166_v16, 0.0 }
 0x223   :  { %v3170_v58 = vpop.eup %3169  ;;  %v2649_v29 = vadd.f32 %v2648_v63, %v2647_v21  ;;  %v2650_v14 = vsel %vm192_vm11, %v3168_v47, 0.0 }
 0x224   :  { %v3172_v33 = vpop.eup %3171  ;;  %v2652_v27 = vsel %vm192_vm11, %v3170_v58, 0.0 }
 0x225   :  { %v2651_v34 = vadd.f32 %v2650_v14, %v2649_v29  ;;  %v3174_v23 = vpop.eup %3173  ;;  %v2654_v30 = vsel %vm192_vm11, %v3172_v33, 0.0 }
 0x226   :  { %v2656_v32 = vsel %vm192_vm11, %v3174_v23, 0.0 }
 0x227   :  { %v2653_v3 = vadd.f32 %v2652_v27, %v2651_v34 }
 0x229   :  { %v2655_v5 = vadd.f32 %v2654_v30, %v2653_v3 }
 0x22b   :  { %v2657_v55 = vadd.f32 %v2656_v32, %v2655_v5 }
 0x22d   :  { %3175 = vlog2.f32 %v2657_v55 }
 0x237   :  { %v3176_v17 = vpop.eup %3175 }
 0x238   :  { %v2659_v39 = vmul.f32 0.6931472, %v3176_v17 }
 0x23a   :  { %v2660_v50 = vadd.f32 %v2659_v39, %v2628_v36 }
 0x23c   :  { %v2666_v1 = vsel %vm4760_vm15, %v2660_v50, %v4947_v54 }
 0x23d   :  { %v2814_v57 = vadd.f32 %v4722_v11, %v2666_v1 }
 0x23f   :  { %v2815_v40 = vsel %vm192_vm11, %v2814_v57, -inf }
 0x240   :  { %v2816_v20 = vrot.slane %v2815_v40, 4 }
 0x242   :  { %v2817_v49 = vmax.f32 %v2815_v40, %v2816_v20 }
 0x244   :  { %v2818_v13 = vrot.slane %v2817_v49, 2 }
 0x246   :  { %v2819_v45 = vmax.f32 %v2817_v49, %v2818_v13 }
 0x248   :  { %v2820_v10 = vrot.slane %v2819_v45, 1 }
 0x24a   :  { %v2821_v48 = vmax.f32 %v2819_v45, %v2820_v10 }
 0x24c   :  { %v2822_v61 = vsub.f32 %v2814_v57, %v2821_v48 }
 0x24e   :  { %v2823_v56 = vmul.f32 1.442695, %v2822_v61 }
 0x250   :  { %3177 = vpow2.f32 %v2823_v56 }
 0x25a   :  { %v3178_v42 = vpop.eup %3177 }
 0x25b   :  { %v2825_v46 = vsel %vm192_vm11, %v3178_v42, 0.0 }
 0x25c   :  { %v2826_v7 = vrot.slane %v2825_v46, 4 }
 0x25e   :  { %v2827_v2 = vadd.f32 %v2826_v7, %v2825_v46 }
 0x260   :  { %v2828_v6 = vrot.slane %v2827_v2, 2 }
 0x262   :  { %v2829_v54 = vadd.f32 %v2828_v6, %v2827_v2 }
 0x264   :  { %v2830_v26 = vrot.slane %v2829_v54, 1 }
 0x266   :  { %v2831_v11 = vadd.f32 %v2830_v26, %v2829_v54 }
 0x268   :  { %3179 = vlog2.f32 %v2831_v11 }
 0x272   :  { %v3180_v38 = vpop.eup %3179 }
 0x273   :  { %v2833_v62 = vmul.f32 0.6931472, %v3180_v38 }
 0x275   :  { %v2834_v37 = vadd.f32 %v2833_v62, %v2821_v48 }
 0x277   :  { %v2835_v53 = vsub.f32 %v2834_v37, %v4783_v52 }
 0x279   :  { %2836 = vst.msk [vmem:[#allocation3] sm:$0x1] %vm100_vm5, %v2835_v53 }
 0x27a   :  { %3196 = shalt.err (!%p3193_p4)
}
 0x27b   :  { %s3197_s17 = scalar_lea.hbm %s5025_s6, 16 }
 0x27c   :  { %p3198_p5 = scmp.ne.s32.totalorder %s5025_s6, %s3197_s17  ;;  %p3201_p6 = scmp.lt.u32.totalorder %s3197_s17, %s5025_s6 }
 0x27e   :  { %p3203_p7 = pnand %p3201_p6, %p3198_p5 }
 0x280   :  { %3206 = shalt.err (!%p3203_p7)
}
 0x281   :  { %3006 = dma.vmem_to_hbm [thread:$0]  %s3004_s13, 16, %s5025_s6, [#allocation4]  }
 0x282   :  { %3207 = dma.done.wait [#allocation4], 16  }
 0x283   :  { %3208 = vsyncadd [#allocation4], 4294967280 }
 0x284   :  { %3012 = vsyncpa [#allocation4], 1 }

</bundles_post_ra>
